<compile_context>
chip_gen: v7x
topology: tpu7x:2x2x1
jax: 0.10.0
libtpu: 0.0.40
codegen_flags: <defaults>
</compile_context>

<pallas_src>
import functools

import jax
import jax.numpy as jnp
import numpy as np
from jax.experimental import pallas as pl
from jax.experimental.pallas import tpu as pltpu


# ------------------------------ fused kernel -------------------------------

def nutty_kernel(x1_ref, w1_ref, b1_ref, w2_ref, b2_ref, w3_ref, b3_ref,
                 wf1_ref, bf1_ref, wf2_ref, bf2_ref, o_ref,
                 hp1_ref, hp2_ref, hp3_ref, xrow2_ref, xrow3_ref, *, bs):
    """Full Nutty forward for one batch block of `bs` samples.

    x1_ref:    (bs, 1024, 75)  bf16  stage-1 im2col (row = h*32+w, col = (kh*5+kw)*3+ci)
    w1_ref:    (75, 32)        bf16
    w2_ref:    (5, 160, 32)    bf16  [kh, kw*32+ci, co]
    w3_ref:    (5, 160, 64)    bf16
    wf1_ref:   (16, 64, 64)    bf16  [p=h*4+w, c, n]
    wf2_ref:   (64, 128)       bf16  (padded from 64x10)
    biases:    f32, shape (1, N)
    o_ref:     (1, bs, 128)    f32   logits (cols 10..127 are zero)
    hp*_ref:   f32 scratch for H-pooled rows of each stage
    xrow*_ref: f32 scratch holding the (kw,Cin)-packed padded rows of stages 2/3
    """
    f32, bf16 = jnp.float32, jnp.bfloat16

    # ---- stage 1: conv 3->32 on 32x32 (pre-packed im2col, K=75) + 2x2 pool ----
    lhs1 = x1_ref[...].reshape(bs * 1024, 75)                       # bf16
    a1 = jnp.dot(lhs1, w1_ref[...], preferred_element_type=f32) + b1_ref[...]
    a1 = a1.reshape(bs, 16, 2, 32, 32)                              # (b, ho, hpar, w, c)
    hp1_ref[...] = jnp.maximum(a1[:, :, 0], a1[:, :, 1]).reshape(bs * 512, 32)
    p1 = jnp.maximum(hp1_ref[pl.ds(0, bs * 256, stride=2), :],
                     hp1_ref[pl.ds(1, bs * 256, stride=2), :])      # (bs*256, 32) f32

    # ---- stage 2: conv 32->32 on 16x16, (kw,Cin) folded into K=160 -----------
    xrow2_ref[...] = jnp.zeros(xrow2_ref.shape, f32)                # zero border
    p1r = p1.reshape(bs, 16, 16, 32)
    for kw in range(5):
        lo_d, hi_d = max(0, 2 - kw), min(16, 18 - kw)
        lo_s, hi_s = lo_d + kw - 2, hi_d + kw - 2
        xrow2_ref[:, 2:18, lo_d:hi_d, kw * 32:(kw + 1) * 32] = \
            p1r[:, :, lo_s:hi_s, :]
    xrow2 = xrow2_ref[...].astype(bf16)                             # single cast
    acc2 = jnp.dot(xrow2[:, 0:16].reshape(bs * 256, 160), w2_ref[0],
                   preferred_element_type=f32)
    for kh in range(1, 5):
        acc2 = acc2 + jnp.dot(xrow2[:, kh:kh + 16].reshape(bs * 256, 160),
                              w2_ref[kh], preferred_element_type=f32)
    acc2 = (acc2 + b2_ref[...]).reshape(bs, 8, 2, 16, 32)
    hp2_ref[...] = jnp.maximum(acc2[:, :, 0], acc2[:, :, 1]).reshape(bs * 128, 32)
    p2 = jnp.maximum(hp2_ref[pl.ds(0, bs * 64, stride=2), :],
                     hp2_ref[pl.ds(1, bs * 64, stride=2), :])       # (bs*64, 32) f32

    # ---- stage 3: conv 32->64 on 8x8, K=160 ----------------------------------
    xrow3_ref[...] = jnp.zeros(xrow3_ref.shape, f32)
    p2r = p2.reshape(bs, 8, 8, 32)
    for kw in range(5):
        lo_d, hi_d = max(0, 2 - kw), min(8, 10 - kw)
        lo_s, hi_s = lo_d + kw - 2, hi_d + kw - 2
        xrow3_ref[:, 2:10, lo_d:hi_d, kw * 32:(kw + 1) * 32] = \
            p2r[:, :, lo_s:hi_s, :]
    xrow3 = xrow3_ref[...].astype(bf16)
    acc3 = jnp.dot(xrow3[:, 0:8].reshape(bs * 64, 160), w3_ref[0],
                   preferred_element_type=f32)
    for kh in range(1, 5):
        acc3 = acc3 + jnp.dot(xrow3[:, kh:kh + 8].reshape(bs * 64, 160),
                              w3_ref[kh], preferred_element_type=f32)
    acc3 = (acc3 + b3_ref[...]).reshape(bs, 4, 2, 8, 64)
    hp3_ref[...] = jnp.maximum(acc3[:, :, 0], acc3[:, :, 1]).reshape(bs * 32, 64)
    p3 = jnp.maximum(hp3_ref[pl.ds(0, bs * 16, stride=2), :],
                     hp3_ref[pl.ds(1, bs * 16, stride=2), :])       # (bs*16, 64) f32

    # ---- FC: Linear(1024,64) as 16 per-position 64x64 matmuls, then 64->128 --
    p3r = p3.astype(bf16).reshape(bs, 16, 64)
    h = jnp.dot(p3r[:, 0, :], wf1_ref[0], preferred_element_type=f32)
    for pos in range(1, 16):
        h = h + jnp.dot(p3r[:, pos, :], wf1_ref[pos], preferred_element_type=f32)
    h = h + bf1_ref[...]
    logits = jnp.dot(h.astype(bf16), wf2_ref[...],
                     preferred_element_type=f32) + bf2_ref[...]     # (bs, 128)
    o_ref[0] = logits


# ------------------------------- wrappers ----------------------------------

def _pick_bs(B):
    """Largest batch block <= 8 dividing B; prefer >= 2 grid steps (v7x cores)."""
    divs = [d for d in (8, 4, 2, 1) if B % d == 0]
    bs = divs[0]
    if B // bs < 2:
        for d in divs:
            if B // d >= 2:
                bs = d
                break
    return bs


def nutty_fused(x1, prep):
    """x1: (B, 1024, 75) bf16 packed stage-1 patches -> (B, 10) f32 logits."""
    B = x1.shape[0]
    bs = _pick_bs(B)
    kernel = functools.partial(nutty_kernel, bs=bs)
    out = pl.pallas_call(
        kernel,
        out_shape=jax.ShapeDtypeStruct((B // bs, bs, 128), jnp.float32),
        grid=(B // bs,),
        in_specs=[
            pl.BlockSpec((bs, 1024, 75), lambda i: (i, 0, 0)),   # stage-1 im2col
            pl.BlockSpec((75, 32), lambda i: (0, 0)),
            pl.BlockSpec((1, 32), lambda i: (0, 0)),
            pl.BlockSpec((5, 160, 32), lambda i: (0, 0, 0)),
            pl.BlockSpec((1, 32), lambda i: (0, 0)),
            pl.BlockSpec((5, 160, 64), lambda i: (0, 0, 0)),
            pl.BlockSpec((1, 64), lambda i: (0, 0)),
            pl.BlockSpec((16, 64, 64), lambda i: (0, 0, 0)),
            pl.BlockSpec((1, 64), lambda i: (0, 0)),
            pl.BlockSpec((64, 128), lambda i: (0, 0)),
            pl.BlockSpec((1, 128), lambda i: (0, 0)),
        ],
        out_specs=pl.BlockSpec((1, bs, 128), lambda i: (i, 0, 0)),
        scratch_shapes=[
            pltpu.VMEM((bs * 512, 32), jnp.float32),     # stage-1 H-pooled rows
            pltpu.VMEM((bs * 128, 32), jnp.float32),     # stage-2 H-pooled rows
            pltpu.VMEM((bs * 32, 64), jnp.float32),      # stage-3 H-pooled rows
            pltpu.VMEM((bs, 20, 16, 160), jnp.float32),  # stage-2 kw-packed rows
            pltpu.VMEM((bs, 12, 8, 160), jnp.float32),   # stage-3 kw-packed rows
        ],
        compiler_params=pltpu.CompilerParams(
            dimension_semantics=("parallel",),
            vmem_limit_bytes=48 * 1024 * 1024),
    )(x1, prep["w1"], prep["b1"], prep["w2"], prep["b2"],
      prep["w3"], prep["b3"], prep["wf1"], prep["bf1"],
      prep["wf2"], prep["bf2"])
    return out.reshape(B, 128)[:, :10]


def nutty_forward(x_nchw, prep):
    """Forward pass of Nutty.  x_nchw: (B, 3, 32, 32) f32 -> (B, 10) f32."""
    B = x_nchw.shape[0]
    x = jnp.transpose(x_nchw, (0, 2, 3, 1)).astype(jnp.bfloat16)    # NHWC, bf16 once
    xpad = jnp.pad(x, ((0, 0), (2, 2), (2, 2), (0, 0)))
    cols = [xpad[:, kh:kh + 32, kw:kw + 32, :]
            for kh in range(5) for kw in range(5)]
    x1 = jnp.concatenate(cols, axis=-1).reshape(B, 1024, 75)        # im2col, K=(kh,kw,ci)
    return nutty_fused(x1, prep)


# ------------------------------- parameters --------------------------------

def init_params():
    """PyTorch-default-style parameters in PyTorch layouts (f32)."""
    key = jax.random.PRNGKey(42)
    ks = jax.random.split(key, 10)

    def u(k, shape, fan_in):
        bound = 1.0 / np.sqrt(fan_in)
        return jax.random.uniform(k, shape, jnp.float32, -bound, bound)

    return {
        "w1": u(ks[0], (32, 3, 5, 5), 3 * 25),   "b1": u(ks[1], (32,), 3 * 25),
        "w2": u(ks[2], (32, 32, 5, 5), 32 * 25), "b2": u(ks[3], (32,), 32 * 25),
        "w3": u(ks[4], (64, 32, 5, 5), 32 * 25), "b3": u(ks[5], (64,), 32 * 25),
        "wf1": u(ks[6], (64, 1024), 1024), "bf1": u(ks[7], (64,), 1024),
        "wf2": u(ks[8], (10, 64), 64),     "bf2": u(ks[9], (10,), 64),
    }


def prepare_params(p):
    """One-time parameter re-layout, hoisted out of the per-step forward."""
    def conv_w_kwpack(w):                       # (Cout, Cin, 5, 5) -> (5, 5*Cin, Cout)
        cout, cin = w.shape[0], w.shape[1]
        w = jnp.transpose(w, (2, 3, 1, 0))      # (kh, kw, ci, co)
        return w.reshape(5, 5 * cin, cout).astype(jnp.bfloat16)

    # stage-1 weights fully folded:  (kh*5+kw)*3+ci  x  co
    w1p = jnp.transpose(p["w1"], (2, 3, 1, 0)).reshape(75, 32).astype(jnp.bfloat16)

    # fc1 permuted to (p = h*4+w, c, n) so it matches the kernel's channels-last flatten
    wf1 = p["wf1"].reshape(64, 64, 4, 4)                       # (n, c, h, w)
    wf1 = jnp.transpose(wf1, (2, 3, 1, 0)).reshape(16, 64, 64)

    # fc2 transposed and zero-padded to 128 output lanes (unmasked final store)
    wf2 = jnp.pad(jnp.transpose(p["wf2"]), ((0, 0), (0, 118)))
    bf2 = jnp.pad(p["bf2"], (0, 118)).reshape(1, 128)

    return {
        "w1": w1p, "b1": p["b1"].reshape(1, -1),
        "w2": conv_w_kwpack(p["w2"]), "b2": p["b2"].reshape(1, -1),
        "w3": conv_w_kwpack(p["w3"]), "b3": p["b3"].reshape(1, -1),
        "wf1": wf1.astype(jnp.bfloat16), "bf1": p["bf1"].reshape(1, -1),
        "wf2": wf2.astype(jnp.bfloat16), "bf2": bf2,
    }


# --------------------------- pure-JAX references ---------------------------

def reference_forward_f32(x, p):
    """Pure-f32 XLA reference implementing the PyTorch module verbatim."""
    def conv(x, w, b):
        y = jax.lax.conv_general_dilated(
            x, w, window_strides=(1, 1), padding=((2, 2), (2, 2)),
            dimension_numbers=("NCHW", "OIHW", "NCHW"))
        return y + b.reshape(1, -1, 1, 1)

    def pool(x):
        return jax.lax.reduce_window(x, -jnp.inf, jax.lax.max,
                                     (1, 1, 2, 2), (1, 1, 2, 2), "VALID")

    h = pool(conv(x, p["w1"], p["b1"]))
    h = pool(conv(h, p["w2"], p["b2"]))
    h = pool(conv(h, p["w3"], p["b3"]))
    h = h.reshape(x.shape[0], -1)
    h = h @ p["wf1"].T + p["bf1"]
    return h @ p["wf2"].T + p["bf2"]


def reference_forward_bf16_matched(x, p):
    """XLA reference with the same rounding points as the Pallas path
    (bf16 matmul operands, f32 accumulation / bias / pool) -> tight check."""
    def conv(x, w, b):
        y = jax.lax.conv_general_dilated(
            x.astype(jnp.bfloat16), w.astype(jnp.bfloat16),
            window_strides=(1, 1), padding=((2, 2), (2, 2)),
            dimension_numbers=("NCHW", "OIHW", "NCHW"),
            preferred_element_type=jnp.float32)
        return y + b.reshape(1, -1, 1, 1)

    def pool(x):
        return jax.lax.reduce_window(x, -jnp.inf, jax.lax.max,
                                     (1, 1, 2, 2), (1, 1, 2, 2), "VALID")

    h = pool(conv(x, p["w1"], p["b1"]))
    h = pool(conv(h, p["w2"], p["b2"]))
    h = pool(conv(h, p["w3"], p["b3"]))
    feat = h.reshape(x.shape[0], -1)
    h1 = jnp.dot(feat.astype(jnp.bfloat16), p["wf1"].T.astype(jnp.bfloat16),
                 preferred_element_type=jnp.float32) + p["bf1"]
    return jnp.dot(h1.astype(jnp.bfloat16), p["wf2"].T.astype(jnp.bfloat16),
                   preferred_element_type=jnp.float32) + p["bf2"]


if __name__ == "__main__":
    params = init_params()
    prep = prepare_params(params)   # one-time weight re-layout (not per step)

    # Linear(1024, 64) == 64 ch * 4 * 4 after three 2x2 pools => input is 3x32x32.
    x = jax.random.normal(jax.random.PRNGKey(0), (2, 3, 32, 32), jnp.float32)

    out = jax.block_until_ready(jax.jit(nutty_forward)(x, prep))
    assert out.shape == (2, 10) and out.dtype == jnp.float32

    # Tight check vs an XLA reference with identical rounding points.
    ref_matched = reference_forward_bf16_matched(x, params)
    np.testing.assert_allclose(np.asarray(out), np.asarray(ref_matched),
                               rtol=5e-3, atol=5e-3)

    # End-to-end fidelity vs the pure-f32 PyTorch-equivalent reference
    # (looser: the Pallas path uses bf16 MXU operands by design).
    ref_f32 = reference_forward_f32(x, params)
    np.testing.assert_allclose(np.asarray(out), np.asarray(ref_f32),
                               rtol=5e-2, atol=5e-2)

    print("KERNEL_OK")
</pallas_src>

<mosaic_0001>
module attributes {stable_mosaic.version = 11 : i64} {
  func.func @nutty_kernel(%arg0: i32, %arg1: memref<1x1024x75xbf16, #tpu.memory_space<vmem>>, %arg2: memref<75x32xbf16, #tpu.memory_space<vmem>>, %arg3: memref<1x32xf32, #tpu.memory_space<vmem>>, %arg4: memref<5x160x32xbf16, #tpu.memory_space<vmem>>, %arg5: memref<1x32xf32, #tpu.memory_space<vmem>>, %arg6: memref<5x160x64xbf16, #tpu.memory_space<vmem>>, %arg7: memref<1x64xf32, #tpu.memory_space<vmem>>, %arg8: memref<16x64x64xbf16, #tpu.memory_space<vmem>>, %arg9: memref<1x64xf32, #tpu.memory_space<vmem>>, %arg10: memref<64x128xbf16, #tpu.memory_space<vmem>>, %arg11: memref<1x128xf32, #tpu.memory_space<vmem>>, %arg12: memref<1x1x128xf32, #tpu.memory_space<vmem>>, %arg13: memref<512x32xf32, #tpu.memory_space<vmem>>, %arg14: memref<128x32xf32, #tpu.memory_space<vmem>>, %arg15: memref<32x64xf32, #tpu.memory_space<vmem>>, %arg16: memref<1x20x16x160xf32, #tpu.memory_space<vmem>>, %arg17: memref<1x12x8x160xf32, #tpu.memory_space<vmem>>) attributes {dimension_semantics = [#tpu.dimension_semantics<parallel>], iteration_bounds = array<i64: 2>, scalar_prefetch = 0 : i64, scratch_operands = 5 : i64, tpu.core_type = #tpu.core_type<tc>, window_params = [{transform_indices = @transform_0, window_bounds = array<i64: 1, 1024, 75>}, {pipeline_mode = #tpu.pipeline_mode<synchronous>, transform_indices = @transform_1, window_bounds = array<i64: 75, 32>}, {pipeline_mode = #tpu.pipeline_mode<synchronous>, transform_indices = @transform_2, window_bounds = array<i64: 1, 32>}, {pipeline_mode = #tpu.pipeline_mode<synchronous>, transform_indices = @transform_3, window_bounds = array<i64: 5, 160, 32>}, {pipeline_mode = #tpu.pipeline_mode<synchronous>, transform_indices = @transform_4, window_bounds = array<i64: 1, 32>}, {pipeline_mode = #tpu.pipeline_mode<synchronous>, transform_indices = @transform_5, window_bounds = array<i64: 5, 160, 64>}, {pipeline_mode = #tpu.pipeline_mode<synchronous>, transform_indices = @transform_6, window_bounds = array<i64: 1, 64>}, {pipeline_mode = #tpu.pipeline_mode<synchronous>, transform_indices = @transform_7, window_bounds = array<i64: 16, 64, 64>}, {pipeline_mode = #tpu.pipeline_mode<synchronous>, transform_indices = @transform_8, window_bounds = array<i64: 1, 64>}, {pipeline_mode = #tpu.pipeline_mode<synchronous>, transform_indices = @transform_9, window_bounds = array<i64: 64, 128>}, {pipeline_mode = #tpu.pipeline_mode<synchronous>, transform_indices = @transform_10, window_bounds = array<i64: 1, 128>}, {transform_indices = @transform_11, window_bounds = array<i64: 1, 1, 128>}]} {
    %c0 = arith.constant 0 : index
    %c0_0 = arith.constant 0 : index
    %c0_1 = arith.constant 0 : index
    %0 = vector.load %arg1[%c0, %c0_0, %c0_1] : memref<1x1024x75xbf16, #tpu.memory_space<vmem>>, vector<1x1024x75xbf16>
    %1 = vector.shape_cast %0 : vector<1x1024x75xbf16> to vector<1024x75xbf16>
    %c0_2 = arith.constant 0 : index
    %c0_3 = arith.constant 0 : index
    %2 = vector.load %arg2[%c0_2, %c0_3] : memref<75x32xbf16, #tpu.memory_space<vmem>>, vector<75x32xbf16>
    %cst = arith.constant dense<0.000000e+00> : vector<1024x32xf32>
    %3 = tpu.matmul %1, %2, %cst {dimension_numbers = #tpu.dot_dimension_numbers<[1], [0], [0], [1], [0, 0, 1, 1], [], []>} : vector<1024x75xbf16>, vector<75x32xbf16>, vector<1024x32xf32> -> vector<1024x32xf32>
    %c0_4 = arith.constant 0 : index
    %c0_5 = arith.constant 0 : index
    %4 = vector.load %arg3[%c0_4, %c0_5] : memref<1x32xf32, #tpu.memory_space<vmem>>, vector<1x32xf32>
    %5 = vector.broadcast %4 : vector<1x32xf32> to vector<1024x32xf32>
    %6 = arith.addf %3, %5 : vector<1024x32xf32>
    %7 = vector.shape_cast %6 : vector<1024x32xf32> to vector<1x16x2x32x32xf32>
    %8 = vector.extract_strided_slice %7 {offsets = [0, 0, 0, 0, 0], sizes = [1, 16, 1, 32, 32], strides = [1, 1, 1, 1, 1]} : vector<1x16x2x32x32xf32> to vector<1x16x1x32x32xf32>
    %9 = vector.shape_cast %8 : vector<1x16x1x32x32xf32> to vector<1x16x32x32xf32>
    %10 = vector.extract_strided_slice %7 {offsets = [0, 0, 1, 0, 0], sizes = [1, 16, 1, 32, 32], strides = [1, 1, 1, 1, 1]} : vector<1x16x2x32x32xf32> to vector<1x16x1x32x32xf32>
    %11 = vector.shape_cast %10 : vector<1x16x1x32x32xf32> to vector<1x16x32x32xf32>
    %12 = arith.maximumf %9, %11 : vector<1x16x32x32xf32>
    %13 = vector.shape_cast %12 : vector<1x16x32x32xf32> to vector<512x32xf32>
    %c0_6 = arith.constant 0 : index
    %c0_7 = arith.constant 0 : index
    %14 = vector.load %arg13[%c0_6, %c0_7] : memref<512x32xf32, #tpu.memory_space<vmem>>, vector<512x32xf32>
    tpu.vector_store %arg13[%c0_6, %c0_7], %13 {strides = array<i32>} : memref<512x32xf32, #tpu.memory_space<vmem>>, vector<512x32xf32>,
    %c0_8 = arith.constant 0 : index
    %c0_9 = arith.constant 0 : index
    %15 = tpu.strided_load %arg13[%c0_8, %c0_9] {strides = array<i32: 2, 1>} : memref<512x32xf32, #tpu.memory_space<vmem>>, vector<256x32xf32>
    %c1 = arith.constant 1 : index
    %c0_10 = arith.constant 0 : index
    %16 = tpu.strided_load %arg13[%c1, %c0_10] {strides = array<i32: 2, 1>} : memref<512x32xf32, #tpu.memory_space<vmem>>, vector<256x32xf32>
    %17 = arith.maximumf %15, %16 : vector<256x32xf32>
    %cst_11 = arith.constant 0.000000e+00 : f32
    %18 = vector.broadcast %cst_11 : f32 to vector<1x20x16x160xf32>
    %c0_12 = arith.constant 0 : index
    %c0_13 = arith.constant 0 : index
    %c0_14 = arith.constant 0 : index
    %c0_15 = arith.constant 0 : index
    %19 = vector.load %arg16[%c0_12, %c0_13, %c0_14, %c0_15] : memref<1x20x16x160xf32, #tpu.memory_space<vmem>>, vector<1x20x16x160xf32>
    tpu.vector_store %arg16[%c0_12, %c0_13, %c0_14, %c0_15], %18 {strides = array<i32>} : memref<1x20x16x160xf32, #tpu.memory_space<vmem>>, vector<1x20x16x160xf32>,
    %20 = vector.shape_cast %17 : vector<256x32xf32> to vector<1x16x16x32xf32>
    %21 = vector.extract_strided_slice %20 {offsets = [0, 0, 0, 0], sizes = [1, 16, 14, 32], strides = [1, 1, 1, 1]} : vector<1x16x16x32xf32> to vector<1x16x14x32xf32>
    %c0_16 = arith.constant 0 : index
    %c2 = arith.constant 2 : index
    %c2_17 = arith.constant 2 : index
    %c0_18 = arith.constant 0 : index
    %22 = vector.load %arg16[%c0_16, %c2, %c2_17, %c0_18] : memref<1x20x16x160xf32, #tpu.memory_space<vmem>>, vector<1x16x14x32xf32>
    tpu.vector_store %arg16[%c0_16, %c2, %c2_17, %c0_18], %21 {strides = array<i32>} : memref<1x20x16x160xf32, #tpu.memory_space<vmem>>, vector<1x16x14x32xf32>,
    %23 = vector.extract_strided_slice %20 {offsets = [0, 0, 0, 0], sizes = [1, 16, 15, 32], strides = [1, 1, 1, 1]} : vector<1x16x16x32xf32> to vector<1x16x15x32xf32>
    %c0_19 = arith.constant 0 : index
    %c2_20 = arith.constant 2 : index
    %c1_21 = arith.constant 1 : index
    %c32 = arith.constant 32 : index
    %24 = vector.load %arg16[%c0_19, %c2_20, %c1_21, %c32] : memref<1x20x16x160xf32, #tpu.memory_space<vmem>>, vector<1x16x15x32xf32>
    tpu.vector_store %arg16[%c0_19, %c2_20, %c1_21, %c32], %23 {strides = array<i32>} : memref<1x20x16x160xf32, #tpu.memory_space<vmem>>, vector<1x16x15x32xf32>,
    %c0_22 = arith.constant 0 : index
    %c2_23 = arith.constant 2 : index
    %c0_24 = arith.constant 0 : index
    %c64 = arith.constant 64 : index
    %25 = vector.load %arg16[%c0_22, %c2_23, %c0_24, %c64] : memref<1x20x16x160xf32, #tpu.memory_space<vmem>>, vector<1x16x16x32xf32>
    tpu.vector_store %arg16[%c0_22, %c2_23, %c0_24, %c64], %20 {strides = array<i32>} : memref<1x20x16x160xf32, #tpu.memory_space<vmem>>, vector<1x16x16x32xf32>,
    %26 = vector.extract_strided_slice %20 {offsets = [0, 0, 1, 0], sizes = [1, 16, 15, 32], strides = [1, 1, 1, 1]} : vector<1x16x16x32xf32> to vector<1x16x15x32xf32>
    %c0_25 = arith.constant 0 : index
    %c2_26 = arith.constant 2 : index
    %c0_27 = arith.constant 0 : index
    %c96 = arith.constant 96 : index
    %27 = vector.load %arg16[%c0_25, %c2_26, %c0_27, %c96] : memref<1x20x16x160xf32, #tpu.memory_space<vmem>>, vector<1x16x15x32xf32>
    tpu.vector_store %arg16[%c0_25, %c2_26, %c0_27, %c96], %26 {strides = array<i32>} : memref<1x20x16x160xf32, #tpu.memory_space<vmem>>, vector<1x16x15x32xf32>,
    %28 = vector.extract_strided_slice %20 {offsets = [0, 0, 2, 0], sizes = [1, 16, 14, 32], strides = [1, 1, 1, 1]} : vector<1x16x16x32xf32> to vector<1x16x14x32xf32>
    %c0_28 = arith.constant 0 : index
    %c2_29 = arith.constant 2 : index
    %c0_30 = arith.constant 0 : index
    %c128 = arith.constant 128 : index
    %29 = vector.load %arg16[%c0_28, %c2_29, %c0_30, %c128] : memref<1x20x16x160xf32, #tpu.memory_space<vmem>>, vector<1x16x14x32xf32>
    tpu.vector_store %arg16[%c0_28, %c2_29, %c0_30, %c128], %28 {strides = array<i32>} : memref<1x20x16x160xf32, #tpu.memory_space<vmem>>, vector<1x16x14x32xf32>,
    %c0_31 = arith.constant 0 : index
    %c0_32 = arith.constant 0 : index
    %c0_33 = arith.constant 0 : index
    %c0_34 = arith.constant 0 : index
    %30 = vector.load %arg16[%c0_31, %c0_32, %c0_33, %c0_34] : memref<1x20x16x160xf32, #tpu.memory_space<vmem>>, vector<1x20x16x160xf32>
    %31 = arith.truncf %30 : vector<1x20x16x160xf32> to vector<1x20x16x160xbf16>
    %32 = vector.extract_strided_slice %31 {offsets = [0, 0, 0, 0], sizes = [1, 16, 16, 160], strides = [1, 1, 1, 1]} : vector<1x20x16x160xbf16> to vector<1x16x16x160xbf16>
    %33 = vector.shape_cast %32 : vector<1x16x16x160xbf16> to vector<256x160xbf16>
    %c0_35 = arith.constant 0 : index
    %c0_36 = arith.constant 0 : index
    %c0_37 = arith.constant 0 : index
    %34 = vector.load %arg4[%c0_35, %c0_36, %c0_37] : memref<5x160x32xbf16, #tpu.memory_space<vmem>>, vector<1x160x32xbf16>
    %35 = vector.shape_cast %34 : vector<1x160x32xbf16> to vector<160x32xbf16>
    %cst_38 = arith.constant dense<0.000000e+00> : vector<256x32xf32>
    %36 = tpu.matmul %33, %35, %cst_38 {dimension_numbers = #tpu.dot_dimension_numbers<[1], [0], [0], [1], [0, 0, 1, 1], [], []>} : vector<256x160xbf16>, vector<160x32xbf16>, vector<256x32xf32> -> vector<256x32xf32>
    %37 = vector.extract_strided_slice %31 {offsets = [0, 1, 0, 0], sizes = [1, 16, 16, 160], strides = [1, 1, 1, 1]} : vector<1x20x16x160xbf16> to vector<1x16x16x160xbf16>
    %38 = vector.shape_cast %37 : vector<1x16x16x160xbf16> to vector<256x160xbf16>
    %c1_39 = arith.constant 1 : index
    %c0_40 = arith.constant 0 : index
    %c0_41 = arith.constant 0 : index
    %39 = vector.load %arg4[%c1_39, %c0_40, %c0_41] : memref<5x160x32xbf16, #tpu.memory_space<vmem>>, vector<1x160x32xbf16>
    %40 = vector.shape_cast %39 : vector<1x160x32xbf16> to vector<160x32xbf16>
    %cst_42 = arith.constant dense<0.000000e+00> : vector<256x32xf32>
    %41 = tpu.matmul %38, %40, %cst_42 {dimension_numbers = #tpu.dot_dimension_numbers<[1], [0], [0], [1], [0, 0, 1, 1], [], []>} : vector<256x160xbf16>, vector<160x32xbf16>, vector<256x32xf32> -> vector<256x32xf32>
    %42 = arith.addf %36, %41 : vector<256x32xf32>
    %43 = vector.extract_strided_slice %31 {offsets = [0, 2, 0, 0], sizes = [1, 16, 16, 160], strides = [1, 1, 1, 1]} : vector<1x20x16x160xbf16> to vector<1x16x16x160xbf16>
    %44 = vector.shape_cast %43 : vector<1x16x16x160xbf16> to vector<256x160xbf16>
    %c2_43 = arith.constant 2 : index
    %c0_44 = arith.constant 0 : index
    %c0_45 = arith.constant 0 : index
    %45 = vector.load %arg4[%c2_43, %c0_44, %c0_45] : memref<5x160x32xbf16, #tpu.memory_space<vmem>>, vector<1x160x32xbf16>
    %46 = vector.shape_cast %45 : vector<1x160x32xbf16> to vector<160x32xbf16>
    %cst_46 = arith.constant dense<0.000000e+00> : vector<256x32xf32>
    %47 = tpu.matmul %44, %46, %cst_46 {dimension_numbers = #tpu.dot_dimension_numbers<[1], [0], [0], [1], [0, 0, 1, 1], [], []>} : vector<256x160xbf16>, vector<160x32xbf16>, vector<256x32xf32> -> vector<256x32xf32>
    %48 = arith.addf %42, %47 : vector<256x32xf32>
    %49 = vector.extract_strided_slice %31 {offsets = [0, 3, 0, 0], sizes = [1, 16, 16, 160], strides = [1, 1, 1, 1]} : vector<1x20x16x160xbf16> to vector<1x16x16x160xbf16>
    %50 = vector.shape_cast %49 : vector<1x16x16x160xbf16> to vector<256x160xbf16>
    %c3 = arith.constant 3 : index
    %c0_47 = arith.constant 0 : index
    %c0_48 = arith.constant 0 : index
    %51 = vector.load %arg4[%c3, %c0_47, %c0_48] : memref<5x160x32xbf16, #tpu.memory_space<vmem>>, vector<1x160x32xbf16>
    %52 = vector.shape_cast %51 : vector<1x160x32xbf16> to vector<160x32xbf16>
    %cst_49 = arith.constant dense<0.000000e+00> : vector<256x32xf32>
    %53 = tpu.matmul %50, %52, %cst_49 {dimension_numbers = #tpu.dot_dimension_numbers<[1], [0], [0], [1], [0, 0, 1, 1], [], []>} : vector<256x160xbf16>, vector<160x32xbf16>, vector<256x32xf32> -> vector<256x32xf32>
    %54 = arith.addf %48, %53 : vector<256x32xf32>
    %55 = vector.extract_strided_slice %31 {offsets = [0, 4, 0, 0], sizes = [1, 16, 16, 160], strides = [1, 1, 1, 1]} : vector<1x20x16x160xbf16> to vector<1x16x16x160xbf16>
    %56 = vector.shape_cast %55 : vector<1x16x16x160xbf16> to vector<256x160xbf16>
    %c4 = arith.constant 4 : index
    %c0_50 = arith.constant 0 : index
    %c0_51 = arith.constant 0 : index
    %57 = vector.load %arg4[%c4, %c0_50, %c0_51] : memref<5x160x32xbf16, #tpu.memory_space<vmem>>, vector<1x160x32xbf16>
    %58 = vector.shape_cast %57 : vector<1x160x32xbf16> to vector<160x32xbf16>
    %cst_52 = arith.constant dense<0.000000e+00> : vector<256x32xf32>
    %59 = tpu.matmul %56, %58, %cst_52 {dimension_numbers = #tpu.dot_dimension_numbers<[1], [0], [0], [1], [0, 0, 1, 1], [], []>} : vector<256x160xbf16>, vector<160x32xbf16>, vector<256x32xf32> -> vector<256x32xf32>
    %60 = arith.addf %54, %59 : vector<256x32xf32>
    %c0_53 = arith.constant 0 : index
    %c0_54 = arith.constant 0 : index
    %61 = vector.load %arg5[%c0_53, %c0_54] : memref<1x32xf32, #tpu.memory_space<vmem>>, vector<1x32xf32>
    %62 = vector.broadcast %61 : vector<1x32xf32> to vector<256x32xf32>
    %63 = arith.addf %60, %62 : vector<256x32xf32>
    %64 = vector.shape_cast %63 : vector<256x32xf32> to vector<1x8x2x16x32xf32>
    %65 = vector.extract_strided_slice %64 {offsets = [0, 0, 0, 0, 0], sizes = [1, 8, 1, 16, 32], strides = [1, 1, 1, 1, 1]} : vector<1x8x2x16x32xf32> to vector<1x8x1x16x32xf32>
    %66 = vector.shape_cast %65 : vector<1x8x1x16x32xf32> to vector<1x8x16x32xf32>
    %67 = vector.extract_strided_slice %64 {offsets = [0, 0, 1, 0, 0], sizes = [1, 8, 1, 16, 32], strides = [1, 1, 1, 1, 1]} : vector<1x8x2x16x32xf32> to vector<1x8x1x16x32xf32>
    %68 = vector.shape_cast %67 : vector<1x8x1x16x32xf32> to vector<1x8x16x32xf32>
    %69 = arith.maximumf %66, %68 : vector<1x8x16x32xf32>
    %70 = vector.shape_cast %69 : vector<1x8x16x32xf32> to vector<128x32xf32>
    %c0_55 = arith.constant 0 : index
    %c0_56 = arith.constant 0 : index
    %71 = vector.load %arg14[%c0_55, %c0_56] : memref<128x32xf32, #tpu.memory_space<vmem>>, vector<128x32xf32>
    tpu.vector_store %arg14[%c0_55, %c0_56], %70 {strides = array<i32>} : memref<128x32xf32, #tpu.memory_space<vmem>>, vector<128x32xf32>,
    %c0_57 = arith.constant 0 : index
    %c0_58 = arith.constant 0 : index
    %72 = tpu.strided_load %arg14[%c0_57, %c0_58] {strides = array<i32: 2, 1>} : memref<128x32xf32, #tpu.memory_space<vmem>>, vector<64x32xf32>
    %c1_59 = arith.constant 1 : index
    %c0_60 = arith.constant 0 : index
    %73 = tpu.strided_load %arg14[%c1_59, %c0_60] {strides = array<i32: 2, 1>} : memref<128x32xf32, #tpu.memory_space<vmem>>, vector<64x32xf32>
    %74 = arith.maximumf %72, %73 : vector<64x32xf32>
    %cst_61 = arith.constant 0.000000e+00 : f32
    %75 = vector.broadcast %cst_61 : f32 to vector<1x12x8x160xf32>
    %c0_62 = arith.constant 0 : index
    %c0_63 = arith.constant 0 : index
    %c0_64 = arith.constant 0 : index
    %c0_65 = arith.constant 0 : index
    %76 = vector.load %arg17[%c0_62, %c0_63, %c0_64, %c0_65] : memref<1x12x8x160xf32, #tpu.memory_space<vmem>>, vector<1x12x8x160xf32>
    tpu.vector_store %arg17[%c0_62, %c0_63, %c0_64, %c0_65], %75 {strides = array<i32>} : memref<1x12x8x160xf32, #tpu.memory_space<vmem>>, vector<1x12x8x160xf32>,
    %77 = vector.shape_cast %74 : vector<64x32xf32> to vector<1x8x8x32xf32>
    %78 = vector.extract_strided_slice %77 {offsets = [0, 0, 0, 0], sizes = [1, 8, 6, 32], strides = [1, 1, 1, 1]} : vector<1x8x8x32xf32> to vector<1x8x6x32xf32>
    %c0_66 = arith.constant 0 : index
    %c2_67 = arith.constant 2 : index
    %c2_68 = arith.constant 2 : index
    %c0_69 = arith.constant 0 : index
    %79 = vector.load %arg17[%c0_66, %c2_67, %c2_68, %c0_69] : memref<1x12x8x160xf32, #tpu.memory_space<vmem>>, vector<1x8x6x32xf32>
    tpu.vector_store %arg17[%c0_66, %c2_67, %c2_68, %c0_69], %78 {strides = array<i32>} : memref<1x12x8x160xf32, #tpu.memory_space<vmem>>, vector<1x8x6x32xf32>,
    %80 = vector.extract_strided_slice %77 {offsets = [0, 0, 0, 0], sizes = [1, 8, 7, 32], strides = [1, 1, 1, 1]} : vector<1x8x8x32xf32> to vector<1x8x7x32xf32>
    %c0_70 = arith.constant 0 : index
    %c2_71 = arith.constant 2 : index
    %c1_72 = arith.constant 1 : index
    %c32_73 = arith.constant 32 : index
    %81 = vector.load %arg17[%c0_70, %c2_71, %c1_72, %c32_73] : memref<1x12x8x160xf32, #tpu.memory_space<vmem>>, vector<1x8x7x32xf32>
    tpu.vector_store %arg17[%c0_70, %c2_71, %c1_72, %c32_73], %80 {strides = array<i32>} : memref<1x12x8x160xf32, #tpu.memory_space<vmem>>, vector<1x8x7x32xf32>,
    %c0_74 = arith.constant 0 : index
    %c2_75 = arith.constant 2 : index
    %c0_76 = arith.constant 0 : index
    %c64_77 = arith.constant 64 : index
    %82 = vector.load %arg17[%c0_74, %c2_75, %c0_76, %c64_77] : memref<1x12x8x160xf32, #tpu.memory_space<vmem>>, vector<1x8x8x32xf32>
    tpu.vector_store %arg17[%c0_74, %c2_75, %c0_76, %c64_77], %77 {strides = array<i32>} : memref<1x12x8x160xf32, #tpu.memory_space<vmem>>, vector<1x8x8x32xf32>,
    %83 = vector.extract_strided_slice %77 {offsets = [0, 0, 1, 0], sizes = [1, 8, 7, 32], strides = [1, 1, 1, 1]} : vector<1x8x8x32xf32> to vector<1x8x7x32xf32>
    %c0_78 = arith.constant 0 : index
    %c2_79 = arith.constant 2 : index
    %c0_80 = arith.constant 0 : index
    %c96_81 = arith.constant 96 : index
    %84 = vector.load %arg17[%c0_78, %c2_79, %c0_80, %c96_81] : memref<1x12x8x160xf32, #tpu.memory_space<vmem>>, vector<1x8x7x32xf32>
    tpu.vector_store %arg17[%c0_78, %c2_79, %c0_80, %c96_81], %83 {strides = array<i32>} : memref<1x12x8x160xf32, #tpu.memory_space<vmem>>, vector<1x8x7x32xf32>,
    %85 = vector.extract_strided_slice %77 {offsets = [0, 0, 2, 0], sizes = [1, 8, 6, 32], strides = [1, 1, 1, 1]} : vector<1x8x8x32xf32> to vector<1x8x6x32xf32>
    %c0_82 = arith.constant 0 : index
    %c2_83 = arith.constant 2 : index
    %c0_84 = arith.constant 0 : index
    %c128_85 = arith.constant 128 : index
    %86 = vector.load %arg17[%c0_82, %c2_83, %c0_84, %c128_85] : memref<1x12x8x160xf32, #tpu.memory_space<vmem>>, vector<1x8x6x32xf32>
    tpu.vector_store %arg17[%c0_82, %c2_83, %c0_84, %c128_85], %85 {strides = array<i32>} : memref<1x12x8x160xf32, #tpu.memory_space<vmem>>, vector<1x8x6x32xf32>,
    %c0_86 = arith.constant 0 : index
    %c0_87 = arith.constant 0 : index
    %c0_88 = arith.constant 0 : index
    %c0_89 = arith.constant 0 : index
    %87 = vector.load %arg17[%c0_86, %c0_87, %c0_88, %c0_89] : memref<1x12x8x160xf32, #tpu.memory_space<vmem>>, vector<1x12x8x160xf32>
    %88 = arith.truncf %87 : vector<1x12x8x160xf32> to vector<1x12x8x160xbf16>
    %89 = vector.extract_strided_slice %88 {offsets = [0, 0, 0, 0], sizes = [1, 8, 8, 160], strides = [1, 1, 1, 1]} : vector<1x12x8x160xbf16> to vector<1x8x8x160xbf16>
    %90 = vector.shape_cast %89 : vector<1x8x8x160xbf16> to vector<64x160xbf16>
    %c0_90 = arith.constant 0 : index
    %c0_91 = arith.constant 0 : index
    %c0_92 = arith.constant 0 : index
    %91 = vector.load %arg6[%c0_90, %c0_91, %c0_92] : memref<5x160x64xbf16, #tpu.memory_space<vmem>>, vector<1x160x64xbf16>
    %92 = vector.shape_cast %91 : vector<1x160x64xbf16> to vector<160x64xbf16>
    %cst_93 = arith.constant dense<0.000000e+00> : vector<64x64xf32>
    %93 = tpu.matmul %90, %92, %cst_93 {dimension_numbers = #tpu.dot_dimension_numbers<[1], [0], [0], [1], [0, 0, 1, 1], [], []>} : vector<64x160xbf16>, vector<160x64xbf16>, vector<64x64xf32> -> vector<64x64xf32>
    %94 = vector.extract_strided_slice %88 {offsets = [0, 1, 0, 0], sizes = [1, 8, 8, 160], strides = [1, 1, 1, 1]} : vector<1x12x8x160xbf16> to vector<1x8x8x160xbf16>
    %95 = vector.shape_cast %94 : vector<1x8x8x160xbf16> to vector<64x160xbf16>
    %c1_94 = arith.constant 1 : index
    %c0_95 = arith.constant 0 : index
    %c0_96 = arith.constant 0 : index
    %96 = vector.load %arg6[%c1_94, %c0_95, %c0_96] : memref<5x160x64xbf16, #tpu.memory_space<vmem>>, vector<1x160x64xbf16>
    %97 = vector.shape_cast %96 : vector<1x160x64xbf16> to vector<160x64xbf16>
    %cst_97 = arith.constant dense<0.000000e+00> : vector<64x64xf32>
    %98 = tpu.matmul %95, %97, %cst_97 {dimension_numbers = #tpu.dot_dimension_numbers<[1], [0], [0], [1], [0, 0, 1, 1], [], []>} : vector<64x160xbf16>, vector<160x64xbf16>, vector<64x64xf32> -> vector<64x64xf32>
    %99 = arith.addf %93, %98 : vector<64x64xf32>
    %100 = vector.extract_strided_slice %88 {offsets = [0, 2, 0, 0], sizes = [1, 8, 8, 160], strides = [1, 1, 1, 1]} : vector<1x12x8x160xbf16> to vector<1x8x8x160xbf16>
    %101 = vector.shape_cast %100 : vector<1x8x8x160xbf16> to vector<64x160xbf16>
    %c2_98 = arith.constant 2 : index
    %c0_99 = arith.constant 0 : index
    %c0_100 = arith.constant 0 : index
    %102 = vector.load %arg6[%c2_98, %c0_99, %c0_100] : memref<5x160x64xbf16, #tpu.memory_space<vmem>>, vector<1x160x64xbf16>
    %103 = vector.shape_cast %102 : vector<1x160x64xbf16> to vector<160x64xbf16>
    %cst_101 = arith.constant dense<0.000000e+00> : vector<64x64xf32>
    %104 = tpu.matmul %101, %103, %cst_101 {dimension_numbers = #tpu.dot_dimension_numbers<[1], [0], [0], [1], [0, 0, 1, 1], [], []>} : vector<64x160xbf16>, vector<160x64xbf16>, vector<64x64xf32> -> vector<64x64xf32>
    %105 = arith.addf %99, %104 : vector<64x64xf32>
    %106 = vector.extract_strided_slice %88 {offsets = [0, 3, 0, 0], sizes = [1, 8, 8, 160], strides = [1, 1, 1, 1]} : vector<1x12x8x160xbf16> to vector<1x8x8x160xbf16>
    %107 = vector.shape_cast %106 : vector<1x8x8x160xbf16> to vector<64x160xbf16>
    %c3_102 = arith.constant 3 : index
    %c0_103 = arith.constant 0 : index
    %c0_104 = arith.constant 0 : index
    %108 = vector.load %arg6[%c3_102, %c0_103, %c0_104] : memref<5x160x64xbf16, #tpu.memory_space<vmem>>, vector<1x160x64xbf16>
    %109 = vector.shape_cast %108 : vector<1x160x64xbf16> to vector<160x64xbf16>
    %cst_105 = arith.constant dense<0.000000e+00> : vector<64x64xf32>
    %110 = tpu.matmul %107, %109, %cst_105 {dimension_numbers = #tpu.dot_dimension_numbers<[1], [0], [0], [1], [0, 0, 1, 1], [], []>} : vector<64x160xbf16>, vector<160x64xbf16>, vector<64x64xf32> -> vector<64x64xf32>
    %111 = arith.addf %105, %110 : vector<64x64xf32>
    %112 = vector.extract_strided_slice %88 {offsets = [0, 4, 0, 0], sizes = [1, 8, 8, 160], strides = [1, 1, 1, 1]} : vector<1x12x8x160xbf16> to vector<1x8x8x160xbf16>
    %113 = vector.shape_cast %112 : vector<1x8x8x160xbf16> to vector<64x160xbf16>
    %c4_106 = arith.constant 4 : index
    %c0_107 = arith.constant 0 : index
    %c0_108 = arith.constant 0 : index
    %114 = vector.load %arg6[%c4_106, %c0_107, %c0_108] : memref<5x160x64xbf16, #tpu.memory_space<vmem>>, vector<1x160x64xbf16>
    %115 = vector.shape_cast %114 : vector<1x160x64xbf16> to vector<160x64xbf16>
    %cst_109 = arith.constant dense<0.000000e+00> : vector<64x64xf32>
    %116 = tpu.matmul %113, %115, %cst_109 {dimension_numbers = #tpu.dot_dimension_numbers<[1], [0], [0], [1], [0, 0, 1, 1], [], []>} : vector<64x160xbf16>, vector<160x64xbf16>, vector<64x64xf32> -> vector<64x64xf32>
    %117 = arith.addf %111, %116 : vector<64x64xf32>
    %c0_110 = arith.constant 0 : index
    %c0_111 = arith.constant 0 : index
    %118 = vector.load %arg7[%c0_110, %c0_111] : memref<1x64xf32, #tpu.memory_space<vmem>>, vector<1x64xf32>
    %119 = vector.broadcast %118 : vector<1x64xf32> to vector<64x64xf32>
    %120 = arith.addf %117, %119 : vector<64x64xf32>
    %121 = vector.shape_cast %120 : vector<64x64xf32> to vector<1x4x2x8x64xf32>
    %122 = vector.extract_strided_slice %121 {offsets = [0, 0, 0, 0, 0], sizes = [1, 4, 1, 8, 64], strides = [1, 1, 1, 1, 1]} : vector<1x4x2x8x64xf32> to vector<1x4x1x8x64xf32>
    %123 = vector.shape_cast %122 : vector<1x4x1x8x64xf32> to vector<1x4x8x64xf32>
    %124 = vector.extract_strided_slice %121 {offsets = [0, 0, 1, 0, 0], sizes = [1, 4, 1, 8, 64], strides = [1, 1, 1, 1, 1]} : vector<1x4x2x8x64xf32> to vector<1x4x1x8x64xf32>
    %125 = vector.shape_cast %124 : vector<1x4x1x8x64xf32> to vector<1x4x8x64xf32>
    %126 = arith.maximumf %123, %125 : vector<1x4x8x64xf32>
    %127 = vector.shape_cast %126 : vector<1x4x8x64xf32> to vector<32x64xf32>
    %c0_112 = arith.constant 0 : index
    %c0_113 = arith.constant 0 : index
    %128 = vector.load %arg15[%c0_112, %c0_113] : memref<32x64xf32, #tpu.memory_space<vmem>>, vector<32x64xf32>
    tpu.vector_store %arg15[%c0_112, %c0_113], %127 {strides = array<i32>} : memref<32x64xf32, #tpu.memory_space<vmem>>, vector<32x64xf32>,
    %c0_114 = arith.constant 0 : index
    %c0_115 = arith.constant 0 : index
    %129 = tpu.strided_load %arg15[%c0_114, %c0_115] {strides = array<i32: 2, 1>} : memref<32x64xf32, #tpu.memory_space<vmem>>, vector<16x64xf32>
    %c1_116 = arith.constant 1 : index
    %c0_117 = arith.constant 0 : index
    %130 = tpu.strided_load %arg15[%c1_116, %c0_117] {strides = array<i32: 2, 1>} : memref<32x64xf32, #tpu.memory_space<vmem>>, vector<16x64xf32>
    %131 = arith.maximumf %129, %130 : vector<16x64xf32>
    %132 = arith.truncf %131 : vector<16x64xf32> to vector<16x64xbf16>
    %133 = vector.shape_cast %132 : vector<16x64xbf16> to vector<1x16x64xbf16>
    %134 = vector.extract_strided_slice %133 {offsets = [0, 0, 0], sizes = [1, 1, 64], strides = [1, 1, 1]} : vector<1x16x64xbf16> to vector<1x1x64xbf16>
    %135 = vector.shape_cast %134 : vector<1x1x64xbf16> to vector<1x64xbf16>
    %c0_118 = arith.constant 0 : index
    %c0_119 = arith.constant 0 : index
    %c0_120 = arith.constant 0 : index
    %136 = vector.load %arg8[%c0_118, %c0_119, %c0_120] : memref<16x64x64xbf16, #tpu.memory_space<vmem>>, vector<1x64x64xbf16>
    %137 = vector.shape_cast %136 : vector<1x64x64xbf16> to vector<64x64xbf16>
    %cst_121 = arith.constant dense<0.000000e+00> : vector<1x64xf32>
    %138 = tpu.matmul %135, %137, %cst_121 {dimension_numbers = #tpu.dot_dimension_numbers<[1], [0], [0], [1], [0, 0, 1, 1], [], []>} : vector<1x64xbf16>, vector<64x64xbf16>, vector<1x64xf32> -> vector<1x64xf32>
    %139 = vector.extract_strided_slice %133 {offsets = [0, 1, 0], sizes = [1, 1, 64], strides = [1, 1, 1]} : vector<1x16x64xbf16> to vector<1x1x64xbf16>
    %140 = vector.shape_cast %139 : vector<1x1x64xbf16> to vector<1x64xbf16>
    %c1_122 = arith.constant 1 : index
    %c0_123 = arith.constant 0 : index
    %c0_124 = arith.constant 0 : index
    %141 = vector.load %arg8[%c1_122, %c0_123, %c0_124] : memref<16x64x64xbf16, #tpu.memory_space<vmem>>, vector<1x64x64xbf16>
    %142 = vector.shape_cast %141 : vector<1x64x64xbf16> to vector<64x64xbf16>
    %cst_125 = arith.constant dense<0.000000e+00> : vector<1x64xf32>
    %143 = tpu.matmul %140, %142, %cst_125 {dimension_numbers = #tpu.dot_dimension_numbers<[1], [0], [0], [1], [0, 0, 1, 1], [], []>} : vector<1x64xbf16>, vector<64x64xbf16>, vector<1x64xf32> -> vector<1x64xf32>
    %144 = arith.addf %138, %143 : vector<1x64xf32>
    %145 = vector.extract_strided_slice %133 {offsets = [0, 2, 0], sizes = [1, 1, 64], strides = [1, 1, 1]} : vector<1x16x64xbf16> to vector<1x1x64xbf16>
    %146 = vector.shape_cast %145 : vector<1x1x64xbf16> to vector<1x64xbf16>
    %c2_126 = arith.constant 2 : index
    %c0_127 = arith.constant 0 : index
    %c0_128 = arith.constant 0 : index
    %147 = vector.load %arg8[%c2_126, %c0_127, %c0_128] : memref<16x64x64xbf16, #tpu.memory_space<vmem>>, vector<1x64x64xbf16>
    %148 = vector.shape_cast %147 : vector<1x64x64xbf16> to vector<64x64xbf16>
    %cst_129 = arith.constant dense<0.000000e+00> : vector<1x64xf32>
    %149 = tpu.matmul %146, %148, %cst_129 {dimension_numbers = #tpu.dot_dimension_numbers<[1], [0], [0], [1], [0, 0, 1, 1], [], []>} : vector<1x64xbf16>, vector<64x64xbf16>, vector<1x64xf32> -> vector<1x64xf32>
    %150 = arith.addf %144, %149 : vector<1x64xf32>
    %151 = vector.extract_strided_slice %133 {offsets = [0, 3, 0], sizes = [1, 1, 64], strides = [1, 1, 1]} : vector<1x16x64xbf16> to vector<1x1x64xbf16>
    %152 = vector.shape_cast %151 : vector<1x1x64xbf16> to vector<1x64xbf16>
    %c3_130 = arith.constant 3 : index
    %c0_131 = arith.constant 0 : index
    %c0_132 = arith.constant 0 : index
    %153 = vector.load %arg8[%c3_130, %c0_131, %c0_132] : memref<16x64x64xbf16, #tpu.memory_space<vmem>>, vector<1x64x64xbf16>
    %154 = vector.shape_cast %153 : vector<1x64x64xbf16> to vector<64x64xbf16>
    %cst_133 = arith.constant dense<0.000000e+00> : vector<1x64xf32>
    %155 = tpu.matmul %152, %154, %cst_133 {dimension_numbers = #tpu.dot_dimension_numbers<[1], [0], [0], [1], [0, 0, 1, 1], [], []>} : vector<1x64xbf16>, vector<64x64xbf16>, vector<1x64xf32> -> vector<1x64xf32>
    %156 = arith.addf %150, %155 : vector<1x64xf32>
    %157 = vector.extract_strided_slice %133 {offsets = [0, 4, 0], sizes = [1, 1, 64], strides = [1, 1, 1]} : vector<1x16x64xbf16> to vector<1x1x64xbf16>
    %158 = vector.shape_cast %157 : vector<1x1x64xbf16> to vector<1x64xbf16>
    %c4_134 = arith.constant 4 : index
    %c0_135 = arith.constant 0 : index
    %c0_136 = arith.constant 0 : index
    %159 = vector.load %arg8[%c4_134, %c0_135, %c0_136] : memref<16x64x64xbf16, #tpu.memory_space<vmem>>, vector<1x64x64xbf16>
    %160 = vector.shape_cast %159 : vector<1x64x64xbf16> to vector<64x64xbf16>
    %cst_137 = arith.constant dense<0.000000e+00> : vector<1x64xf32>
    %161 = tpu.matmul %158, %160, %cst_137 {dimension_numbers = #tpu.dot_dimension_numbers<[1], [0], [0], [1], [0, 0, 1, 1], [], []>} : vector<1x64xbf16>, vector<64x64xbf16>, vector<1x64xf32> -> vector<1x64xf32>
    %162 = arith.addf %156, %161 : vector<1x64xf32>
    %163 = vector.extract_strided_slice %133 {offsets = [0, 5, 0], sizes = [1, 1, 64], strides = [1, 1, 1]} : vector<1x16x64xbf16> to vector<1x1x64xbf16>
    %164 = vector.shape_cast %163 : vector<1x1x64xbf16> to vector<1x64xbf16>
    %c5 = arith.constant 5 : index
    %c0_138 = arith.constant 0 : index
    %c0_139 = arith.constant 0 : index
    %165 = vector.load %arg8[%c5, %c0_138, %c0_139] : memref<16x64x64xbf16, #tpu.memory_space<vmem>>, vector<1x64x64xbf16>
    %166 = vector.shape_cast %165 : vector<1x64x64xbf16> to vector<64x64xbf16>
    %cst_140 = arith.constant dense<0.000000e+00> : vector<1x64xf32>
    %167 = tpu.matmul %164, %166, %cst_140 {dimension_numbers = #tpu.dot_dimension_numbers<[1], [0], [0], [1], [0, 0, 1, 1], [], []>} : vector<1x64xbf16>, vector<64x64xbf16>, vector<1x64xf32> -> vector<1x64xf32>
    %168 = arith.addf %162, %167 : vector<1x64xf32>
    %169 = vector.extract_strided_slice %133 {offsets = [0, 6, 0], sizes = [1, 1, 64], strides = [1, 1, 1]} : vector<1x16x64xbf16> to vector<1x1x64xbf16>
    %170 = vector.shape_cast %169 : vector<1x1x64xbf16> to vector<1x64xbf16>
    %c6 = arith.constant 6 : index
    %c0_141 = arith.constant 0 : index
    %c0_142 = arith.constant 0 : index
    %171 = vector.load %arg8[%c6, %c0_141, %c0_142] : memref<16x64x64xbf16, #tpu.memory_space<vmem>>, vector<1x64x64xbf16>
    %172 = vector.shape_cast %171 : vector<1x64x64xbf16> to vector<64x64xbf16>
    %cst_143 = arith.constant dense<0.000000e+00> : vector<1x64xf32>
    %173 = tpu.matmul %170, %172, %cst_143 {dimension_numbers = #tpu.dot_dimension_numbers<[1], [0], [0], [1], [0, 0, 1, 1], [], []>} : vector<1x64xbf16>, vector<64x64xbf16>, vector<1x64xf32> -> vector<1x64xf32>
    %174 = arith.addf %168, %173 : vector<1x64xf32>
    %175 = vector.extract_strided_slice %133 {offsets = [0, 7, 0], sizes = [1, 1, 64], strides = [1, 1, 1]} : vector<1x16x64xbf16> to vector<1x1x64xbf16>
    %176 = vector.shape_cast %175 : vector<1x1x64xbf16> to vector<1x64xbf16>
    %c7 = arith.constant 7 : index
    %c0_144 = arith.constant 0 : index
    %c0_145 = arith.constant 0 : index
    %177 = vector.load %arg8[%c7, %c0_144, %c0_145] : memref<16x64x64xbf16, #tpu.memory_space<vmem>>, vector<1x64x64xbf16>
    %178 = vector.shape_cast %177 : vector<1x64x64xbf16> to vector<64x64xbf16>
    %cst_146 = arith.constant dense<0.000000e+00> : vector<1x64xf32>
    %179 = tpu.matmul %176, %178, %cst_146 {dimension_numbers = #tpu.dot_dimension_numbers<[1], [0], [0], [1], [0, 0, 1, 1], [], []>} : vector<1x64xbf16>, vector<64x64xbf16>, vector<1x64xf32> -> vector<1x64xf32>
    %180 = arith.addf %174, %179 : vector<1x64xf32>
    %181 = vector.extract_strided_slice %133 {offsets = [0, 8, 0], sizes = [1, 1, 64], strides = [1, 1, 1]} : vector<1x16x64xbf16> to vector<1x1x64xbf16>
    %182 = vector.shape_cast %181 : vector<1x1x64xbf16> to vector<1x64xbf16>
    %c8 = arith.constant 8 : index
    %c0_147 = arith.constant 0 : index
    %c0_148 = arith.constant 0 : index
    %183 = vector.load %arg8[%c8, %c0_147, %c0_148] : memref<16x64x64xbf16, #tpu.memory_space<vmem>>, vector<1x64x64xbf16>
    %184 = vector.shape_cast %183 : vector<1x64x64xbf16> to vector<64x64xbf16>
    %cst_149 = arith.constant dense<0.000000e+00> : vector<1x64xf32>
    %185 = tpu.matmul %182, %184, %cst_149 {dimension_numbers = #tpu.dot_dimension_numbers<[1], [0], [0], [1], [0, 0, 1, 1], [], []>} : vector<1x64xbf16>, vector<64x64xbf16>, vector<1x64xf32> -> vector<1x64xf32>
    %186 = arith.addf %180, %185 : vector<1x64xf32>
    %187 = vector.extract_strided_slice %133 {offsets = [0, 9, 0], sizes = [1, 1, 64], strides = [1, 1, 1]} : vector<1x16x64xbf16> to vector<1x1x64xbf16>
    %188 = vector.shape_cast %187 : vector<1x1x64xbf16> to vector<1x64xbf16>
    %c9 = arith.constant 9 : index
    %c0_150 = arith.constant 0 : index
    %c0_151 = arith.constant 0 : index
    %189 = vector.load %arg8[%c9, %c0_150, %c0_151] : memref<16x64x64xbf16, #tpu.memory_space<vmem>>, vector<1x64x64xbf16>
    %190 = vector.shape_cast %189 : vector<1x64x64xbf16> to vector<64x64xbf16>
    %cst_152 = arith.constant dense<0.000000e+00> : vector<1x64xf32>
    %191 = tpu.matmul %188, %190, %cst_152 {dimension_numbers = #tpu.dot_dimension_numbers<[1], [0], [0], [1], [0, 0, 1, 1], [], []>} : vector<1x64xbf16>, vector<64x64xbf16>, vector<1x64xf32> -> vector<1x64xf32>
    %192 = arith.addf %186, %191 : vector<1x64xf32>
    %193 = vector.extract_strided_slice %133 {offsets = [0, 10, 0], sizes = [1, 1, 64], strides = [1, 1, 1]} : vector<1x16x64xbf16> to vector<1x1x64xbf16>
    %194 = vector.shape_cast %193 : vector<1x1x64xbf16> to vector<1x64xbf16>
    %c10 = arith.constant 10 : index
    %c0_153 = arith.constant 0 : index
    %c0_154 = arith.constant 0 : index
    %195 = vector.load %arg8[%c10, %c0_153, %c0_154] : memref<16x64x64xbf16, #tpu.memory_space<vmem>>, vector<1x64x64xbf16>
    %196 = vector.shape_cast %195 : vector<1x64x64xbf16> to vector<64x64xbf16>
    %cst_155 = arith.constant dense<0.000000e+00> : vector<1x64xf32>
    %197 = tpu.matmul %194, %196, %cst_155 {dimension_numbers = #tpu.dot_dimension_numbers<[1], [0], [0], [1], [0, 0, 1, 1], [], []>} : vector<1x64xbf16>, vector<64x64xbf16>, vector<1x64xf32> -> vector<1x64xf32>
    %198 = arith.addf %192, %197 : vector<1x64xf32>
    %199 = vector.extract_strided_slice %133 {offsets = [0, 11, 0], sizes = [1, 1, 64], strides = [1, 1, 1]} : vector<1x16x64xbf16> to vector<1x1x64xbf16>
    %200 = vector.shape_cast %199 : vector<1x1x64xbf16> to vector<1x64xbf16>
    %c11 = arith.constant 11 : index
    %c0_156 = arith.constant 0 : index
    %c0_157 = arith.constant 0 : index
    %201 = vector.load %arg8[%c11, %c0_156, %c0_157] : memref<16x64x64xbf16, #tpu.memory_space<vmem>>, vector<1x64x64xbf16>
    %202 = vector.shape_cast %201 : vector<1x64x64xbf16> to vector<64x64xbf16>
    %cst_158 = arith.constant dense<0.000000e+00> : vector<1x64xf32>
    %203 = tpu.matmul %200, %202, %cst_158 {dimension_numbers = #tpu.dot_dimension_numbers<[1], [0], [0], [1], [0, 0, 1, 1], [], []>} : vector<1x64xbf16>, vector<64x64xbf16>, vector<1x64xf32> -> vector<1x64xf32>
    %204 = arith.addf %198, %203 : vector<1x64xf32>
    %205 = vector.extract_strided_slice %133 {offsets = [0, 12, 0], sizes = [1, 1, 64], strides = [1, 1, 1]} : vector<1x16x64xbf16> to vector<1x1x64xbf16>
    %206 = vector.shape_cast %205 : vector<1x1x64xbf16> to vector<1x64xbf16>
    %c12 = arith.constant 12 : index
    %c0_159 = arith.constant 0 : index
    %c0_160 = arith.constant 0 : index
    %207 = vector.load %arg8[%c12, %c0_159, %c0_160] : memref<16x64x64xbf16, #tpu.memory_space<vmem>>, vector<1x64x64xbf16>
    %208 = vector.shape_cast %207 : vector<1x64x64xbf16> to vector<64x64xbf16>
    %cst_161 = arith.constant dense<0.000000e+00> : vector<1x64xf32>
    %209 = tpu.matmul %206, %208, %cst_161 {dimension_numbers = #tpu.dot_dimension_numbers<[1], [0], [0], [1], [0, 0, 1, 1], [], []>} : vector<1x64xbf16>, vector<64x64xbf16>, vector<1x64xf32> -> vector<1x64xf32>
    %210 = arith.addf %204, %209 : vector<1x64xf32>
    %211 = vector.extract_strided_slice %133 {offsets = [0, 13, 0], sizes = [1, 1, 64], strides = [1, 1, 1]} : vector<1x16x64xbf16> to vector<1x1x64xbf16>
    %212 = vector.shape_cast %211 : vector<1x1x64xbf16> to vector<1x64xbf16>
    %c13 = arith.constant 13 : index
    %c0_162 = arith.constant 0 : index
    %c0_163 = arith.constant 0 : index
    %213 = vector.load %arg8[%c13, %c0_162, %c0_163] : memref<16x64x64xbf16, #tpu.memory_space<vmem>>, vector<1x64x64xbf16>
    %214 = vector.shape_cast %213 : vector<1x64x64xbf16> to vector<64x64xbf16>
    %cst_164 = arith.constant dense<0.000000e+00> : vector<1x64xf32>
    %215 = tpu.matmul %212, %214, %cst_164 {dimension_numbers = #tpu.dot_dimension_numbers<[1], [0], [0], [1], [0, 0, 1, 1], [], []>} : vector<1x64xbf16>, vector<64x64xbf16>, vector<1x64xf32> -> vector<1x64xf32>
    %216 = arith.addf %210, %215 : vector<1x64xf32>
    %217 = vector.extract_strided_slice %133 {offsets = [0, 14, 0], sizes = [1, 1, 64], strides = [1, 1, 1]} : vector<1x16x64xbf16> to vector<1x1x64xbf16>
    %218 = vector.shape_cast %217 : vector<1x1x64xbf16> to vector<1x64xbf16>
    %c14 = arith.constant 14 : index
    %c0_165 = arith.constant 0 : index
    %c0_166 = arith.constant 0 : index
    %219 = vector.load %arg8[%c14, %c0_165, %c0_166] : memref<16x64x64xbf16, #tpu.memory_space<vmem>>, vector<1x64x64xbf16>
    %220 = vector.shape_cast %219 : vector<1x64x64xbf16> to vector<64x64xbf16>
    %cst_167 = arith.constant dense<0.000000e+00> : vector<1x64xf32>
    %221 = tpu.matmul %218, %220, %cst_167 {dimension_numbers = #tpu.dot_dimension_numbers<[1], [0], [0], [1], [0, 0, 1, 1], [], []>} : vector<1x64xbf16>, vector<64x64xbf16>, vector<1x64xf32> -> vector<1x64xf32>
    %222 = arith.addf %216, %221 : vector<1x64xf32>
    %223 = vector.extract_strided_slice %133 {offsets = [0, 15, 0], sizes = [1, 1, 64], strides = [1, 1, 1]} : vector<1x16x64xbf16> to vector<1x1x64xbf16>
    %224 = vector.shape_cast %223 : vector<1x1x64xbf16> to vector<1x64xbf16>
    %c15 = arith.constant 15 : index
    %c0_168 = arith.constant 0 : index
    %c0_169 = arith.constant 0 : index
    %225 = vector.load %arg8[%c15, %c0_168, %c0_169] : memref<16x64x64xbf16, #tpu.memory_space<vmem>>, vector<1x64x64xbf16>
    %226 = vector.shape_cast %225 : vector<1x64x64xbf16> to vector<64x64xbf16>
    %cst_170 = arith.constant dense<0.000000e+00> : vector<1x64xf32>
    %227 = tpu.matmul %224, %226, %cst_170 {dimension_numbers = #tpu.dot_dimension_numbers<[1], [0], [0], [1], [0, 0, 1, 1], [], []>} : vector<1x64xbf16>, vector<64x64xbf16>, vector<1x64xf32> -> vector<1x64xf32>
    %228 = arith.addf %222, %227 : vector<1x64xf32>
    %c0_171 = arith.constant 0 : index
    %c0_172 = arith.constant 0 : index
    %229 = vector.load %arg9[%c0_171, %c0_172] : memref<1x64xf32, #tpu.memory_space<vmem>>, vector<1x64xf32>
    %230 = arith.addf %228, %229 : vector<1x64xf32>
    %231 = arith.truncf %230 : vector<1x64xf32> to vector<1x64xbf16>
    %c0_173 = arith.constant 0 : index
    %c0_174 = arith.constant 0 : index
    %232 = vector.load %arg10[%c0_173, %c0_174] : memref<64x128xbf16, #tpu.memory_space<vmem>>, vector<64x128xbf16>
    %cst_175 = arith.constant dense<0.000000e+00> : vector<1x128xf32>
    %233 = tpu.matmul %231, %232, %cst_175 {dimension_numbers = #tpu.dot_dimension_numbers<[1], [0], [0], [1], [0, 0, 1, 1], [], []>} : vector<1x64xbf16>, vector<64x128xbf16>, vector<1x128xf32> -> vector<1x128xf32>
    %c0_176 = arith.constant 0 : index
    %c0_177 = arith.constant 0 : index
    %234 = vector.load %arg11[%c0_176, %c0_177] : memref<1x128xf32, #tpu.memory_space<vmem>>, vector<1x128xf32>
    %235 = arith.addf %233, %234 : vector<1x128xf32>
    %c0_178 = arith.constant 0 : index
    %c0_179 = arith.constant 0 : index
    %c0_180 = arith.constant 0 : index
    %236 = vector.load %arg12[%c0_178, %c0_179, %c0_180] : memref<1x1x128xf32, #tpu.memory_space<vmem>>, vector<1x1x128xf32>
    %237 = vector.shape_cast %236 : vector<1x1x128xf32> to vector<1x128xf32>
    %238 = vector.shape_cast %235 : vector<1x128xf32> to vector<1x1x128xf32>
    tpu.vector_store %arg12[%c0_178, %c0_179, %c0_180], %238 {strides = array<i32>} : memref<1x1x128xf32, #tpu.memory_space<vmem>>, vector<1x1x128xf32>,
    return
  }
  func.func @transform_0(%arg0: i32) -> (i32, i32, i32) {
    %c0_i32 = arith.constant 0 : i32
    %c0_i32_0 = arith.constant 0 : i32
    %c0_i32_1 = arith.constant 0 : i32
    return %arg0, %c0_i32, %c0_i32_0 : i32, i32, i32
  }
  func.func @transform_1(%arg0: i32) -> (i32, i32) {
    %c0_i32 = arith.constant 0 : i32
    %c0_i32_0 = arith.constant 0 : i32
    %c0_i32_1 = arith.constant 0 : i32
    return %c0_i32, %c0_i32_0 : i32, i32
  }
  func.func @transform_2(%arg0: i32) -> (i32, i32) {
    %c0_i32 = arith.constant 0 : i32
    %c0_i32_0 = arith.constant 0 : i32
    %c0_i32_1 = arith.constant 0 : i32
    return %c0_i32, %c0_i32_0 : i32, i32
  }
  func.func @transform_3(%arg0: i32) -> (i32, i32, i32) {
    %c0_i32 = arith.constant 0 : i32
    %c0_i32_0 = arith.constant 0 : i32
    %c0_i32_1 = arith.constant 0 : i32
    %c0_i32_2 = arith.constant 0 : i32
    return %c0_i32, %c0_i32_0, %c0_i32_1 : i32, i32, i32
  }
  func.func @transform_4(%arg0: i32) -> (i32, i32) {
    %c0_i32 = arith.constant 0 : i32
    %c0_i32_0 = arith.constant 0 : i32
    %c0_i32_1 = arith.constant 0 : i32
    return %c0_i32, %c0_i32_0 : i32, i32
  }
  func.func @transform_5(%arg0: i32) -> (i32, i32, i32) {
    %c0_i32 = arith.constant 0 : i32
    %c0_i32_0 = arith.constant 0 : i32
    %c0_i32_1 = arith.constant 0 : i32
    %c0_i32_2 = arith.constant 0 : i32
    return %c0_i32, %c0_i32_0, %c0_i32_1 : i32, i32, i32
  }
  func.func @transform_6(%arg0: i32) -> (i32, i32) {
    %c0_i32 = arith.constant 0 : i32
    %c0_i32_0 = arith.constant 0 : i32
    %c0_i32_1 = arith.constant 0 : i32
    return %c0_i32, %c0_i32_0 : i32, i32
  }
  func.func @transform_7(%arg0: i32) -> (i32, i32, i32) {
    %c0_i32 = arith.constant 0 : i32
    %c0_i32_0 = arith.constant 0 : i32
    %c0_i32_1 = arith.constant 0 : i32
    %c0_i32_2 = arith.constant 0 : i32
    return %c0_i32, %c0_i32_0, %c0_i32_1 : i32, i32, i32
  }
  func.func @transform_8(%arg0: i32) -> (i32, i32) {
    %c0_i32 = arith.constant 0 : i32
    %c0_i32_0 = arith.constant 0 : i32
    %c0_i32_1 = arith.constant 0 : i32
    return %c0_i32, %c0_i32_0 : i32, i32
  }
  func.func @transform_9(%arg0: i32) -> (i32, i32) {
    %c0_i32 = arith.constant 0 : i32
    %c0_i32_0 = arith.constant 0 : i32
    %c0_i32_1 = arith.constant 0 : i32
    return %c0_i32, %c0_i32_0 : i32, i32
  }
  func.func @transform_10(%arg0: i32) -> (i32, i32) {
    %c0_i32 = arith.constant 0 : i32
    %c0_i32_0 = arith.constant 0 : i32
    %c0_i32_1 = arith.constant 0 : i32
    return %c0_i32, %c0_i32_0 : i32, i32
  }
  func.func @transform_11(%arg0: i32) -> (i32, i32, i32) {
    %c0_i32 = arith.constant 0 : i32
    %c0_i32_0 = arith.constant 0 : i32
    %c0_i32_1 = arith.constant 0 : i32
    return %arg0, %c0_i32, %c0_i32_0 : i32, i32, i32
  }
}

</mosaic_0001>

<bundles_post_ra>
// kernel: nutty_forward.1
= control target key start
LH: loop header
LB: loop body
LE: loop exit
PB: predicated region body
PF: predicated region fallthrough
CT: control target
= control target key end

     0   :  { %16 = vsyncpa [#allocation8], 0  ;;  %s11194_s0 = inlined_call_operand.vmem [shape: bf16[2,1024,75], index: 0, kind: input, shape index: {}]   ;;  %s11195_s1 = inlined_call_operand.vmem [shape: bf16[75,32], index: 1, kind: input, shape index: {}]   ;;  %s11196_s2 = inlined_call_operand.vmem [shape: f32[1,32], index: 2, kind: input, shape index: {}]   ;;  %s11197_s3 = inlined_call_operand.vmem [shape: bf16[5,160,32], index: 3, kind: input, shape index: {}]   ;;  %s11198_s4 = inlined_call_operand.vmem [shape: f32[1,32], index: 4, kind: input, shape index: {}]   ;;  %s11199_s5 = inlined_call_operand.vmem [shape: bf16[5,160,64], index: 5, kind: input, shape index: {}]   ;;  %s11200_s6 = inlined_call_operand.vmem [shape: f32[1,64], index: 6, kind: input, shape index: {}]   ;;  %s11201_s7 = inlined_call_operand.vmem [shape: bf16[16,64,64], index: 7, kind: input, shape index: {}]   ;;  %s11202_s8 = inlined_call_operand.vmem [shape: f32[1,64], index: 8, kind: input, shape index: {}]   ;;  %s11203_s9 = inlined_call_operand.vmem [shape: bf16[64,128], index: 9, kind: input, shape index: {}]   ;;  %s11204_s10 = inlined_call_operand.vmem [shape: f32[1,128], index: 10, kind: input, shape index: {}]   ;;  %s11205_s11 = inlined_call_operand.hbm [shape: f32[2,1,128], index: 11, kind: output, shape index: {}]  }
   0x1   :  { %18 = vsyncpa [#allocation8 + $0x1], 0  ;;  %s8541_s17 = smov 0   ;;  %s8543_s18 = smov 0  }
   0x2   :  { %s8545_s19 = smov 0   ;;  %s8547_s20 = smov 0  }
   0x3 LB: > { %s8562_s21 = sadd.s32 4294967295, %s8470_s20   ;;  %s6870_s22 = sadd.s32 4294967294, %s8470_s20   ;;  %s8470_s20 = sphi %s8547_s20, %s11272_s20   ;;  %s8466_s19 = sphi %s8545_s19, %s11271_s19   ;;  %s8462_s18 = sphi %s8543_s18, %s11270_s18   ;;  %s8458_s17 = sphi %s8541_s17, %s11269_s17  }
   0x4   : > { %s8566_s23 = sadd.s32 1, %s8470_s20   ;;  %s267_s24 = sadd.s32 1, %s8466_s19 }
   0x5   : > { %s264_s25 = ssub.s32 %s8470_s20, %s8566_s23  ;;  %p277_p0 = scmp.ne.s32.totalorder %s8466_s19, %s8462_s18 }
   0x6   : > { %p265_p1 = scmp.eq.s32.totalorder %s264_s25, 0  ;;  %p278_p2 = scmp.eq.s32.totalorder %s8562_s21, 1 }
   0x7   : > { %p283_p3 = scmp.ne.s32.totalorder %s8462_s18, %s8458_s17  ;;  %p284_p4 = scmp.eq.s32.totalorder %s6870_s22, 1 }
   0x8   : > { %s8577_s26 = scalar_select %p265_p1, %s8466_s19, %s267_s24  }
   0x9   : > { %p8579_p5 = por %p278_p2, %p277_p0  ;;  %p8583_p6 = por %p284_p4, %p283_p3 }
   0xa   : > { %p6873_p7 = scmp.ge.s32.totalorder %s8470_s20, 1  ;;  %p340_p8 = scmp.lt.s32.totalorder %s8470_s20, 3 }
   0xc   : > { %p341_p9 = pnand %p6873_p7, %p340_p8 }
   0xe   : > { %344 = sbr.rel (%p341_p9) target bundleno = 2148 (0x864), region = 64 }
  0x15   : > { %v8167_v0 = vld [vmem:[%s11195_s1] sm:$0xff]   ;;  %v8168_v1 = vld [vmem:[%s11195_s1 + $0x8] sm:$0xff]   ;;  %vm1072_vm0 = vcmask 1044480   ;;  %vm1073_vm1 = vcmask 1045504   ;;  %v8169_v2 = vld [vmem:[%s11195_s1 + $0x10] sm:$0xff]   ;;  %v8472_v3 = vmov 65535  }
  0x16   : > { %7779 = vmatprep.subr.bf16.mxu0 %v8167_v0  ;;  %v1074_v4 = vsel %vm1072_vm0, 4294967295, %v8472_v3  ;;  %p379_p10 = scmp.lt.s32.totalorder %s8562_s21, 1  ;;  %v8170_v5 = vld [vmem:[%s11195_s1 + $0x18] sm:$0xff]   ;;  %v8171_v6 = vld [vmem:[%s11195_s1 + $0x20] sm:$0x3f]   ;;  %vm879_vm2 = vcmask 613376  }
  0x17   : > { %7780 = vmatpush3.bf16.msra.mxu0 %v8167_v0  ;;  %v1075_v7 = vsel %vm1073_vm1, %v1074_v4, 0  ;;  %v8226_v32 = vld [vmem:[%s11197_s3 + $0x50] sm:$0xff]   ;;  %v11206_v33 = vmov 0   ;;  %v8227_v35 = vld [vmem:[%s11197_s3 + $0x58] sm:$0xff]   ;;  %v8230_v37 = vld [vmem:[%s11197_s3 + $0x60] sm:$0xff]   ;;  %vm1688_vm3 = vcmask 261120  }
  0x18   : > { %7781 = vmatprep.subr.bf16.mxu0 %v8168_v1  ;;  %s380_s29 = scalar_select %p379_p10, %s8562_s21, 1  ;;  %v1077_v9 = vand.u32 %v8171_v6, %v1075_v7  ;;  %3008 = vmatprep.subr.bf16.mxu1 %v11206_v33  ;;  %v8231_v39 = vld [vmem:[%s11197_s3 + $0x68] sm:$0xff]   ;;  %v8234_v41 = vld [vmem:[%s11197_s3 + $0x70] sm:$0xff]   ;;  %v8235_v43 = vld [vmem:[%s11197_s3 + $0x78] sm:$0xff]   ;;  %v8474_v49 = vmov 0.0   ;;  %v8475_v58 = vmov 0.0|0.0  }
  0x19   : > { %3009 = vmatpush1.bf16.msra.mxu1 %v8226_v32  ;;  %v8238_v45 = vld [vmem:[%s11197_s3 + $0x80] sm:$0xff]   ;;  %v8706_v47 = vld [vmem:[%s11197_s3 + $0x88] sm:$0xff]   ;;  %1923 = vst.msk [vmem:[#allocation5 + $0x58] sm:$0xff] %vm1688_vm3, %v8474_v49  ;;  %1912 = vst [vmem:[#allocation5] sm:$0xff] %v8474_v49  ;;  %vm2707_vm4 = vcmask 259072   ;;  %vm2139_vm5 = vcmask 1040384  }
  0x1a   : > { %s7602_s30 = sshll.u32 %s380_s29, 9  ;;  %3010 = vmatprep.subr.bf16.mxu1 %v11206_v33  ;;  %1913 = vst.msk [vmem:[#allocation5 + $0x8] sm:$0xff] %vm1688_vm3, %v8474_v49  ;;  %1915 = vst.msk [vmem:[#allocation5 + $0x18] sm:$0xff] %vm1688_vm3, %v8474_v49  ;;  %v8242_v50 = vld [vmem:[%s11197_s3 + $0x90] sm:$0xff]   ;;  %v8243_v52 = vld [vmem:[%s11197_s3 + $0x98] sm:$0xff]   ;;  %vm2106_vm6 = vcmask 261122  }
  0x1b   : > { %7782 = vmatpush3.bf16.msra.mxu0 %v8168_v1  ;;  %s8610_s14 = scalar_lea.vmem %s11194_s0, %s7602_s30  ;;  %1917 = vst.msk [vmem:[#allocation5 + $0x28] sm:$0xff] %vm1688_vm3, %v8474_v49  ;;  %1919 = vst.msk [vmem:[#allocation5 + $0x38] sm:$0xff] %vm1688_vm3, %v8474_v49  ;;  %v8250_v32 = vld [vmem:[%s11197_s3 + $0xc0] sm:$0xff]   ;;  %vm2024_vm7 = vcmask 1041408   ;;  %s8476_s22 = smov 64   ;;  %vm2447_vm8 = vcmask 1046528  }
  0x1c   : > { %7783 = vmatprep.subr.bf16.mxu0 %v8169_v2  ;;  %v8172_v8 = vld [vmem:[%s8610_s14] sm:$0xff]   ;;  %v8173_v10 = vld [vmem:[%s8610_s14 + $0x8] sm:$0xff]   ;;  %v8174_v11 = vld [vmem:[%s8610_s14 + $0x10] sm:$0xff]   ;;  %1920 = vst [vmem:[#allocation5 + $0x40] sm:$0xff] %v8474_v49  ;;  %s8477_s29 = smov 32   ;;  %s8478_s13 = smov 96  }
  0x1d   : > { %7789 = vmatprep.mubr.msk.bf16.mxu0 %vm879_vm2, %v8172_v8  ;;  %v8175_v12 = vld [vmem:[%s8610_s14 + $0x18] sm:$0xff]   ;;  %v8176_v13 = vld [vmem:[%s8610_s14 + $0x20] sm:$0xff]   ;;  %v8177_v14 = vld [vmem:[%s8610_s14 + $0x28] sm:$0xff]   ;;  %3011 = vmatpush1.bf16.msra.mxu1 %v8227_v35  ;;  %1921 = vst.msk [vmem:[#allocation5 + $0x48] sm:$0xff] %vm1688_vm3, %v8474_v49  ;;  %vm2284_vm9 = vcmask 523521   ;;  %vm2414_vm10 = vcmask 785920  }
  0x1e   : > { %v8178_v15 = vld [vmem:[%s8610_s14 + $0x30] sm:$0xff]   ;;  %v8179_v16 = vld [vmem:[%s8610_s14 + $0x38] sm:$0xff]   ;;  %v8180_v17 = vld [vmem:[%s8610_s14 + $0x40] sm:$0xff]   ;;  %3012 = vmatprep.subr.bf16.mxu1 %v11206_v33  ;;  %1922 = vst [vmem:[#allocation5 + $0x50] sm:$0xff] %v8474_v49  ;;  %vm2286_vm11 = vcmask 523520   ;;  %vm2594_vm12 = vcmask 1047296  }
  0x1f   : > { %7784 = vmatpush3.bf16.msra.mxu0 %v8169_v2  ;;  %v8181_v18 = vld [vmem:[%s8610_s14 + $0x48] sm:$0xff]   ;;  %v8182_v19 = vld [vmem:[%s8610_s14 + $0x50] sm:$0xff]   ;;  %v8183_v20 = vld [vmem:[%s8610_s14 + $0x58] sm:$0xff]   ;;  %1924 = vst [vmem:[#allocation5 + $0x60] sm:$0xff] %v8474_v49  ;;  %vm2592_vm13 = vcmask 1048320   ;;  %vm8479_vm14 = vmmov 0  }
  0x20   : > { %7785 = vmatprep.subr.bf16.mxu0 %v8170_v5  ;;  %v8184_v21 = vld [vmem:[%s8610_s14 + $0x60] sm:$0xff]   ;;  %v8185_v22 = vld [vmem:[%s8610_s14 + $0x68] sm:$0xff]   ;;  %v8186_v23 = vld [vmem:[%s8610_s14 + $0x70] sm:$0xff]   ;;  %1925 = vst.msk [vmem:[#allocation5 + $0x68] sm:$0xff] %vm1688_vm3, %v8474_v49  ;;  %vm5461_vm15 = vcmask 523264   ;;  %s7599_s12 = sshll.u32 %s8562_s21, 4 }
  0x21   : > { %v8187_v24 = vld [vmem:[%s8610_s14 + $0x78] sm:$0xff]   ;;  %v8188_v25 = vld [vmem:[%s8610_s14 + $0x80] sm:$0xff]   ;;  %v8189_v26 = vld [vmem:[%s8610_s14 + $0x88] sm:$0xff]   ;;  %3013 = vmatpush1.bf16.msra.mxu1 %v8230_v37  ;;  %1926 = vst [vmem:[#allocation5 + $0x70] sm:$0xff] %v8474_v49  ;;  %s11152_s25 = scalar_lea.hbm %s11205_s11, %s7599_s12 }
  0x22   : > { %v8190_v27 = vld [vmem:[%s8610_s14 + $0x90] sm:$0xff]   ;;  %v8191_v28 = vld [vmem:[%s8610_s14 + $0x98] sm:$0xff]   ;;  %v8192_v29 = vld [vmem:[%s8610_s14 + $0xa0] sm:$0xff]   ;;  %3014 = vmatprep.subr.bf16.mxu1 %v11206_v33  ;;  %1927 = vst.msk [vmem:[#allocation5 + $0x78] sm:$0xff] %vm1688_vm3, %v8474_v49 }
  0x23   : > { %7786 = vmatpush3.bf16.msra.mxu0 %v8170_v5  ;;  %v8193_v30 = vld [vmem:[%s8610_s14 + $0xa8] sm:$0xff]   ;;  %v8194_v31 = vld [vmem:[%s8610_s14 + $0xb0] sm:$0xff]   ;;  %v8195_v34 = vld [vmem:[%s8610_s14 + $0xb8] sm:$0xff]   ;;  %1928 = vst [vmem:[#allocation5 + $0x80] sm:$0xff] %v8474_v49 }
  0x24   : > { %7787 = vmatprep.subr.bf16.mxu0 %v1077_v9  ;;  %v8196_v36 = vld [vmem:[%s8610_s14 + $0xc0] sm:$0xff]   ;;  %v8197_v38 = vld [vmem:[%s8610_s14 + $0xc8] sm:$0xff]   ;;  %v8198_v40 = vld [vmem:[%s8610_s14 + $0xd0] sm:$0xff]   ;;  %1929 = vst.msk [vmem:[#allocation5 + $0x88] sm:$0xff] %vm1688_vm3, %v8474_v49 }
  0x25   : > { %3015 = vmatpush1.bf16.msra.mxu1 %v8231_v39  ;;  %v8199_v42 = vld [vmem:[%s8610_s14 + $0xd8] sm:$0xff]   ;;  %v8200_v44 = vld [vmem:[%s8610_s14 + $0xe0] sm:$0xff]   ;;  %v8700_v46 = vld [vmem:[%s8610_s14 + $0xe8] sm:$0xff]   ;;  %1930 = vst [vmem:[#allocation5 + $0x90] sm:$0xff] %v8474_v49 }
  0x26   : > { %3016 = vmatprep.subr.bf16.mxu1 %v11206_v33  ;;  %v8709_v48 = vld [vmem:[%s8610_s14 + $0xf0] sm:$0xff]   ;;  %1931 = vst.msk [vmem:[#allocation5 + $0x98] sm:$0xff] %vm1688_vm3, %v8474_v49  ;;  %1932 = vst [vmem:[#allocation5 + $0xa0] sm:$0xff] %v8474_v49  ;;  %v8203_v51 = vld [vmem:[%s8610_s14 + $0xf8] sm:$0xff]  }
  0x27   : > { %7788 = vmatpush3.bf16.msra.mxu0 %v1077_v9  ;;  %1933 = vst.msk [vmem:[#allocation5 + $0xa8] sm:$0xff] %vm1688_vm3, %v8474_v49  ;;  %1934 = vst [vmem:[#allocation5 + $0xb0] sm:$0xff] %v8474_v49  ;;  %v8204_v53 = vld [vmem:[%s8610_s14 + $0x100] sm:$0xff]   ;;  %v2744_v54 = vld [vmem:[#allocation5 + $0x28] sm:$0xff] }
  0x28   : > { %3477 = vmatprep.subr.bf16.mxu0 %v11206_v33  ;;  %1935 = vst.msk [vmem:[#allocation5 + $0xb8] sm:$0xff] %vm1688_vm3, %v8474_v49  ;;  %1936 = vst [vmem:[#allocation5 + $0xc0] sm:$0xff] %v8474_v49  ;;  %v2746_v55 = vld [vmem:[#allocation5 + $0x38] sm:$0xff]  ;;  %v8205_v57 = vld [vmem:[%s8610_s14 + $0x108] sm:$0xff]  }
  0x29   : > { %3017 = vmatpush1.bf16.msra.mxu1 %v8234_v41  ;;  %1937 = vst.msk [vmem:[#allocation5 + $0xc8] sm:$0xff] %vm1688_vm3, %v8474_v49  ;;  %1938 = vst [vmem:[#allocation5 + $0xd0] sm:$0xff] %v8474_v49  ;;  %v8871_v56 = vpack.c.bf16 %v2746_v55, %v2744_v54  ;;  %v8206_v59 = vld [vmem:[%s8610_s14 + $0x110] sm:$0xff]   ;;  %v8207_v60 = vld [vmem:[%s8610_s14 + $0x118] sm:$0xff]  }
  0x2a   : > { %7790 = vmatmul.mubr.msk.bf16.vlgmr.msra.gmra.mrb[0].mxu0 %vm879_vm2, %v8173_v10  ;;  %3018 = vmatprep.subr.bf16.mxu1 %v11206_v33  ;;  %1939 = vst.msk [vmem:[#allocation5 + $0xd8] sm:$0xff] %vm1688_vm3, %v8474_v49  ;;  %1940 = vst [vmem:[#allocation5 + $0xe0] sm:$0xff] %v8474_v49  ;;  %v8208_v61 = vld [vmem:[%s8610_s14 + $0x120] sm:$0xff]   ;;  %v8209_v62 = vld [vmem:[%s8610_s14 + $0x128] sm:$0xff]  }
  0x2b   : > { %7793 = vmatprep.mubr.msk.bf16.mxu0 %vm879_vm2, %v8174_v11  ;;  %1941 = vst.msk [vmem:[#allocation5 + $0xe8] sm:$0xff] %vm1688_vm3, %v8474_v49  ;;  %1942 = vst [vmem:[#allocation5 + $0xf0] sm:$0xff] %v8474_v49  ;;  %7040 = vmatprep.mubr.msk.bf16.mxu1 %vm1688_vm3, %v8871_v56  ;;  %v8210_v63 = vld [vmem:[%s8610_s14 + $0x130] sm:$0xff]   ;;  %v8211_v0 = vld [vmem:[%s8610_s14 + $0x138] sm:$0xff]  }
  0x2c   : > { %1943 = vst.msk [vmem:[#allocation5 + $0xf8] sm:$0xff] %vm1688_vm3, %v8474_v49  ;;  %1944 = vst [vmem:[#allocation5 + $0x100] sm:$0xff] %v8474_v49  ;;  %v8212_v1 = vld [vmem:[%s8610_s14 + $0x140] sm:$0xff]   ;;  %v8213_v2 = vld [vmem:[%s8610_s14 + $0x148] sm:$0xff]  }
  0x2d   : > { %3019 = vmatpush1.bf16.msra.mxu1 %v8235_v43  ;;  %1945 = vst.msk [vmem:[#allocation5 + $0x108] sm:$0xff] %vm1688_vm3, %v8474_v49  ;;  %1946 = vst [vmem:[#allocation5 + $0x110] sm:$0xff] %v8474_v49  ;;  %v8214_v3 = vld [vmem:[%s8610_s14 + $0x150] sm:$0xff]   ;;  %v8215_v4 = vld [vmem:[%s8610_s14 + $0x158] sm:$0xff]  }
  0x2e   : > { %3020 = vmatprep.subr.bf16.mxu1 %v11206_v33  ;;  %1947 = vst.msk [vmem:[#allocation5 + $0x118] sm:$0xff] %vm1688_vm3, %v8474_v49  ;;  %1948 = vst [vmem:[#allocation5 + $0x120] sm:$0xff] %v8474_v49  ;;  %v8216_v5 = vld [vmem:[%s8610_s14 + $0x160] sm:$0xff]   ;;  %v8217_v6 = vld [vmem:[%s8610_s14 + $0x168] sm:$0xff]  }
  0x2f   : > { %1949 = vst.msk [vmem:[#allocation5 + $0x128] sm:$0xff] %vm1688_vm3, %v8474_v49  ;;  %1950 = vst [vmem:[#allocation5 + $0x130] sm:$0xff] %v8474_v49  ;;  %v8218_v7 = vld [vmem:[%s8610_s14 + $0x170] sm:$0xff]   ;;  %v8219_v8 = vld [vmem:[%s8610_s14 + $0x178] sm:$0xff]  }
  0x30   : > { %1951 = vst.msk [vmem:[#allocation5 + $0x138] sm:$0xff] %vm1688_vm3, %v8474_v49  ;;  %1952 = vst [vmem:[#allocation5 + $0x140] sm:$0xff] %v8474_v49  ;;  %v8220_v9 = vld [vmem:[%s8610_s14 + $0x180] sm:$0xff]   ;;  %v8221_v10 = vld [vmem:[%s8610_s14 + $0x188] sm:$0xff]  }
  0x31   : > { %3021 = vmatpush1.bf16.msra.mxu1 %v8238_v45  ;;  %1953 = vst.msk [vmem:[#allocation5 + $0x148] sm:$0xff] %vm1688_vm3, %v8474_v49  ;;  %1954 = vst [vmem:[#allocation5 + $0x150] sm:$0xff] %v8474_v49  ;;  %v8222_v11 = vld [vmem:[%s8610_s14 + $0x190] sm:$0xff]   ;;  %v8253_v55 = vld [vmem:[%s11197_s3 + $0xd8] sm:$0xff]  }
  0x32   : > { %7794 = vmatmul.mubr.msk.bf16.gmra.mrb[4].mxu0 %vm879_vm2, %v8175_v12  ;;  %3022 = vmatprep.subr.bf16.mxu1 %v11206_v33  ;;  %1955 = vst.msk [vmem:[#allocation5 + $0x158] sm:$0xff] %vm1688_vm3, %v8474_v49  ;;  %1956 = vst [vmem:[#allocation5 + $0x160] sm:$0xff] %v8474_v49  ;;  %v8223_v12 = vld [vmem:[%s8610_s14 + $0x198] sm:$0xff]   ;;  %v8236_v37 = vld [vmem:[%s8610_s14 + $0x1d0] sm:$0xff]  }
  0x33   : > { %7797 = vmatprep.mubr.msk.bf16.mxu0 %vm879_vm2, %v8176_v13  ;;  %1957 = vst.msk [vmem:[#allocation5 + $0x168] sm:$0xff] %vm1688_vm3, %v8474_v49  ;;  %1958 = vst [vmem:[#allocation5 + $0x170] sm:$0xff] %v8474_v49  ;;  %v8224_v13 = vld [vmem:[%s8610_s14 + $0x1a0] sm:$0xff]  }
  0x34   : > { %1959 = vst.msk [vmem:[#allocation5 + $0x178] sm:$0xff] %vm1688_vm3, %v8474_v49  ;;  %1960 = vst [vmem:[#allocation5 + $0x180] sm:$0xff] %v8474_v49 }
  0x35   : > { %1961 = vst.msk [vmem:[#allocation5 + $0x188] sm:$0xff] %vm1688_vm3, %v8474_v49  ;;  %1962 = vst [vmem:[#allocation5 + $0x190] sm:$0xff] %v8474_v49  ;;  %3023 = vmatpush1.bf16.msra.mxu1 %v8706_v47 }
  0x36   : > { %1963 = vst.msk [vmem:[#allocation5 + $0x198] sm:$0xff] %vm1688_vm3, %v8474_v49  ;;  %1964 = vst [vmem:[#allocation5 + $0x1a0] sm:$0xff] %v8474_v49  ;;  %3024 = vmatprep.subr.bf16.mxu1 %v11206_v33 }
  0x37   : > { %1965 = vst.msk [vmem:[#allocation5 + $0x1a8] sm:$0xff] %vm1688_vm3, %v8474_v49  ;;  %1966 = vst [vmem:[#allocation5 + $0x1b0] sm:$0xff] %v8474_v49 }
  0x38   : > { %1967 = vst.msk [vmem:[#allocation5 + $0x1b8] sm:$0xff] %vm1688_vm3, %v8474_v49  ;;  %1968 = vst [vmem:[#allocation5 + $0x1c0] sm:$0xff] %v8474_v49 }
  0x39   : > { %1969 = vst.msk [vmem:[#allocation5 + $0x1c8] sm:$0xff] %vm1688_vm3, %v8474_v49  ;;  %1970 = vst [vmem:[#allocation5 + $0x1d0] sm:$0xff] %v8474_v49  ;;  %3025 = vmatpush1.bf16.msra.mxu1 %v8242_v50  ;;  %v8237_v50 = vld [vmem:[%s8610_s14 + $0x1d8] sm:$0xff]  }
  0x3a   : > { %7798 = vmatmul.mubr.msk.bf16.gmra.mrb[8].mxu0 %vm879_vm2, %v8177_v14  ;;  %1971 = vst.msk [vmem:[#allocation5 + $0x1d8] sm:$0xff] %vm1688_vm3, %v8474_v49  ;;  %1972 = vst [vmem:[#allocation5 + $0x1e0] sm:$0xff] %v8474_v49  ;;  %3026 = vmatprep.subr.bf16.mxu1 %v11206_v33  ;;  %v8225_v14 = vld [vmem:[%s8610_s14 + $0x1a8] sm:$0xff]  }
  0x3b   : > { %7801 = vmatprep.mubr.msk.bf16.mxu0 %vm879_vm2, %v8178_v15  ;;  %1973 = vst.msk [vmem:[#allocation5 + $0x1e8] sm:$0xff] %vm1688_vm3, %v8474_v49  ;;  %1974 = vst [vmem:[#allocation5 + $0x1f0] sm:$0xff] %v8474_v49  ;;  %v8246_v15 = vld [vmem:[%s11197_s3 + $0xa0] sm:$0xff]  }
  0x3c   : > { %1975 = vst.msk [vmem:[#allocation5 + $0x1f8] sm:$0xff] %vm1688_vm3, %v8474_v49  ;;  %1976 = vst [vmem:[#allocation5 + $0x200] sm:$0xff] %v8474_v49  ;;  %3478 = vmatpush1.bf16.msra.mxu0 %v8246_v15 }
  0x3d   : > { %1977 = vst.msk [vmem:[#allocation5 + $0x208] sm:$0xff] %vm1688_vm3, %v8474_v49  ;;  %1978 = vst [vmem:[#allocation5 + $0x210] sm:$0xff] %v8474_v49  ;;  %3027 = vmatpush1.bf16.msra.mxu1 %v8243_v52  ;;  %3479 = vmatprep.subr.bf16.mxu0 %v11206_v33 }
  0x3e   : > { %1979 = vst.msk [vmem:[#allocation5 + $0x218] sm:$0xff] %vm1688_vm3, %v8474_v49  ;;  %1980 = vst [vmem:[#allocation5 + $0x220] sm:$0xff] %v8474_v49  ;;  %3232 = vmatprep.subr.bf16.mxu1 %v11206_v33 }
  0x3f   : > { %1981 = vst.msk [vmem:[#allocation5 + $0x228] sm:$0xff] %vm1688_vm3, %v8474_v49  ;;  %1982 = vst [vmem:[#allocation5 + $0x230] sm:$0xff] %v8474_v49 }
  0x40   : > { %1983 = vst.msk [vmem:[#allocation5 + $0x238] sm:$0xff] %vm1688_vm3, %v8474_v49  ;;  %1985 = vst.msk [vmem:[#allocation5 + $0x248] sm:$0xff] %vm1688_vm3, %v8474_v49  ;;  %3041 = vmatmul.mubr.bf16.vlgmr.msra.gmra.mrb[0].mxu1 %v8475_v58 }
  0x41   : > { %1987 = vst.msk [vmem:[#allocation5 + $0x258] sm:$0xff] %vm1688_vm3, %v8474_v49  ;;  %1989 = vst.msk [vmem:[#allocation5 + $0x268] sm:$0xff] %vm1688_vm3, %v8474_v49 }
  0x42   : > { %7802 = vmatmul.mubr.msk.bf16.gmra.mrb[12].mxu0 %vm879_vm2, %v8179_v16  ;;  %1991 = vst.msk [vmem:[#allocation5 + $0x278] sm:$0xff] %vm1688_vm3, %v8474_v49  ;;  %4335 = vst.msk [vmem:[#allocation6 + $0x8] sm:$0xff] %vm1688_vm3, %v8474_v49  ;;  %v8228_v16 = vld [vmem:[%s8610_s14 + $0x1b0] sm:$0xff]  }
  0x43   : > { %7805 = vmatprep.mubr.msk.bf16.mxu0 %vm879_vm2, %v8180_v17  ;;  %4337 = vst.msk [vmem:[#allocation6 + $0x18] sm:$0xff] %vm1688_vm3, %v8474_v49  ;;  %4338 = vst [vmem:[#allocation6 + $0x20] sm:$0xff] %v8474_v49  ;;  %v8247_v17 = vld [vmem:[%s11197_s3 + $0xa8] sm:$0xff]  }
  0x44   : > { %4339 = vst.msk [vmem:[#allocation6 + $0x28] sm:$0xff] %vm1688_vm3, %v8474_v49  ;;  %4340 = vst [vmem:[#allocation6 + $0x30] sm:$0xff] %v8474_v49  ;;  %3480 = vmatpush1.bf16.msra.mxu0 %v8247_v17 }
  0x45   : > { %4341 = vst.msk [vmem:[#allocation6 + $0x38] sm:$0xff] %vm1688_vm3, %v8474_v49  ;;  %4342 = vst [vmem:[#allocation6 + $0x40] sm:$0xff] %v8474_v49  ;;  %3481 = vmatprep.subr.bf16.mxu0 %v11206_v33 }
  0x46   : > { %4343 = vst.msk [vmem:[#allocation6 + $0x48] sm:$0xff] %vm1688_vm3, %v8474_v49  ;;  %4344 = vst [vmem:[#allocation6 + $0x50] sm:$0xff] %v8474_v49 }
  0x47   : > { %4345 = vst.msk [vmem:[#allocation6 + $0x58] sm:$0xff] %vm1688_vm3, %v8474_v49  ;;  %4346 = vst [vmem:[#allocation6 + $0x60] sm:$0xff] %v8474_v49 }
  0x48   : > { %4347 = vst.msk [vmem:[#allocation6 + $0x68] sm:$0xff] %vm1688_vm3, %v8474_v49  ;;  %4348 = vst [vmem:[#allocation6 + $0x70] sm:$0xff] %v8474_v49 }
  0x49   : > { %4349 = vst.msk [vmem:[#allocation6 + $0x78] sm:$0xff] %vm1688_vm3, %v8474_v49  ;;  %4350 = vst [vmem:[#allocation6 + $0x80] sm:$0xff] %v8474_v49 }
  0x4a   : > { %7806 = vmatmul.mubr.msk.bf16.gmra.mrb[16].mxu0 %vm879_vm2, %v8181_v18  ;;  %4351 = vst.msk [vmem:[#allocation6 + $0x88] sm:$0xff] %vm1688_vm3, %v8474_v49  ;;  %4352 = vst [vmem:[#allocation6 + $0x90] sm:$0xff] %v8474_v49 }
  0x4b   : > { %7809 = vmatprep.mubr.msk.bf16.mxu0 %vm879_vm2, %v8182_v19  ;;  %4353 = vst.msk [vmem:[#allocation6 + $0x98] sm:$0xff] %vm1688_vm3, %v8474_v49  ;;  %4355 = vst.msk [vmem:[#allocation6 + $0xa8] sm:$0xff] %vm1688_vm3, %v8474_v49 }
  0x4c   : > { %4357 = vst.msk [vmem:[#allocation6 + $0xb8] sm:$0xff] %vm1688_vm3, %v8474_v49 }
  0x52   : > { %7810 = vmatmul.mubr.msk.bf16.gmra.mrb[20].mxu0 %vm879_vm2, %v8183_v20  ;;  %v8229_v20 = vld [vmem:[%s8610_s14 + $0x1b8] sm:$0xff]  }
  0x53   : > { %7813 = vmatprep.mubr.msk.bf16.mxu0 %vm879_vm2, %v8184_v21  ;;  %v8248_v21 = vld [vmem:[%s11197_s3 + $0xb0] sm:$0xff]  }
  0x54   : > { %3482 = vmatpush1.bf16.msra.mxu0 %v8248_v21 }
  0x55   : > { %3483 = vmatprep.subr.bf16.mxu0 %v11206_v33 }
  0x5a   : > { %7814 = vmatmul.mubr.msk.bf16.gmra.mrb[24].mxu0 %vm879_vm2, %v8185_v22 }
  0x5b   : > { %7817 = vmatprep.mubr.msk.bf16.mxu0 %vm879_vm2, %v8186_v23  ;;  %v8232_v23 = vld [vmem:[%s8610_s14 + $0x1c0] sm:$0xff]  }
  0x62   : > { %7818 = vmatmul.mubr.msk.bf16.gmra.mrb[28].mxu0 %vm879_vm2, %v8187_v24 }
  0x63   : > { %7821 = vmatprep.mubr.msk.bf16.mxu0 %vm879_vm2, %v8188_v25  ;;  %v8249_v25 = vld [vmem:[%s11197_s3 + $0xb8] sm:$0xff]  }
  0x64   : > { %3484 = vmatpush1.bf16.msra.mxu0 %v8249_v25 }
  0x65   : > { %3485 = vmatprep.subr.bf16.mxu0 %v11206_v33 }
  0x68   : > { %3486 = vmatpush1.bf16.msra.mxu0 %v8250_v32 }
  0x69   : > { %3487 = vmatprep.subr.bf16.mxu0 %v11206_v33 }
  0x6a   : > { %7822 = vmatmul.mubr.msk.bf16.gmra.mrb[32].mxu0 %vm879_vm2, %v8189_v26  ;;  %v8944_v26 = vld [vmem:[%s11196_s2] ss:$0 sm:$0xff] }
  0x6b   : > { %7825 = vmatprep.mubr.msk.bf16.mxu0 %vm879_vm2, %v8190_v27 }
  0x72   : > { %7826 = vmatmul.mubr.msk.bf16.gmra.mrb[36].mxu0 %vm879_vm2, %v8191_v28 }
  0x73   : > { %7829 = vmatprep.mubr.msk.bf16.mxu0 %vm879_vm2, %v8192_v29 }
  0x7a   : > { %7830 = vmatmul.mubr.msk.bf16.gmra.mrb[40].mxu0 %vm879_vm2, %v8193_v30 }
  0x7b   : > { %7833 = vmatprep.mubr.msk.bf16.mxu0 %vm879_vm2, %v8194_v31  ;;  %v8233_v31 = vld [vmem:[%s8610_s14 + $0x1c8] sm:$0xff]  }
  0x82   : > { %7834 = vmatmul.mubr.msk.bf16.gmra.mrb[44].mxu0 %vm879_vm2, %v8195_v34 }
  0x83   : > { %7837 = vmatprep.mubr.msk.bf16.mxu0 %vm879_vm2, %v8196_v36 }
  0x8a   : > { %7838 = vmatmul.mubr.msk.bf16.gmra.mrb[48].mxu0 %vm879_vm2, %v8197_v38 }
  0x8b   : > { %7841 = vmatprep.mubr.msk.bf16.mxu0 %vm879_vm2, %v8198_v40 }
  0x92   : > { %7842 = vmatmul.mubr.msk.bf16.gmra.mrb[52].mxu0 %vm879_vm2, %v8199_v42 }
  0x93   : > { %7845 = vmatprep.mubr.msk.bf16.mxu0 %vm879_vm2, %v8200_v44 }
  0x9a   : > { %7846 = vmatmul.mubr.msk.bf16.gmra.mrb[56].mxu0 %vm879_vm2, %v8700_v46  ;;  %v8251_v46 = vld [vmem:[%s11197_s3 + $0xc8] sm:$0xff]  }
  0x9b   : > { %7849 = vmatprep.mubr.msk.bf16.mxu0 %vm879_vm2, %v8709_v48  ;;  %3488 = vmatpush1.bf16.msra.mxu0 %v8251_v46 }
  0x9c   : > { %3489 = vmatprep.subr.bf16.mxu0 %v11206_v33 }
  0xa2   : > { %7850 = vmatmul.mubr.msk.bf16.gmra.mrb[60].mxu0 %vm879_vm2, %v8203_v51  ;;  %v8252_v51 = vld [vmem:[%s11197_s3 + $0xd0] sm:$0xff]  }
  0xa3   : > { %7853 = vmatprep.mubr.msk.bf16.mxu0 %vm879_vm2, %v8204_v53  ;;  %v8240_v53 = vld [vmem:[%s8610_s14 + $0x1e0] sm:$0xff]   ;;  %3490 = vmatpush1.bf16.msra.mxu0 %v8252_v51 }
  0xa4   : > { %3491 = vmatprep.subr.bf16.mxu0 %v11206_v33 }
  0xa7   : > { %3492 = vmatpush1.bf16.msra.mxu0 %v8253_v55 }
  0xa8   : > { %3493 = vmatprep.subr.bf16.mxu0 %v11206_v33 }
  0xaa   : > { %7854 = vmatmul.mubr.msk.bf16.gmra.mrb[64].mxu0 %vm879_vm2, %v8205_v57 }
  0xab   : > { %7857 = vmatprep.mubr.msk.bf16.mxu0 %vm879_vm2, %v8206_v59 }
  0xb2   : > { %7858 = vmatmul.mubr.msk.bf16.gmra.mrb[68].mxu0 %vm879_vm2, %v8207_v60 }
  0xb3   : > { %7861 = vmatprep.mubr.msk.bf16.mxu0 %vm879_vm2, %v8208_v61 }
  0xba   : > { %7862 = vmatmul.mubr.msk.bf16.gmra.mrb[72].mxu0 %vm879_vm2, %v8209_v62 }
  0xbb   : > { %7865 = vmatprep.mubr.msk.bf16.mxu0 %vm879_vm2, %v8210_v63 }
  0xc2   : > { %7866 = vmatmul.mubr.msk.bf16.gmra.mrb[76].mxu0 %vm879_vm2, %v8211_v0 }
  0xc3   : > { %7869 = vmatprep.mubr.msk.bf16.mxu0 %vm879_vm2, %v8212_v1 }
  0xca   : > { %7870 = vmatmul.mubr.msk.bf16.gmra.mrb[80].mxu0 %vm879_vm2, %v8213_v2 }
  0xcb   : > { %7873 = vmatprep.mubr.msk.bf16.mxu0 %vm879_vm2, %v8214_v3 }
  0xd2   : > { %7874 = vmatmul.mubr.msk.bf16.gmra.mrb[84].mxu0 %vm879_vm2, %v8215_v4 }
  0xd3   : > { %7877 = vmatprep.mubr.msk.bf16.mxu0 %vm879_vm2, %v8216_v5 }
  0xda   : > { %7878 = vmatmul.mubr.msk.bf16.gmra.mrb[88].mxu0 %vm879_vm2, %v8217_v6 }
  0xdb   : > { %7881 = vmatprep.mubr.msk.bf16.mxu0 %vm879_vm2, %v8218_v7  ;;  %v8241_v7 = vld [vmem:[%s8610_s14 + $0x1e8] sm:$0xff]  }
  0xe2   : > { %7882 = vmatmul.mubr.msk.bf16.gmra.mrb[92].mxu0 %vm879_vm2, %v8219_v8 }
  0xe3   : > { %7885 = vmatprep.mubr.msk.bf16.mxu0 %vm879_vm2, %v8220_v9 }
  0xea   : > { %7886 = vmatmul.mubr.msk.bf16.gmra.mrb[96].mxu0 %vm879_vm2, %v8221_v10 }
  0xeb   : > { %7889 = vmatprep.mubr.msk.bf16.mxu0 %vm879_vm2, %v8222_v11 }
  0xf2   : > { %7890 = vmatmul.mubr.msk.bf16.gmra.mrb[100].mxu0 %vm879_vm2, %v8223_v12 }
  0xf3   : > { %7893 = vmatprep.mubr.msk.bf16.mxu0 %vm879_vm2, %v8224_v13  ;;  %v8244_v13 = vld [vmem:[%s8610_s14 + $0x1f0] sm:$0xff]  }
  0xfa   : > { %7894 = vmatmul.mubr.msk.bf16.gmra.mrb[104].mxu0 %vm879_vm2, %v8225_v14  ;;  %v8254_v14 = vld [vmem:[%s11197_s3 + $0xe0] sm:$0xff]  }
  0xfb   : > { %7897 = vmatprep.mubr.msk.bf16.mxu0 %vm879_vm2, %v8228_v16  ;;  %3494 = vmatpush1.bf16.msra.mxu0 %v8254_v14 }
  0xfc   : > { %3495 = vmatprep.subr.bf16.mxu0 %v11206_v33 }
  0xfd   : > { %v7791_v18 = vpop.f32.mrb[0].mxu0 }
  0xfe   : > { %v1113_v19 = vpop.f32.mrb[1].mxu0  ;;  %v1122_v28 = vadd.f32 %v7791_v18, %v8944_v26 }
  0xff   : > { %v7792_v22 = vpop.f32.mrb[2].mxu0  ;;  %v1114_v34 = vadd.f32 %v8944_v26, %v1113_v19 }
 0x100   : > { %v1116_v24 = vpop.f32.mrb[3].mxu0  ;;  %v1125_v38 = vadd.f32 %v7792_v22, %v8944_v26 }
 0x101   : > { %v1117_v42 = vadd.f32 %v8944_v26, %v1116_v24 }
 0x102   : > { %7898 = vmatmul.mubr.msk.bf16.gmra.mrb[108].mxu0 %vm879_vm2, %v8229_v20 }
 0x103   : > { %7901 = vmatprep.mubr.msk.bf16.mxu0 %vm879_vm2, %v8232_v23 }
 0x105   : > { %v7795_v27 = vpop.f32.mrb[4].mxu0 }
 0x106   : > { %v1138_v29 = vadd.f32 %v7795_v27, %v8944_v26  ;;  %v1129_v30 = vpop.f32.mrb[5].mxu0 }
 0x107   : > { %v1130_v35 = vadd.f32 %v8944_v26, %v1129_v30  ;;  %v7796_v36 = vpop.f32.mrb[6].mxu0 }
 0x108   : > { %v1626_v39 = vmax.f32 %v1122_v28, %v1138_v29  ;;  %v1141_v40 = vadd.f32 %v7796_v36, %v8944_v26  ;;  %v1132_v41 = vpop.f32.mrb[7].mxu0  ;;  %v8255_v28 = vld [vmem:[%s11197_s3 + $0xe8] sm:$0xff]  }
 0x109   : > { %v1624_v43 = vmax.f32 %v1114_v34, %v1130_v35  ;;  %v1133_v44 = vadd.f32 %v8944_v26, %v1132_v41  ;;  %v8245_v35 = vld [vmem:[%s8610_s14 + $0x1f8] sm:$0xff]   ;;  %3496 = vmatpush1.bf16.msra.mxu0 %v8255_v28 }
 0x10a   : > { %1691 = vst.msk [vmem:[#allocation2 + $0x10] sm:$0xff] %vm1688_vm3, %v1626_v39  ;;  %v1627_v45 = vmax.f32 %v1125_v38, %v1141_v40  ;;  %7902 = vmatmul.mubr.msk.bf16.gmra.mrb[112].mxu0 %vm879_vm2, %v8233_v31  ;;  %4031 = vmatprep.subr.bf16.mxu0 %v11206_v33 }
 0x10b   : > { %1689 = vst.msk [vmem:[#allocation2] sm:$0xff] %vm1688_vm3, %v1624_v43  ;;  %v1625_v47 = vmax.f32 %v1117_v42, %v1133_v44  ;;  %7905 = vmatprep.mubr.msk.bf16.mxu0 %vm879_vm2, %v8236_v37 }
 0x10c   : > { %1692 = vst.msk [vmem:[#allocation2 + $0x18] sm:$0xff] %vm1688_vm3, %v1627_v45 }
 0x10d   : > { %1690 = vst.msk [vmem:[#allocation2 + $0x8] sm:$0xff] %vm1688_vm3, %v1625_v47  ;;  %v7799_v48 = vpop.f32.mrb[8].mxu0 }
 0x10e   : > { %v1145_v49 = vpop.f32.mrb[9].mxu0  ;;  %v1154_v63 = vadd.f32 %v7799_v48, %v8944_v26 }
 0x10f   : > { %v7800_v52 = vpop.f32.mrb[10].mxu0  ;;  %v1146_v2 = vadd.f32 %v8944_v26, %v1145_v49 }
 0x110   : > { %v1148_v54 = vpop.f32.mrb[11].mxu0  ;;  %v1157_v3 = vadd.f32 %v7800_v52, %v8944_v26 }
 0x111   : > { %v1149_v20 = vadd.f32 %v8944_v26, %v1148_v54 }
 0x112   : > { %7906 = vmatmul.mubr.msk.bf16.gmra.mrb[116].mxu0 %vm879_vm2, %v8237_v50 }
 0x113   : > { %v1755_v57 = vld [vmem:[#allocation2 + $0x10] ss:$2 sm:$0xff]  ;;  %v1819_v59 = vld [vmem:[#allocation2 + $0x11] ss:$2 sm:$0xff]  ;;  %7909 = vmatprep.mubr.msk.bf16.mxu0 %vm879_vm2, %v8240_v53 }
 0x114   : > { %v8983_v60 = vmax.f32 %v1755_v57, %v1819_v59  ;;  %v1753_v61 = vld [vmem:[#allocation2] ss:$2 sm:$0xff]  ;;  %v1817_v62 = vld [vmem:[#allocation2 + $0x1] ss:$2 sm:$0xff] }
 0x115   : > { %v7803_v0 = vpop.f32.mrb[12].mxu0  ;;  %v1880_v1 = vmax.f32 %v1753_v61, %v1817_v62 }
 0x116   : > { %v1170_v4 = vadd.f32 %v7803_v0, %v8944_v26  ;;  %2320 = vrot.lane.b32.xlu1 %v8983_v60, %s8476_s22  ;;  %v2627_v5 = vrot.slane %v8983_v60, 2  ;;  %v1161_v6 = vpop.f32.mrb[13].mxu0  ;;  %v2141_v12 = vrot.slane %v8983_v60, 7  ;;  %v2026_v19 = vrot.slane %v8983_v60, 6 }
 0x117   : > { %v1162_v8 = vadd.f32 %v8944_v26, %v1161_v6  ;;  %v7804_v9 = vpop.f32.mrb[14].mxu0  ;;  %v2140_v10 = vrot.slane %v1880_v1, 7  ;;  %v2626_v11 = vrot.slane %v1880_v1, 2  ;;  %v2025_v18 = vrot.slane %v1880_v1, 6 }
 0x118   : > { %v1630_v15 = vmax.f32 %v1154_v63, %v1170_v4  ;;  %2708 = vst.msk [vmem:[#allocation5 + $0x58] sm:$0x3f] %vm2707_vm4, %v2627_v5  ;;  %v1173_v16 = vadd.f32 %v7804_v9, %v8944_v26  ;;  %v1164_v17 = vpop.f32.mrb[15].mxu0  ;;  %v2449_v30 = vrot.slane %v8983_v60, 1  ;;  %v2448_v31 = vrot.slane %v1880_v1, 1 }
 0x119   : > { %v1628_v21 = vmax.f32 %v1146_v2, %v1162_v8  ;;  %v1165_v22 = vadd.f32 %v8944_v26, %v1164_v17  ;;  %v2628_v23 = vsel %vm1073_vm1, %v2626_v11, %v2627_v5  ;;  %2188 = vrot.lane.b32.xlu0 %v2140_v10, %s8477_s29  ;;  %2107 = vst.msk [vmem:[#allocation5 + $0x40] sm:$0xfc] %vm2106_vm6, %v2025_v18 }
 0x11a   : > { %1695 = vst.msk [vmem:[#allocation2 + $0x30] sm:$0xff] %vm1688_vm3, %v1630_v15  ;;  %v1631_v24 = vmax.f32 %v1157_v3, %v1173_v16  ;;  %2706 = vst.msk [vmem:[#allocation5 + $0x48] sm:$0xff] %vm1688_vm3, %v2628_v23  ;;  %7910 = vmatmul.mubr.msk.bf16.gmra.mrb[120].mxu0 %vm879_vm2, %v8241_v7  ;;  %2318 = vrot.lane.b32.xlu1 %v1880_v1, %s8476_s22  ;;  %v2027_v25 = vsel %vm2024_vm7, %v2025_v18, %v2026_v19 }
 0x11b   : > { %1693 = vst.msk [vmem:[#allocation2 + $0x20] sm:$0xff] %vm1688_vm3, %v1628_v21  ;;  %v1629_v27 = vmax.f32 %v1149_v20, %v1165_v22  ;;  %7913 = vmatprep.mubr.msk.bf16.mxu0 %vm879_vm2, %v8244_v13  ;;  %2108 = vst.msk [vmem:[#allocation5 + $0x50] sm:$0xff] %vm1688_vm3, %v2027_v25  ;;  %v2142_v29 = vsel %vm2139_vm5, %v2140_v10, %v2141_v12  ;;  %v2450_v38 = vsel %vm2447_vm8, %v2448_v31, %v2449_v30 }
 0x11c   : > { %1696 = vst.msk [vmem:[#allocation2 + $0x38] sm:$0xff] %vm1688_vm3, %v1631_v24 }
 0x11d   : > { %1694 = vst.msk [vmem:[#allocation2 + $0x28] sm:$0xff] %vm1688_vm3, %v1629_v27  ;;  %v7807_v32 = vpop.f32.mrb[16].mxu0  ;;  %2190 = vrot.lane.b32.xlu0 %v2142_v29, %s8477_s29 }
 0x11e   : > { %v1177_v34 = vpop.f32.mrb[17].mxu0  ;;  %2498 = vrot.lane.b32.xlu1 %v2449_v30, %s8478_s13  ;;  %v1186_v47 = vadd.f32 %v7807_v32, %v8944_v26 }
 0x11f   : > { %v7808_v36 = vpop.f32.mrb[18].mxu0  ;;  %v2750_v40 = vld [vmem:[#allocation5 + $0x58] sm:$0xff]  ;;  %v1178_v48 = vadd.f32 %v8944_v26, %v1177_v34 }
 0x120   : > { %v1180_v37 = vpop.f32.mrb[19].mxu0  ;;  %v1189_v51 = vadd.f32 %v7808_v36, %v8944_v26 }
 0x121   : > { %2496 = vrot.lane.b32.xlu0 %v2450_v38, %s8478_s13  ;;  %v2748_v39 = vld [vmem:[#allocation5 + $0x48] sm:$0xff]  ;;  %v1181_v52 = vadd.f32 %v8944_v26, %v1180_v37 }
 0x122   : > { %7914 = vmatmul.mubr.msk.bf16.gmra.mrb[124].mxu0 %vm879_vm2, %v8245_v35  ;;  %v9031_v41 = vpack.c.bf16 %v2750_v40, %v2748_v39 }
 0x123   : > { %v1759_v42 = vld [vmem:[#allocation2 + $0x30] ss:$2 sm:$0xff]  ;;  %v1823_v43 = vld [vmem:[#allocation2 + $0x31] ss:$2 sm:$0xff] }
 0x124   : > { %7041 = vmatprep.mubr.msk.bf16.mxu1 %vm1688_vm3, %v9031_v41  ;;  %7112 = vmatprep.mubr.msk.bf16.mxu0 %vm1688_vm3, %v9031_v41  ;;  %v1883_v44 = vmax.f32 %v1759_v42, %v1823_v43  ;;  %v1757_v45 = vld [vmem:[#allocation2 + $0x20] ss:$2 sm:$0xff]  ;;  %v1821_v46 = vld [vmem:[#allocation2 + $0x21] ss:$2 sm:$0xff] }
 0x125   : > { %v7811_v49 = vpop.f32.mrb[20].mxu0  ;;  %v1882_v50 = vmax.f32 %v1757_v45, %v1821_v46 }
 0x126   : > { %v1202_v53 = vadd.f32 %v7811_v49, %v8944_v26  ;;  %v1193_v54 = vpop.f32.mrb[21].mxu0  ;;  %v2630_v55 = vrot.slane %v1883_v44, 2  ;;  %2324 = vrot.lane.b32.xlu1 %v1883_v44, %s8476_s22  ;;  %v2452_v61 = vrot.slane %v1883_v44, 1  ;;  %v2144_v62 = vrot.slane %v1883_v44, 7 }
 0x127   : > { %v1194_v57 = vadd.f32 %v8944_v26, %v1193_v54  ;;  %v7812_v59 = vpop.f32.mrb[22].mxu0  ;;  %v2629_v60 = vrot.slane %v1882_v50, 2  ;;  %2322 = vrot.lane.b32.xlu0 %v1882_v50, %s8476_s22  ;;  %v2028_v2 = vrot.slane %v1882_v50, 6  ;;  %v2029_v3 = vrot.slane %v1883_v44, 6 }
 0x128   : > { %v1634_v63 = vmax.f32 %v1186_v47, %v1202_v53  ;;  %2710 = vst.msk [vmem:[#allocation5 + $0x78] sm:$0x3f] %vm2707_vm4, %v2630_v55  ;;  %v1205_v0 = vadd.f32 %v7812_v59, %v8944_v26  ;;  %v1196_v1 = vpop.f32.mrb[23].mxu0  ;;  %v2143_v7 = vrot.slane %v1882_v50, 7  ;;  %v2451_v9 = vrot.slane %v1882_v50, 1 }
 0x129   : > { %v1632_v4 = vmax.f32 %v1178_v48, %v1194_v57  ;;  %v2631_v5 = vsel %vm1073_vm1, %v2629_v60, %v2630_v55  ;;  %v1197_v6 = vadd.f32 %v8944_v26, %v1196_v1  ;;  %2109 = vst.msk [vmem:[#allocation5 + $0x60] sm:$0xfc] %vm2106_vm6, %v2028_v2  ;;  %v2030_v10 = vsel %vm2024_vm7, %v2028_v2, %v2029_v3 }
 0x12a   : > { %1699 = vst.msk [vmem:[#allocation2 + $0x50] sm:$0xff] %vm1688_vm3, %v1634_v63  ;;  %v1635_v8 = vmax.f32 %v1189_v51, %v1205_v0  ;;  %2709 = vst.msk [vmem:[#allocation5 + $0x68] sm:$0xff] %vm1688_vm3, %v2631_v5  ;;  %2502 = vrot.lane.b32.xlu1 %v2452_v61, %s8478_s13  ;;  %v2145_v13 = vsel %vm2139_vm5, %v2143_v7, %v2144_v62  ;;  %v2453_v15 = vsel %vm2447_vm8, %v2451_v9, %v2452_v61 }
 0x12b   : > { %1697 = vst.msk [vmem:[#allocation2 + $0x40] sm:$0xff] %vm1688_vm3, %v1632_v4  ;;  %v1633_v11 = vmax.f32 %v1181_v52, %v1197_v6  ;;  %2192 = vrot.lane.b32.xlu0 %v2143_v7, %s8477_s29  ;;  %2110 = vst.msk [vmem:[#allocation5 + $0x70] sm:$0xff] %vm1688_vm3, %v2030_v10 }
 0x12c   : > { %1700 = vst.msk [vmem:[#allocation2 + $0x58] sm:$0xff] %vm1688_vm3, %v1635_v8 }
 0x12d   : > { %1698 = vst.msk [vmem:[#allocation2 + $0x48] sm:$0xff] %vm1688_vm3, %v1633_v11  ;;  %v7815_v12 = vpop.f32.mrb[24].mxu0 }
 0x12e   : > { %v1209_v14 = vpop.f32.mrb[25].mxu0  ;;  %2194 = vrot.lane.b32.xlu1 %v2145_v13, %s8477_s29  ;;  %v1218_v23 = vadd.f32 %v7815_v12, %v8944_v26 }
 0x12f   : > { %v7816_v16 = vpop.f32.mrb[26].mxu0  ;;  %2500 = vrot.lane.b32.xlu0 %v2453_v15, %s8478_s13  ;;  %v1210_v24 = vadd.f32 %v8944_v26, %v1209_v14 }
 0x130   : > { %v1212_v17 = vpop.f32.mrb[27].mxu0  ;;  %v1221_v28 = vadd.f32 %v7816_v16, %v8944_v26 }
 0x131   : > { %v1213_v29 = vadd.f32 %v8944_v26, %v1212_v17 }
 0x133   : > { %v1763_v18 = vld [vmem:[#allocation2 + $0x50] ss:$2 sm:$0xff]  ;;  %v1827_v19 = vld [vmem:[#allocation2 + $0x51] ss:$2 sm:$0xff] }
 0x134   : > { %v1885_v20 = vmax.f32 %v1763_v18, %v1827_v19  ;;  %v1761_v21 = vld [vmem:[#allocation2 + $0x40] ss:$2 sm:$0xff]  ;;  %v1825_v22 = vld [vmem:[#allocation2 + $0x41] ss:$2 sm:$0xff] }
 0x135   : > { %v7819_v25 = vpop.f32.mrb[28].mxu0  ;;  %v1884_v27 = vmax.f32 %v1761_v21, %v1825_v22 }
 0x136   : > { %v1234_v30 = vadd.f32 %v7819_v25, %v8944_v26  ;;  %v1225_v31 = vpop.f32.mrb[29].mxu0  ;;  %v2633_v32 = vrot.slane %v1885_v20, 2  ;;  %2328 = vrot.lane.b32.xlu1 %v1885_v20, %s8476_s22  ;;  %v2455_v37 = vrot.slane %v1885_v20, 1  ;;  %v2147_v38 = vrot.slane %v1885_v20, 7 }
 0x137   : > { %v1226_v34 = vadd.f32 %v8944_v26, %v1225_v31  ;;  %v7820_v35 = vpop.f32.mrb[30].mxu0  ;;  %v2632_v36 = vrot.slane %v1884_v27, 2  ;;  %2326 = vrot.lane.b32.xlu0 %v1884_v27, %s8476_s22  ;;  %v2031_v43 = vrot.slane %v1884_v27, 6  ;;  %v2032_v44 = vrot.slane %v1885_v20, 6 }
 0x138   : > { %v1638_v39 = vmax.f32 %v1218_v23, %v1234_v30  ;;  %2712 = vst.msk [vmem:[#allocation5 + $0x98] sm:$0x3f] %vm2707_vm4, %v2633_v32  ;;  %v1237_v40 = vadd.f32 %v7820_v35, %v8944_v26  ;;  %v1228_v42 = vpop.f32.mrb[31].mxu0  ;;  %v2146_v48 = vrot.slane %v1884_v27, 7  ;;  %v2454_v50 = vrot.slane %v1884_v27, 1 }
 0x139   : > { %v1636_v45 = vmax.f32 %v1210_v24, %v1226_v34  ;;  %v2634_v46 = vsel %vm1073_vm1, %v2632_v36, %v2633_v32  ;;  %v1229_v47 = vadd.f32 %v8944_v26, %v1228_v42  ;;  %2111 = vst.msk [vmem:[#allocation5 + $0x80] sm:$0xfc] %vm2106_vm6, %v2031_v43  ;;  %v2033_v51 = vsel %vm2024_vm7, %v2031_v43, %v2032_v44 }
 0x13a   : > { %1703 = vst.msk [vmem:[#allocation2 + $0x70] sm:$0xff] %vm1688_vm3, %v1638_v39  ;;  %v1639_v49 = vmax.f32 %v1221_v28, %v1237_v40  ;;  %2711 = vst.msk [vmem:[#allocation5 + $0x88] sm:$0xff] %vm1688_vm3, %v2634_v46  ;;  %2506 = vrot.lane.b32.xlu1 %v2455_v37, %s8478_s13  ;;  %v2148_v54 = vsel %vm2139_vm5, %v2146_v48, %v2147_v38  ;;  %v2456_v57 = vsel %vm2447_vm8, %v2454_v50, %v2455_v37 }
 0x13b   : > { %1701 = vst.msk [vmem:[#allocation2 + $0x60] sm:$0xff] %vm1688_vm3, %v1636_v45  ;;  %v1637_v52 = vmax.f32 %v1213_v29, %v1229_v47  ;;  %2196 = vrot.lane.b32.xlu0 %v2146_v48, %s8477_s29  ;;  %2112 = vst.msk [vmem:[#allocation5 + $0x90] sm:$0xff] %vm1688_vm3, %v2033_v51 }
 0x13c   : > { %1704 = vst.msk [vmem:[#allocation2 + $0x78] sm:$0xff] %vm1688_vm3, %v1639_v49 }
 0x13d   : > { %1702 = vst.msk [vmem:[#allocation2 + $0x68] sm:$0xff] %vm1688_vm3, %v1637_v52  ;;  %v7823_v53 = vpop.f32.mrb[32].mxu0 }
 0x13e   : > { %v1241_v55 = vpop.f32.mrb[33].mxu0  ;;  %2198 = vrot.lane.b32.xlu1 %v2148_v54, %s8477_s29  ;;  %v1250_v2 = vadd.f32 %v7823_v53, %v8944_v26 }
 0x13f   : > { %v7824_v59 = vpop.f32.mrb[34].mxu0  ;;  %2504 = vrot.lane.b32.xlu0 %v2456_v57, %s8478_s13  ;;  %v1242_v3 = vadd.f32 %v8944_v26, %v1241_v55 }
 0x140   : > { %v1244_v60 = vpop.f32.mrb[35].mxu0  ;;  %v1253_v6 = vadd.f32 %v7824_v59, %v8944_v26 }
 0x141   : > { %v1245_v7 = vadd.f32 %v8944_v26, %v1244_v60 }
 0x143   : > { %v1767_v61 = vld [vmem:[#allocation2 + $0x70] ss:$2 sm:$0xff]  ;;  %v1831_v62 = vld [vmem:[#allocation2 + $0x71] ss:$2 sm:$0xff] }
 0x144   : > { %v1887_v63 = vmax.f32 %v1767_v61, %v1831_v62  ;;  %v1765_v0 = vld [vmem:[#allocation2 + $0x60] ss:$2 sm:$0xff]  ;;  %v1829_v1 = vld [vmem:[#allocation2 + $0x61] ss:$2 sm:$0xff] }
 0x145   : > { %v7827_v4 = vpop.f32.mrb[36].mxu0  ;;  %v1886_v5 = vmax.f32 %v1765_v0, %v1829_v1 }
 0x146   : > { %v1266_v8 = vadd.f32 %v7827_v4, %v8944_v26  ;;  %v1257_v9 = vpop.f32.mrb[37].mxu0  ;;  %v2636_v10 = vrot.slane %v1887_v63, 2  ;;  %2332 = vrot.lane.b32.xlu1 %v1887_v63, %s8476_s22  ;;  %v2458_v14 = vrot.slane %v1887_v63, 1  ;;  %v2150_v15 = vrot.slane %v1887_v63, 7 }
 0x147   : > { %v1258_v11 = vadd.f32 %v8944_v26, %v1257_v9  ;;  %v7828_v12 = vpop.f32.mrb[38].mxu0  ;;  %v2635_v13 = vrot.slane %v1886_v5, 2  ;;  %2330 = vrot.lane.b32.xlu0 %v1886_v5, %s8476_s22  ;;  %v2034_v19 = vrot.slane %v1886_v5, 6  ;;  %v2035_v20 = vrot.slane %v1887_v63, 6 }
 0x148   : > { %v1642_v16 = vmax.f32 %v1250_v2, %v1266_v8  ;;  %2714 = vst.msk [vmem:[#allocation5 + $0xb8] sm:$0x3f] %vm2707_vm4, %v2636_v10  ;;  %v1269_v17 = vadd.f32 %v7828_v12, %v8944_v26  ;;  %v1260_v18 = vpop.f32.mrb[39].mxu0  ;;  %v2149_v24 = vrot.slane %v1886_v5, 7  ;;  %v2457_v27 = vrot.slane %v1886_v5, 1 }
 0x149   : > { %v1640_v21 = vmax.f32 %v1242_v3, %v1258_v11  ;;  %v2637_v22 = vsel %vm1073_vm1, %v2635_v13, %v2636_v10  ;;  %v1261_v23 = vadd.f32 %v8944_v26, %v1260_v18  ;;  %2113 = vst.msk [vmem:[#allocation5 + $0xa0] sm:$0xfc] %vm2106_vm6, %v2034_v19  ;;  %v2036_v28 = vsel %vm2024_vm7, %v2034_v19, %v2035_v20 }
 0x14a   : > { %1707 = vst.msk [vmem:[#allocation2 + $0x90] sm:$0xff] %vm1688_vm3, %v1642_v16  ;;  %v1643_v25 = vmax.f32 %v1253_v6, %v1269_v17  ;;  %2713 = vst.msk [vmem:[#allocation5 + $0xa8] sm:$0xff] %vm1688_vm3, %v2637_v22  ;;  %2510 = vrot.lane.b32.xlu1 %v2458_v14, %s8478_s13  ;;  %v2151_v31 = vsel %vm2139_vm5, %v2149_v24, %v2150_v15  ;;  %v2459_v34 = vsel %vm2447_vm8, %v2457_v27, %v2458_v14 }
 0x14b   : > { %1705 = vst.msk [vmem:[#allocation2 + $0x80] sm:$0xff] %vm1688_vm3, %v1640_v21  ;;  %v1641_v29 = vmax.f32 %v1245_v7, %v1261_v23  ;;  %2200 = vrot.lane.b32.xlu0 %v2149_v24, %s8477_s29  ;;  %2114 = vst.msk [vmem:[#allocation5 + $0xb0] sm:$0xff] %vm1688_vm3, %v2036_v28 }
 0x14c   : > { %1708 = vst.msk [vmem:[#allocation2 + $0x98] sm:$0xff] %vm1688_vm3, %v1643_v25 }
 0x14d   : > { %1706 = vst.msk [vmem:[#allocation2 + $0x88] sm:$0xff] %vm1688_vm3, %v1641_v29  ;;  %v7831_v30 = vpop.f32.mrb[40].mxu0 }
 0x14e   : > { %v1273_v32 = vpop.f32.mrb[41].mxu0  ;;  %2202 = vrot.lane.b32.xlu1 %v2151_v31, %s8477_s29  ;;  %v1282_v43 = vadd.f32 %v7831_v30, %v8944_v26 }
 0x14f   : > { %v7832_v35 = vpop.f32.mrb[42].mxu0  ;;  %2508 = vrot.lane.b32.xlu0 %v2459_v34, %s8478_s13  ;;  %v1274_v44 = vadd.f32 %v8944_v26, %v1273_v32 }
 0x150   : > { %v1276_v36 = vpop.f32.mrb[43].mxu0  ;;  %v1285_v47 = vadd.f32 %v7832_v35, %v8944_v26 }
 0x151   : > { %v1277_v48 = vadd.f32 %v8944_v26, %v1276_v36 }
 0x153   : > { %v1771_v37 = vld [vmem:[#allocation2 + $0x90] ss:$2 sm:$0xff]  ;;  %v1835_v38 = vld [vmem:[#allocation2 + $0x91] ss:$2 sm:$0xff] }
 0x154   : > { %v1889_v39 = vmax.f32 %v1771_v37, %v1835_v38  ;;  %v1769_v40 = vld [vmem:[#allocation2 + $0x80] ss:$2 sm:$0xff]  ;;  %v1833_v42 = vld [vmem:[#allocation2 + $0x81] ss:$2 sm:$0xff] }
 0x155   : > { %v7835_v45 = vpop.f32.mrb[44].mxu0  ;;  %v1888_v46 = vmax.f32 %v1769_v40, %v1833_v42 }
 0x156   : > { %v1298_v49 = vadd.f32 %v7835_v45, %v8944_v26  ;;  %v1289_v50 = vpop.f32.mrb[45].mxu0  ;;  %v2639_v51 = vrot.slane %v1889_v39, 2  ;;  %2336 = vrot.lane.b32.xlu1 %v1889_v39, %s8476_s22  ;;  %v2461_v55 = vrot.slane %v1889_v39, 1  ;;  %v2153_v57 = vrot.slane %v1889_v39, 7 }
 0x157   : > { %v1290_v52 = vadd.f32 %v8944_v26, %v1289_v50  ;;  %v7836_v53 = vpop.f32.mrb[46].mxu0  ;;  %v2638_v54 = vrot.slane %v1888_v46, 2  ;;  %2334 = vrot.lane.b32.xlu0 %v1888_v46, %s8476_s22  ;;  %v2037_v62 = vrot.slane %v1888_v46, 6  ;;  %v2038_v63 = vrot.slane %v1889_v39, 6 }
 0x158   : > { %v1646_v59 = vmax.f32 %v1282_v43, %v1298_v49  ;;  %2716 = vst.msk [vmem:[#allocation5 + $0xd8] sm:$0x3f] %vm2707_vm4, %v2639_v51  ;;  %v1301_v60 = vadd.f32 %v7836_v53, %v8944_v26  ;;  %v1292_v61 = vpop.f32.mrb[47].mxu0  ;;  %v2152_v3 = vrot.slane %v1888_v46, 7  ;;  %v2460_v5 = vrot.slane %v1888_v46, 1 }
 0x159   : > { %v1644_v0 = vmax.f32 %v1274_v44, %v1290_v52  ;;  %v2640_v1 = vsel %vm1073_vm1, %v2638_v54, %v2639_v51  ;;  %v1293_v2 = vadd.f32 %v8944_v26, %v1292_v61  ;;  %2115 = vst.msk [vmem:[#allocation5 + $0xc0] sm:$0xfc] %vm2106_vm6, %v2037_v62  ;;  %v2039_v6 = vsel %vm2024_vm7, %v2037_v62, %v2038_v63 }
 0x15a   : > { %1711 = vst.msk [vmem:[#allocation2 + $0xb0] sm:$0xff] %vm1688_vm3, %v1646_v59  ;;  %v1647_v4 = vmax.f32 %v1285_v47, %v1301_v60  ;;  %2715 = vst.msk [vmem:[#allocation5 + $0xc8] sm:$0xff] %vm1688_vm3, %v2640_v1  ;;  %2514 = vrot.lane.b32.xlu1 %v2461_v55, %s8478_s13  ;;  %v2154_v9 = vsel %vm2139_vm5, %v2152_v3, %v2153_v57  ;;  %v2462_v11 = vsel %vm2447_vm8, %v2460_v5, %v2461_v55 }
 0x15b   : > { %1709 = vst.msk [vmem:[#allocation2 + $0xa0] sm:$0xff] %vm1688_vm3, %v1644_v0  ;;  %v1645_v7 = vmax.f32 %v1277_v48, %v1293_v2  ;;  %2204 = vrot.lane.b32.xlu0 %v2152_v3, %s8477_s29  ;;  %2116 = vst.msk [vmem:[#allocation5 + $0xd0] sm:$0xff] %vm1688_vm3, %v2039_v6 }
 0x15c   : > { %1712 = vst.msk [vmem:[#allocation2 + $0xb8] sm:$0xff] %vm1688_vm3, %v1647_v4 }
 0x15d   : > { %1710 = vst.msk [vmem:[#allocation2 + $0xa8] sm:$0xff] %vm1688_vm3, %v1645_v7  ;;  %v7839_v8 = vpop.f32.mrb[48].mxu0 }
 0x15e   : > { %v1305_v10 = vpop.f32.mrb[49].mxu0  ;;  %2206 = vrot.lane.b32.xlu1 %v2154_v9, %s8477_s29  ;;  %v1314_v19 = vadd.f32 %v7839_v8, %v8944_v26 }
 0x15f   : > { %v7840_v12 = vpop.f32.mrb[50].mxu0  ;;  %2512 = vrot.lane.b32.xlu0 %v2462_v11, %s8478_s13  ;;  %v1306_v20 = vadd.f32 %v8944_v26, %v1305_v10 }
 0x160   : > { %v1308_v13 = vpop.f32.mrb[51].mxu0  ;;  %v1317_v23 = vadd.f32 %v7840_v12, %v8944_v26 }
 0x161   : > { %v1309_v24 = vadd.f32 %v8944_v26, %v1308_v13 }
 0x163   : > { %v1775_v14 = vld [vmem:[#allocation2 + $0xb0] ss:$2 sm:$0xff]  ;;  %v1839_v15 = vld [vmem:[#allocation2 + $0xb1] ss:$2 sm:$0xff] }
 0x164   : > { %v1891_v16 = vmax.f32 %v1775_v14, %v1839_v15  ;;  %v1773_v17 = vld [vmem:[#allocation2 + $0xa0] ss:$2 sm:$0xff]  ;;  %v1837_v18 = vld [vmem:[#allocation2 + $0xa1] ss:$2 sm:$0xff] }
 0x165   : > { %v7843_v21 = vpop.f32.mrb[52].mxu0  ;;  %v1890_v22 = vmax.f32 %v1773_v17, %v1837_v18 }
 0x166   : > { %v1330_v25 = vadd.f32 %v7843_v21, %v8944_v26  ;;  %v1321_v27 = vpop.f32.mrb[53].mxu0  ;;  %v2642_v28 = vrot.slane %v1891_v16, 2  ;;  %2340 = vrot.lane.b32.xlu1 %v1891_v16, %s8476_s22  ;;  %v2464_v32 = vrot.slane %v1891_v16, 1  ;;  %v2156_v34 = vrot.slane %v1891_v16, 7 }
 0x167   : > { %v1322_v29 = vadd.f32 %v8944_v26, %v1321_v27  ;;  %v7844_v30 = vpop.f32.mrb[54].mxu0  ;;  %v2641_v31 = vrot.slane %v1890_v22, 2  ;;  %2338 = vrot.lane.b32.xlu0 %v1890_v22, %s8476_s22  ;;  %v2040_v38 = vrot.slane %v1890_v22, 6  ;;  %v2041_v39 = vrot.slane %v1891_v16, 6 }
 0x168   : > { %v1650_v35 = vmax.f32 %v1314_v19, %v1330_v25  ;;  %2718 = vst.msk [vmem:[#allocation5 + $0xf8] sm:$0x3f] %vm2707_vm4, %v2642_v28  ;;  %v1333_v36 = vadd.f32 %v7844_v30, %v8944_v26  ;;  %v1324_v37 = vpop.f32.mrb[55].mxu0  ;;  %v2155_v44 = vrot.slane %v1890_v22, 7  ;;  %v2463_v46 = vrot.slane %v1890_v22, 1 }
 0x169   : > { %v1648_v40 = vmax.f32 %v1306_v20, %v1322_v29  ;;  %v2643_v42 = vsel %vm1073_vm1, %v2641_v31, %v2642_v28  ;;  %v1325_v43 = vadd.f32 %v8944_v26, %v1324_v37  ;;  %2117 = vst.msk [vmem:[#allocation5 + $0xe0] sm:$0xfc] %vm2106_vm6, %v2040_v38  ;;  %v2042_v47 = vsel %vm2024_vm7, %v2040_v38, %v2041_v39 }
 0x16a   : > { %1715 = vst.msk [vmem:[#allocation2 + $0xd0] sm:$0xff] %vm1688_vm3, %v1650_v35  ;;  %v1651_v45 = vmax.f32 %v1317_v23, %v1333_v36  ;;  %2717 = vst.msk [vmem:[#allocation5 + $0xe8] sm:$0xff] %vm1688_vm3, %v2643_v42  ;;  %2518 = vrot.lane.b32.xlu1 %v2464_v32, %s8478_s13  ;;  %v2157_v50 = vsel %vm2139_vm5, %v2155_v44, %v2156_v34  ;;  %v2465_v52 = vsel %vm2447_vm8, %v2463_v46, %v2464_v32  ;;  %v8256_v35 = vld [vmem:[%s11197_s3] sm:$0xff]  }
 0x16b   : > { %1713 = vst.msk [vmem:[#allocation2 + $0xc0] sm:$0xff] %vm1688_vm3, %v1648_v40  ;;  %v1649_v48 = vmax.f32 %v1309_v24, %v1325_v43  ;;  %2208 = vrot.lane.b32.xlu0 %v2155_v44, %s8477_s29  ;;  %2118 = vst.msk [vmem:[#allocation5 + $0xf0] sm:$0xff] %vm1688_vm3, %v2042_v47  ;;  %3233 = vmatpush1.bf16.msra.mxu1 %v8256_v35 }
 0x16c   : > { %1716 = vst.msk [vmem:[#allocation2 + $0xd8] sm:$0xff] %vm1688_vm3, %v1651_v45  ;;  %3234 = vmatprep.subr.bf16.mxu1 %v11206_v33 }
 0x16d   : > { %1714 = vst.msk [vmem:[#allocation2 + $0xc8] sm:$0xff] %vm1688_vm3, %v1649_v48  ;;  %v7847_v49 = vpop.f32.mrb[56].mxu0 }
 0x16e   : > { %v1337_v51 = vpop.f32.mrb[57].mxu0  ;;  %2210 = vrot.lane.b32.xlu1 %v2157_v50, %s8477_s29  ;;  %v1346_v62 = vadd.f32 %v7847_v49, %v8944_v26 }
 0x16f   : > { %v7848_v53 = vpop.f32.mrb[58].mxu0  ;;  %2516 = vrot.lane.b32.xlu0 %v2465_v52, %s8478_s13  ;;  %v1338_v63 = vadd.f32 %v8944_v26, %v1337_v51 }
 0x170   : > { %v1340_v54 = vpop.f32.mrb[59].mxu0  ;;  %v1349_v2 = vadd.f32 %v7848_v53, %v8944_v26 }
 0x171   : > { %v1341_v3 = vadd.f32 %v8944_v26, %v1340_v54 }
 0x173   : > { %v1779_v55 = vld [vmem:[#allocation2 + $0xd0] ss:$2 sm:$0xff]  ;;  %v1843_v57 = vld [vmem:[#allocation2 + $0xd1] ss:$2 sm:$0xff] }
 0x174   : > { %v1893_v59 = vmax.f32 %v1779_v55, %v1843_v57  ;;  %v1777_v60 = vld [vmem:[#allocation2 + $0xc0] ss:$2 sm:$0xff]  ;;  %v1841_v61 = vld [vmem:[#allocation2 + $0xc1] ss:$2 sm:$0xff] }
 0x175   : > { %v7851_v0 = vpop.f32.mrb[60].mxu0  ;;  %v1892_v1 = vmax.f32 %v1777_v60, %v1841_v61 }
 0x176   : > { %v1362_v4 = vadd.f32 %v7851_v0, %v8944_v26  ;;  %v1353_v5 = vpop.f32.mrb[61].mxu0  ;;  %v2645_v6 = vrot.slane %v1893_v59, 2  ;;  %2344 = vrot.lane.b32.xlu1 %v1893_v59, %s8476_s22  ;;  %v2467_v10 = vrot.slane %v1893_v59, 1  ;;  %v2159_v11 = vrot.slane %v1893_v59, 7 }
 0x177   : > { %v1354_v7 = vadd.f32 %v8944_v26, %v1353_v5  ;;  %v7852_v8 = vpop.f32.mrb[62].mxu0  ;;  %v2644_v9 = vrot.slane %v1892_v1, 2  ;;  %2342 = vrot.lane.b32.xlu0 %v1892_v1, %s8476_s22  ;;  %v2043_v15 = vrot.slane %v1892_v1, 6  ;;  %v2044_v16 = vrot.slane %v1893_v59, 6 }
 0x178   : > { %v1654_v12 = vmax.f32 %v1346_v62, %v1362_v4  ;;  %2720 = vst.msk [vmem:[#allocation5 + $0x118] sm:$0x3f] %vm2707_vm4, %v2645_v6  ;;  %v1365_v13 = vadd.f32 %v7852_v8, %v8944_v26  ;;  %v1356_v14 = vpop.f32.mrb[63].mxu0  ;;  %v2158_v20 = vrot.slane %v1892_v1, 7  ;;  %v2466_v22 = vrot.slane %v1892_v1, 1 }
 0x179   : > { %v1652_v17 = vmax.f32 %v1338_v63, %v1354_v7  ;;  %v2646_v18 = vsel %vm1073_vm1, %v2644_v9, %v2645_v6  ;;  %v1357_v19 = vadd.f32 %v8944_v26, %v1356_v14  ;;  %2119 = vst.msk [vmem:[#allocation5 + $0x100] sm:$0xfc] %vm2106_vm6, %v2043_v15  ;;  %v2045_v23 = vsel %vm2024_vm7, %v2043_v15, %v2044_v16 }
 0x17a   : > { %1719 = vst.msk [vmem:[#allocation2 + $0xf0] sm:$0xff] %vm1688_vm3, %v1654_v12  ;;  %v1655_v21 = vmax.f32 %v1349_v2, %v1365_v13  ;;  %2719 = vst.msk [vmem:[#allocation5 + $0x108] sm:$0xff] %vm1688_vm3, %v2646_v18  ;;  %2522 = vrot.lane.b32.xlu1 %v2467_v10, %s8478_s13  ;;  %v2160_v27 = vsel %vm2139_vm5, %v2158_v20, %v2159_v11  ;;  %v2468_v29 = vsel %vm2447_vm8, %v2466_v22, %v2467_v10  ;;  %v8257_v18 = vld [vmem:[%s11197_s3 + $0x8] sm:$0xff]   ;;  %v9235_v22 = vld [vmem:[%s11196_s2] ss:$0 sm:$0xff] }
 0x17b   : > { %1717 = vst.msk [vmem:[#allocation2 + $0xe0] sm:$0xff] %vm1688_vm3, %v1652_v17  ;;  %v1653_v24 = vmax.f32 %v1341_v3, %v1357_v19  ;;  %2212 = vrot.lane.b32.xlu0 %v2158_v20, %s8477_s29  ;;  %2120 = vst.msk [vmem:[#allocation5 + $0x110] sm:$0xff] %vm1688_vm3, %v2045_v23  ;;  %3235 = vmatpush1.bf16.msra.mxu1 %v8257_v18 }
 0x17c   : > { %1720 = vst.msk [vmem:[#allocation2 + $0xf8] sm:$0xff] %vm1688_vm3, %v1655_v21  ;;  %3236 = vmatprep.subr.bf16.mxu1 %v11206_v33 }
 0x17d   : > { %1718 = vst.msk [vmem:[#allocation2 + $0xe8] sm:$0xff] %vm1688_vm3, %v1653_v24  ;;  %v7855_v25 = vpop.f32.mrb[64].mxu0 }
 0x17e   : > { %v1369_v28 = vpop.f32.mrb[65].mxu0  ;;  %2214 = vrot.lane.b32.xlu1 %v2160_v27, %s8477_s29  ;;  %v1378_v39 = vadd.f32 %v7855_v25, %v8944_v26 }
 0x17f   : > { %v7856_v30 = vpop.f32.mrb[66].mxu0  ;;  %2520 = vrot.lane.b32.xlu0 %v2468_v29, %s8478_s13  ;;  %v1370_v40 = vadd.f32 %v8944_v26, %v1369_v28 }
 0x180   : > { %v1372_v31 = vpop.f32.mrb[67].mxu0  ;;  %v1381_v44 = vadd.f32 %v7856_v30, %v8944_v26 }
 0x181   : > { %v1373_v45 = vadd.f32 %v8944_v26, %v1372_v31 }
 0x183   : > { %v1783_v32 = vld [vmem:[#allocation2 + $0xf0] ss:$2 sm:$0xff]  ;;  %v1847_v34 = vld [vmem:[#allocation2 + $0xf1] ss:$2 sm:$0xff] }
 0x184   : > { %v1895_v36 = vmax.f32 %v1783_v32, %v1847_v34  ;;  %v1781_v37 = vld [vmem:[#allocation2 + $0xe0] ss:$2 sm:$0xff]  ;;  %v1845_v38 = vld [vmem:[#allocation2 + $0xe1] ss:$2 sm:$0xff] }
 0x185   : > { %v7859_v42 = vpop.f32.mrb[68].mxu0  ;;  %v1894_v43 = vmax.f32 %v1781_v37, %v1845_v38 }
 0x186   : > { %v1394_v46 = vadd.f32 %v7859_v42, %v8944_v26  ;;  %v1385_v47 = vpop.f32.mrb[69].mxu0  ;;  %v2648_v48 = vrot.slane %v1895_v36, 2  ;;  %2348 = vrot.lane.b32.xlu1 %v1895_v36, %s8476_s22  ;;  %v2470_v52 = vrot.slane %v1895_v36, 1  ;;  %v2162_v53 = vrot.slane %v1895_v36, 7 }
 0x187   : > { %v1386_v49 = vadd.f32 %v8944_v26, %v1385_v47  ;;  %v7860_v50 = vpop.f32.mrb[70].mxu0  ;;  %v2647_v51 = vrot.slane %v1894_v43, 2  ;;  %2346 = vrot.lane.b32.xlu0 %v1894_v43, %s8476_s22  ;;  %v2046_v60 = vrot.slane %v1894_v43, 6  ;;  %v2047_v61 = vrot.slane %v1895_v36, 6 }
 0x188   : > { %v1658_v54 = vmax.f32 %v1378_v39, %v1394_v46  ;;  %2722 = vst.msk [vmem:[#allocation5 + $0x138] sm:$0x3f] %vm2707_vm4, %v2648_v48  ;;  %v1397_v55 = vadd.f32 %v7860_v50, %v8944_v26  ;;  %v2321_v57 = vpop.permute.xlu1 %2320  ;;  %v1388_v59 = vpop.f32.mrb[71].mxu0  ;;  %v2161_v1 = vrot.slane %v1894_v43, 7  ;;  %v2469_v3 = vrot.slane %v1894_v43, 1 }
 0x189   : > { %v1656_v62 = vmax.f32 %v1370_v40, %v1386_v49  ;;  %v2649_v63 = vsel %vm1073_vm1, %v2647_v51, %v2648_v48  ;;  %v1389_v0 = vadd.f32 %v8944_v26, %v1388_v59  ;;  %2121 = vst.msk [vmem:[#allocation5 + $0x120] sm:$0xfc] %vm2106_vm6, %v2046_v60  ;;  %v2048_v4 = vsel %vm2024_vm7, %v2046_v60, %v2047_v61  ;;  %v2752_v59 = vld [vmem:[#allocation5 + $0x68] sm:$0xff] }
 0x18a   : > { %1723 = vst.msk [vmem:[#allocation2 + $0x110] sm:$0xff] %vm1688_vm3, %v1658_v54  ;;  %v1659_v2 = vmax.f32 %v1381_v44, %v1397_v55  ;;  %2721 = vst.msk [vmem:[#allocation5 + $0x128] sm:$0xff] %vm1688_vm3, %v2649_v63  ;;  %2526 = vrot.lane.b32.xlu1 %v2470_v52, %s8478_s13  ;;  %v2163_v8 = vsel %vm2139_vm5, %v2161_v1, %v2162_v53  ;;  %v2471_v10 = vsel %vm2447_vm8, %v2469_v3, %v2470_v52 }
 0x18b   : > { %1721 = vst.msk [vmem:[#allocation2 + $0x100] sm:$0xff] %vm1688_vm3, %v1656_v62  ;;  %v1657_v5 = vmax.f32 %v1373_v45, %v1389_v0  ;;  %v2189_v6 = vpop.permute.xlu0 %2188  ;;  %2216 = vrot.lane.b32.xlu0 %v2161_v1, %s8477_s29  ;;  %2122 = vst.msk [vmem:[#allocation5 + $0x130] sm:$0xff] %vm1688_vm3, %v2048_v4  ;;  %v2754_v1 = vld [vmem:[#allocation5 + $0x78] sm:$0xff] }
 0x18c   : > { %1724 = vst.msk [vmem:[#allocation2 + $0x118] sm:$0xff] %vm1688_vm3, %v1659_v2  ;;  %v2319_v26 = vpop.permute.xlu1 %2318  ;;  %v9267_v4 = vpack.c.bf16 %v2754_v1, %v2752_v59 }
 0x18d   : > { %2285 = vst.msk [vmem:[#allocation5 + $0x40] sm:$0xfe] %vm2284_vm9, %v2189_v6  ;;  %v7863_v7 = vpop.f32.mrb[72].mxu0  ;;  %v8258_v6 = vld [vmem:[%s11197_s3 + $0x10] sm:$0xff]  }
 0x18e   : > { %1722 = vst.msk [vmem:[#allocation2 + $0x108] sm:$0xff] %vm1688_vm3, %v1657_v5  ;;  %v1401_v9 = vpop.f32.mrb[73].mxu0  ;;  %2218 = vrot.lane.b32.xlu1 %v2163_v8, %s8477_s29  ;;  %v1410_v23 = vadd.f32 %v9235_v22, %v7863_v7  ;;  %3237 = vmatpush1.bf16.msra.mxu1 %v8258_v6  ;;  %v8260_v6 = vld [vmem:[%s11197_s3 + $0x20] sm:$0xff]  }
 0x18f   : > { %2415 = vst.msk [vmem:[#allocation5 + $0x40] sm:$0xff] %vm2414_vm10, %v2319_v26  ;;  %v7864_v11 = vpop.f32.mrb[74].mxu0  ;;  %2524 = vrot.lane.b32.xlu0 %v2471_v10, %s8478_s13  ;;  %v2191_v12 = vpop.permute.xlu0 %2190  ;;  %v1402_v24 = vadd.f32 %v9235_v22, %v1401_v9  ;;  %3238 = vmatprep.subr.bf16.mxu1 %v11206_v33 }
 0x190   : > { %2287 = vst.msk [vmem:[#allocation5 + $0x50] sm:$0xff] %vm2286_vm11, %v2191_v12  ;;  %v1404_v13 = vpop.f32.mrb[75].mxu0  ;;  %v2499_v14 = vpop.permute.xlu1 %2498  ;;  %v1413_v28 = vadd.f32 %v9235_v22, %v7864_v11 }
 0x191   : > { %2416 = vst.msk [vmem:[#allocation5 + $0x50] sm:$0xff] %vm2414_vm10, %v2321_v57  ;;  %v1405_v29 = vadd.f32 %v9235_v22, %v1404_v13 }
 0x192   : > { %2595 = vst.msk [vmem:[#allocation5 + $0x50] sm:$0x7f] %vm2594_vm12, %v2499_v14 }
 0x193   : > { %v2497_v15 = vpop.permute.xlu0 %2496  ;;  %v1787_v16 = vld [vmem:[#allocation2 + $0x110] ss:$2 sm:$0xff]  ;;  %v1851_v17 = vld [vmem:[#allocation2 + $0x111] ss:$2 sm:$0xff] }
 0x194   : > { %2593 = vst.msk [vmem:[#allocation5 + $0x40] sm:$0xff] %vm2592_vm13, %v2497_v15  ;;  %v1897_v19 = vmax.f32 %v1787_v16, %v1851_v17 }
 0x195   : > { %v1785_v20 = vld [vmem:[#allocation2 + $0x100] ss:$2 sm:$0xff]  ;;  %v1849_v21 = vld [vmem:[#allocation2 + $0x101] ss:$2 sm:$0xff]  ;;  %v7867_v25 = vpop.f32.mrb[76].mxu0 }
 0x196   : > { %v1896_v27 = vmax.f32 %v1785_v20, %v1849_v21  ;;  %v1426_v30 = vadd.f32 %v9235_v22, %v7867_v25  ;;  %v1417_v31 = vpop.f32.mrb[77].mxu0  ;;  %v2651_v32 = vrot.slane %v1897_v19, 2  ;;  %2352 = vrot.lane.b32.xlu1 %v1897_v19, %s8476_s22  ;;  %v2473_v37 = vrot.slane %v1897_v19, 1 }
 0x197   : > { %v1418_v34 = vadd.f32 %v9235_v22, %v1417_v31  ;;  %v7868_v35 = vpop.f32.mrb[78].mxu0  ;;  %v2165_v38 = vrot.slane %v1897_v19, 7  ;;  %v2050_v45 = vrot.slane %v1897_v19, 6 }
 0x198   : > { %v2650_v36 = vrot.slane %v1896_v27, 2  ;;  %2350 = vrot.lane.b32.xlu0 %v1896_v27, %s8476_s22  ;;  %v1662_v39 = vmax.f32 %v1410_v23, %v1426_v30  ;;  %2724 = vst.msk [vmem:[#allocation5 + $0x158] sm:$0x3f] %vm2707_vm4, %v2651_v32  ;;  %v1429_v40 = vadd.f32 %v9235_v22, %v7868_v35  ;;  %v1420_v42 = vpop.f32.mrb[79].mxu0  ;;  %v2325_v43 = vpop.permute.xlu1 %2324  ;;  %v2049_v44 = vrot.slane %v1896_v27, 6 }
 0x199   : > { %v1660_v46 = vmax.f32 %v1402_v24, %v1418_v34  ;;  %v1421_v48 = vadd.f32 %v9235_v22, %v1420_v42  ;;  %v2323_v49 = vpop.permute.xlu0 %2322  ;;  %v2164_v50 = vrot.slane %v1896_v27, 7  ;;  %v2472_v52 = vrot.slane %v1896_v27, 1  ;;  %v2749_v57 = vld [vmem:[#allocation5 + $0x50] sm:$0xff] }
 0x19a   : > { %v2652_v47 = vsel %vm1073_vm1, %v2650_v36, %v2651_v32  ;;  %1727 = vst.msk [vmem:[#allocation2 + $0x130] sm:$0xff] %vm1688_vm3, %v1662_v39  ;;  %v1663_v51 = vmax.f32 %v1413_v28, %v1429_v40  ;;  %2530 = vrot.lane.b32.xlu1 %v2473_v37, %s8478_s13  ;;  %v2051_v53 = vsel %vm2024_vm7, %v2049_v44, %v2050_v45  ;;  %v8259_v45 = vld [vmem:[%s11197_s3 + $0x18] sm:$0xff]  }
 0x19b   : > { %2723 = vst.msk [vmem:[#allocation5 + $0x148] sm:$0xff] %vm1688_vm3, %v2652_v47  ;;  %1725 = vst.msk [vmem:[#allocation2 + $0x120] sm:$0xff] %vm1688_vm3, %v1660_v46  ;;  %v1661_v54 = vmax.f32 %v1405_v29, %v1421_v48  ;;  %v2747_v55 = vld [vmem:[#allocation5 + $0x40] sm:$0xff]  ;;  %v2166_v0 = vsel %vm2139_vm5, %v2164_v50, %v2165_v38  ;;  %v2474_v3 = vsel %vm2447_vm8, %v2472_v52, %v2473_v37  ;;  %v2758_v52 = vld [vmem:[#allocation5 + $0x98] sm:$0xff]  ;;  %3239 = vmatpush1.bf16.msra.mxu1 %v8259_v45 }
 0x19c   : > { %2123 = vst.msk [vmem:[#allocation5 + $0x140] sm:$0xfc] %vm2106_vm6, %v2049_v44  ;;  %2220 = vrot.lane.b32.xlu0 %v2164_v50, %s8477_s29  ;;  %v2503_v60 = vpop.permute.xlu1 %2502  ;;  %v9259_v61 = vpack.c.bf16 %v2749_v57, %v2747_v55  ;;  %v2756_v44 = vld [vmem:[#allocation5 + $0x88] sm:$0xff]  ;;  %3240 = vmatprep.subr.bf16.mxu1 %v11206_v33 }
 0x19d   : > { %2124 = vst.msk [vmem:[#allocation5 + $0x150] sm:$0xff] %vm1688_vm3, %v2051_v53  ;;  %1728 = vst.msk [vmem:[#allocation2 + $0x138] sm:$0xff] %vm1688_vm3, %v1663_v51  ;;  %v7871_v62 = vpop.f32.mrb[80].mxu0  ;;  %v2193_v63 = vpop.permute.xlu0 %2192 }
 0x19e   : > { %1726 = vst.msk [vmem:[#allocation2 + $0x128] sm:$0xff] %vm1688_vm3, %v1661_v54  ;;  %v1433_v2 = vpop.f32.mrb[81].mxu0  ;;  %2222 = vrot.lane.b32.xlu1 %v2166_v0, %s8477_s29  ;;  %3049 = vmatmul.mubr.bf16.gmra.mrb[4].mxu1 %v9259_v61  ;;  %v1442_v14 = vadd.f32 %v9235_v22, %v7871_v62  ;;  %v9317_v54 = vpack.c.bf16 %v2758_v52, %v2756_v44 }
 0x19f   : > { %2288 = vst.msk [vmem:[#allocation5 + $0x60] sm:$0xfe] %vm2284_vm9, %v2193_v63  ;;  %3510 = vmatmul.mubr.bf16.vlgmr.msra.gmra.mrb[128].mxu0 %v9259_v61  ;;  %v7872_v5 = vpop.f32.mrb[82].mxu0  ;;  %7042 = vmatprep.mubr.msk.bf16.mxu1 %vm1688_vm3, %v9267_v4  ;;  %v1434_v15 = vadd.f32 %v9235_v22, %v1433_v2 }
 0x1a0   : > { %2417 = vst.msk [vmem:[#allocation5 + $0x60] sm:$0xff] %vm2414_vm10, %v2323_v49  ;;  %2528 = vrot.lane.b32.xlu0 %v2474_v3, %s8478_s13  ;;  %7113 = vmatprep.mubr.msk.bf16.mxu0 %vm1688_vm3, %v9267_v4  ;;  %v1436_v26 = vpop.f32.mrb[83].mxu0  ;;  %v2195_v7 = vpop.permute.xlu1 %2194  ;;  %v1445_v18 = vadd.f32 %v9235_v22, %v7872_v5 }
 0x1a1   : > { %2289 = vst.msk [vmem:[#allocation5 + $0x70] sm:$0xff] %vm2286_vm11, %v2195_v7  ;;  %v2501_v8 = vpop.permute.xlu0 %2500  ;;  %v1437_v19 = vadd.f32 %v9235_v22, %v1436_v26  ;;  %3241 = vmatpush1.bf16.msra.mxu1 %v8260_v6 }
 0x1a2   : > { %2418 = vst.msk [vmem:[#allocation5 + $0x70] sm:$0xff] %vm2414_vm10, %v2325_v43  ;;  %3242 = vmatprep.subr.bf16.mxu1 %v11206_v33 }
 0x1a3   : > { %2596 = vst.msk [vmem:[#allocation5 + $0x60] sm:$0xff] %vm2592_vm13, %v2501_v8 }
 0x1a4   : > { %2597 = vst.msk [vmem:[#allocation5 + $0x70] sm:$0x7f] %vm2594_vm12, %v2503_v60  ;;  %v1791_v9 = vld [vmem:[#allocation2 + $0x130] ss:$2 sm:$0xff]  ;;  %v1855_v10 = vld [vmem:[#allocation2 + $0x131] ss:$2 sm:$0xff] }
 0x1a5   : > { %v9284_v11 = vmax.f32 %v1791_v9, %v1855_v10  ;;  %v1789_v12 = vld [vmem:[#allocation2 + $0x120] ss:$2 sm:$0xff]  ;;  %v1853_v13 = vld [vmem:[#allocation2 + $0x121] ss:$2 sm:$0xff]  ;;  %v7875_v16 = vpop.f32.mrb[84].mxu0 }
 0x1a6   : > { %v1898_v17 = vmax.f32 %v1789_v12, %v1853_v13  ;;  %v1458_v20 = vadd.f32 %v9235_v22, %v7875_v16  ;;  %v1449_v21 = vpop.f32.mrb[85].mxu0 }
 0x1a7   : > { %v2654_v23 = vrot.slane %v9284_v11, 2  ;;  %2356 = vrot.lane.b32.xlu1 %v9284_v11, %s8476_s22  ;;  %v1450_v24 = vadd.f32 %v9235_v22, %v1449_v21  ;;  %v7876_v25 = vpop.f32.mrb[86].mxu0  ;;  %v2476_v28 = vrot.slane %v9284_v11, 1  ;;  %v2168_v29 = vrot.slane %v9284_v11, 7 }
 0x1a8   : > { %v2653_v27 = vrot.slane %v1898_v17, 2  ;;  %2354 = vrot.lane.b32.xlu0 %v1898_v17, %s8476_s22  ;;  %v1666_v30 = vmax.f32 %v1442_v14, %v1458_v20  ;;  %v1461_v31 = vadd.f32 %v9235_v22, %v7876_v25  ;;  %v1452_v32 = vpop.f32.mrb[87].mxu0  ;;  %v2329_v34 = vpop.permute.xlu1 %2328  ;;  %v2052_v35 = vrot.slane %v1898_v17, 6 }
 0x1a9   : > { %2726 = vst.msk [vmem:[#allocation5 + $0x178] sm:$0x3f] %vm2707_vm4, %v2654_v23  ;;  %v2053_v36 = vrot.slane %v9284_v11, 6  ;;  %v1664_v37 = vmax.f32 %v1434_v15, %v1450_v24  ;;  %v1453_v39 = vadd.f32 %v9235_v22, %v1452_v32  ;;  %v2327_v40 = vpop.permute.xlu0 %2326  ;;  %v2167_v42 = vrot.slane %v1898_v17, 7 }
 0x1aa   : > { %v2655_v38 = vsel %vm1073_vm1, %v2653_v27, %v2654_v23  ;;  %v2751_v43 = vld [vmem:[#allocation5 + $0x60] sm:$0xff]  ;;  %1731 = vst.msk [vmem:[#allocation2 + $0x150] sm:$0xff] %vm1688_vm3, %v1666_v30  ;;  %v1667_v46 = vmax.f32 %v1445_v18, %v1461_v31  ;;  %v2475_v48 = vrot.slane %v1898_v17, 1 }
 0x1ab   : > { %2725 = vst.msk [vmem:[#allocation5 + $0x168] sm:$0xff] %vm1688_vm3, %v2655_v38  ;;  %2534 = vrot.lane.b32.xlu1 %v2476_v28, %s8478_s13  ;;  %v2753_v47 = vld [vmem:[#allocation5 + $0x70] sm:$0xff]  ;;  %v2054_v49 = vsel %vm2024_vm7, %v2052_v35, %v2053_v36  ;;  %1729 = vst.msk [vmem:[#allocation2 + $0x140] sm:$0xff] %vm1688_vm3, %v1664_v37  ;;  %v1665_v50 = vmax.f32 %v1437_v19, %v1453_v39  ;;  %v2169_v59 = vsel %vm2139_vm5, %v2167_v42, %v2168_v29  ;;  %v2760_v38 = vld [vmem:[#allocation5 + $0xa8] sm:$0xff] }
 0x1ac   : > { %2125 = vst.msk [vmem:[#allocation5 + $0x160] sm:$0xfc] %vm2106_vm6, %v2052_v35  ;;  %2224 = vrot.lane.b32.xlu0 %v2167_v42, %s8477_s29  ;;  %v9313_v51 = vpack.c.bf16 %v2753_v47, %v2751_v43  ;;  %v2507_v53 = vpop.permute.xlu1 %2506  ;;  %v2477_v62 = vsel %vm2447_vm8, %v2475_v48, %v2476_v28 }
 0x1ad   : > { %2126 = vst.msk [vmem:[#allocation5 + $0x170] sm:$0xff] %vm1688_vm3, %v2054_v49  ;;  %1732 = vst.msk [vmem:[#allocation2 + $0x158] sm:$0xff] %vm1688_vm3, %v1667_v46  ;;  %v7879_v55 = vpop.f32.mrb[88].mxu0  ;;  %v2197_v57 = vpop.permute.xlu0 %2196  ;;  %v2762_v46 = vld [vmem:[#allocation5 + $0xb8] sm:$0xff] }
 0x1ae   : > { %1730 = vst.msk [vmem:[#allocation2 + $0x148] sm:$0xff] %vm1688_vm3, %v1665_v50  ;;  %3057 = vmatmul.mubr.bf16.gmra.mrb[8].mxu1 %v9313_v51  ;;  %3518 = vmatmul.mubr.bf16.gmra.mrb[132].mxu0 %v9313_v51  ;;  %v1465_v60 = vpop.f32.mrb[89].mxu0  ;;  %v1474_v9 = vadd.f32 %v9235_v22, %v7879_v55  ;;  %v9371_v48 = vpack.c.bf16 %v2762_v46, %v2760_v38 }
 0x1af   : > { %2290 = vst.msk [vmem:[#allocation5 + $0x80] sm:$0xfe] %vm2284_vm9, %v2197_v57  ;;  %2226 = vrot.lane.b32.xlu1 %v2169_v59, %s8477_s29  ;;  %7043 = vmatprep.mubr.msk.bf16.mxu1 %vm1688_vm3, %v9317_v54  ;;  %v7880_v63 = vpop.f32.mrb[90].mxu0  ;;  %v1466_v10 = vadd.f32 %v9235_v22, %v1465_v60 }
 0x1b0   : > { %2419 = vst.msk [vmem:[#allocation5 + $0x80] sm:$0xff] %vm2414_vm10, %v2327_v40  ;;  %7114 = vmatprep.mubr.msk.bf16.mxu0 %vm1688_vm3, %v9317_v54  ;;  %2532 = vrot.lane.b32.xlu0 %v2477_v62, %s8478_s13  ;;  %v1468_v0 = vpop.f32.mrb[91].mxu0  ;;  %v2199_v1 = vpop.permute.xlu1 %2198  ;;  %v1477_v13 = vadd.f32 %v9235_v22, %v7880_v63 }
 0x1b1   : > { %2291 = vst.msk [vmem:[#allocation5 + $0x90] sm:$0xff] %vm2286_vm11, %v2199_v1  ;;  %v2505_v2 = vpop.permute.xlu0 %2504  ;;  %v1469_v14 = vadd.f32 %v9235_v22, %v1468_v0  ;;  %v8261_v1 = vld [vmem:[%s11197_s3 + $0x28] sm:$0xff]  }
 0x1b2   : > { %2420 = vst.msk [vmem:[#allocation5 + $0x90] sm:$0xff] %vm2414_vm10, %v2329_v34  ;;  %3243 = vmatpush1.bf16.msra.mxu1 %v8261_v1 }
 0x1b3   : > { %2598 = vst.msk [vmem:[#allocation5 + $0x80] sm:$0xff] %vm2592_vm13, %v2505_v2  ;;  %3244 = vmatprep.subr.bf16.mxu1 %v11206_v33 }
 0x1b4   : > { %2599 = vst.msk [vmem:[#allocation5 + $0x90] sm:$0x7f] %vm2594_vm12, %v2507_v53  ;;  %v1795_v3 = vld [vmem:[#allocation2 + $0x150] ss:$2 sm:$0xff]  ;;  %v1859_v5 = vld [vmem:[#allocation2 + $0x151] ss:$2 sm:$0xff] }
 0x1b5   : > { %v9340_v26 = vmax.f32 %v1795_v3, %v1859_v5  ;;  %v1793_v7 = vld [vmem:[#allocation2 + $0x140] ss:$2 sm:$0xff]  ;;  %v1857_v8 = vld [vmem:[#allocation2 + $0x141] ss:$2 sm:$0xff]  ;;  %v7883_v11 = vpop.f32.mrb[92].mxu0 }
 0x1b6   : > { %v1900_v12 = vmax.f32 %v1793_v7, %v1857_v8  ;;  %v1490_v15 = vadd.f32 %v9235_v22, %v7883_v11  ;;  %v1481_v16 = vpop.f32.mrb[93].mxu0 }
 0x1b7   : > { %v2657_v17 = vrot.slane %v9340_v26, 2  ;;  %2360 = vrot.lane.b32.xlu1 %v9340_v26, %s8476_s22  ;;  %v1482_v18 = vadd.f32 %v9235_v22, %v1481_v16  ;;  %v7884_v19 = vpop.f32.mrb[94].mxu0  ;;  %v2479_v21 = vrot.slane %v9340_v26, 1  ;;  %v2171_v23 = vrot.slane %v9340_v26, 7 }
 0x1b8   : > { %v2656_v20 = vrot.slane %v1900_v12, 2  ;;  %2358 = vrot.lane.b32.xlu0 %v1900_v12, %s8476_s22  ;;  %v1670_v24 = vmax.f32 %v1474_v9, %v1490_v15  ;;  %v1493_v25 = vadd.f32 %v9235_v22, %v7884_v19  ;;  %v1484_v27 = vpop.f32.mrb[95].mxu0  ;;  %v2333_v28 = vpop.permute.xlu1 %2332  ;;  %v2055_v29 = vrot.slane %v1900_v12, 6 }
 0x1b9   : > { %2728 = vst.msk [vmem:[#allocation5 + $0x198] sm:$0x3f] %vm2707_vm4, %v2657_v17  ;;  %v2056_v30 = vrot.slane %v9340_v26, 6  ;;  %v1668_v31 = vmax.f32 %v1466_v10, %v1482_v18  ;;  %v1485_v34 = vadd.f32 %v9235_v22, %v1484_v27  ;;  %v2331_v35 = vpop.permute.xlu0 %2330  ;;  %v2170_v36 = vrot.slane %v1900_v12, 7 }
 0x1ba   : > { %v2658_v32 = vsel %vm1073_vm1, %v2656_v20, %v2657_v17  ;;  %v2755_v37 = vld [vmem:[#allocation5 + $0x80] sm:$0xff]  ;;  %1735 = vst.msk [vmem:[#allocation2 + $0x170] sm:$0xff] %vm1688_vm3, %v1670_v24  ;;  %v1671_v39 = vmax.f32 %v1477_v13, %v1493_v25  ;;  %v2478_v42 = vrot.slane %v1900_v12, 1 }
 0x1bb   : > { %2727 = vst.msk [vmem:[#allocation5 + $0x188] sm:$0xff] %vm1688_vm3, %v2658_v32  ;;  %2538 = vrot.lane.b32.xlu1 %v2479_v21, %s8478_s13  ;;  %v2757_v40 = vld [vmem:[#allocation5 + $0x90] sm:$0xff]  ;;  %v2057_v43 = vsel %vm2024_vm7, %v2055_v29, %v2056_v30  ;;  %1733 = vst.msk [vmem:[#allocation2 + $0x160] sm:$0xff] %vm1688_vm3, %v1668_v31  ;;  %v1669_v44 = vmax.f32 %v1469_v14, %v1485_v34  ;;  %v2172_v52 = vsel %vm2139_vm5, %v2170_v36, %v2171_v23  ;;  %v2764_v34 = vld [vmem:[#allocation5 + $0xc8] sm:$0xff] }
 0x1bc   : > { %2127 = vst.msk [vmem:[#allocation5 + $0x180] sm:$0xfc] %vm2106_vm6, %v2055_v29  ;;  %2228 = vrot.lane.b32.xlu0 %v2170_v36, %s8477_s29  ;;  %v9367_v45 = vpack.c.bf16 %v2757_v40, %v2755_v37  ;;  %v2511_v47 = vpop.permute.xlu1 %2510  ;;  %v2480_v55 = vsel %vm2447_vm8, %v2478_v42, %v2479_v21  ;;  %v2766_v42 = vld [vmem:[#allocation5 + $0xd8] sm:$0xff] }
 0x1bd   : > { %2128 = vst.msk [vmem:[#allocation5 + $0x190] sm:$0xff] %vm1688_vm3, %v2057_v43  ;;  %1736 = vst.msk [vmem:[#allocation2 + $0x178] sm:$0xff] %vm1688_vm3, %v1671_v39  ;;  %v7887_v49 = vpop.f32.mrb[96].mxu0  ;;  %v2201_v50 = vpop.permute.xlu0 %2200 }
 0x1be   : > { %1734 = vst.msk [vmem:[#allocation2 + $0x168] sm:$0xff] %vm1688_vm3, %v1669_v44  ;;  %3065 = vmatmul.mubr.bf16.gmra.mrb[12].mxu1 %v9367_v45  ;;  %3526 = vmatmul.mubr.bf16.gmra.mrb[136].mxu0 %v9367_v45  ;;  %v1497_v53 = vpop.f32.mrb[97].mxu0  ;;  %v1506_v6 = vadd.f32 %v9235_v22, %v7887_v49  ;;  %v9424_v44 = vpack.c.bf16 %v2766_v42, %v2764_v34 }
 0x1bf   : > { %2292 = vst.msk [vmem:[#allocation5 + $0xa0] sm:$0xfe] %vm2284_vm9, %v2201_v50  ;;  %2230 = vrot.lane.b32.xlu1 %v2172_v52, %s8477_s29  ;;  %7044 = vmatprep.mubr.msk.bf16.mxu1 %vm1688_vm3, %v9371_v48  ;;  %v7888_v57 = vpop.f32.mrb[98].mxu0  ;;  %v1498_v26 = vadd.f32 %v9235_v22, %v1497_v53 }
 0x1c0   : > { %2421 = vst.msk [vmem:[#allocation5 + $0xa0] sm:$0xff] %vm2414_vm10, %v2331_v35  ;;  %7115 = vmatprep.mubr.msk.bf16.mxu0 %vm1688_vm3, %v9371_v48  ;;  %2536 = vrot.lane.b32.xlu0 %v2480_v55, %s8478_s13  ;;  %v1500_v59 = vpop.f32.mrb[99].mxu0  ;;  %v2203_v60 = vpop.permute.xlu1 %2202  ;;  %v1509_v9 = vadd.f32 %v9235_v22, %v7888_v57 }
 0x1c1   : > { %2293 = vst.msk [vmem:[#allocation5 + $0xb0] sm:$0xff] %vm2286_vm11, %v2203_v60  ;;  %v2509_v62 = vpop.permute.xlu0 %2508  ;;  %v1501_v10 = vadd.f32 %v9235_v22, %v1500_v59 }
 0x1c2   : > { %2422 = vst.msk [vmem:[#allocation5 + $0xb0] sm:$0xff] %vm2414_vm10, %v2333_v28 }
 0x1c3   : > { %2600 = vst.msk [vmem:[#allocation5 + $0xa0] sm:$0xff] %vm2592_vm13, %v2509_v62 }
 0x1c4   : > { %2601 = vst.msk [vmem:[#allocation5 + $0xb0] sm:$0x7f] %vm2594_vm12, %v2511_v47  ;;  %v1799_v63 = vld [vmem:[#allocation2 + $0x170] ss:$2 sm:$0xff]  ;;  %v1863_v0 = vld [vmem:[#allocation2 + $0x171] ss:$2 sm:$0xff] }
 0x1c5   : > { %v9393_v2 = vmax.f32 %v1799_v63, %v1863_v0  ;;  %v1797_v3 = vld [vmem:[#allocation2 + $0x160] ss:$2 sm:$0xff]  ;;  %v1861_v5 = vld [vmem:[#allocation2 + $0x161] ss:$2 sm:$0xff]  ;;  %v7891_v7 = vpop.f32.mrb[100].mxu0  ;;  %v8262_v63 = vld [vmem:[%s11197_s3 + $0x30] sm:$0xff]  }
 0x1c6   : > { %v1902_v8 = vmax.f32 %v1797_v3, %v1861_v5  ;;  %v1522_v11 = vadd.f32 %v9235_v22, %v7891_v7  ;;  %v1513_v12 = vpop.f32.mrb[101].mxu0  ;;  %3245 = vmatpush1.bf16.msra.mxu1 %v8262_v63 }
 0x1c7   : > { %v2660_v13 = vrot.slane %v9393_v2, 2  ;;  %2364 = vrot.lane.b32.xlu1 %v9393_v2, %s8476_s22  ;;  %v1514_v14 = vadd.f32 %v9235_v22, %v1513_v12  ;;  %v7892_v15 = vpop.f32.mrb[102].mxu0  ;;  %v2482_v17 = vrot.slane %v9393_v2, 1  ;;  %v2174_v18 = vrot.slane %v9393_v2, 7  ;;  %3246 = vmatprep.subr.bf16.mxu1 %v11206_v33 }
 0x1c8   : > { %v2659_v16 = vrot.slane %v1902_v8, 2  ;;  %2362 = vrot.lane.b32.xlu0 %v1902_v8, %s8476_s22  ;;  %v1674_v19 = vmax.f32 %v1506_v6, %v1522_v11  ;;  %v1525_v20 = vadd.f32 %v9235_v22, %v7892_v15  ;;  %v1516_v21 = vpop.f32.mrb[103].mxu0  ;;  %v2337_v23 = vpop.permute.xlu1 %2336  ;;  %v2058_v24 = vrot.slane %v1902_v8, 6 }
 0x1c9   : > { %2730 = vst.msk [vmem:[#allocation5 + $0x1b8] sm:$0x3f] %vm2707_vm4, %v2660_v13  ;;  %v2059_v25 = vrot.slane %v9393_v2, 6  ;;  %v1672_v27 = vmax.f32 %v1498_v26, %v1514_v14  ;;  %v1517_v29 = vadd.f32 %v9235_v22, %v1516_v21  ;;  %v2335_v30 = vpop.permute.xlu0 %2334  ;;  %v2173_v31 = vrot.slane %v1902_v8, 7 }
 0x1ca   : > { %v2661_v28 = vsel %vm1073_vm1, %v2659_v16, %v2660_v13  ;;  %v2759_v32 = vld [vmem:[#allocation5 + $0xa0] sm:$0xff]  ;;  %1739 = vst.msk [vmem:[#allocation2 + $0x190] sm:$0xff] %vm1688_vm3, %v1674_v19  ;;  %v1675_v35 = vmax.f32 %v1509_v9, %v1525_v20  ;;  %v2481_v37 = vrot.slane %v1902_v8, 1 }
 0x1cb   : > { %2729 = vst.msk [vmem:[#allocation5 + $0x1a8] sm:$0xff] %vm1688_vm3, %v2661_v28  ;;  %2542 = vrot.lane.b32.xlu1 %v2482_v17, %s8478_s13  ;;  %v2761_v36 = vld [vmem:[#allocation5 + $0xb0] sm:$0xff]  ;;  %v2060_v38 = vsel %vm2024_vm7, %v2058_v24, %v2059_v25  ;;  %1737 = vst.msk [vmem:[#allocation2 + $0x180] sm:$0xff] %vm1688_vm3, %v1672_v27  ;;  %v1673_v39 = vmax.f32 %v1501_v10, %v1517_v29  ;;  %v2175_v49 = vsel %vm2139_vm5, %v2173_v31, %v2174_v18 }
 0x1cc   : > { %2129 = vst.msk [vmem:[#allocation5 + $0x1a0] sm:$0xfc] %vm2106_vm6, %v2058_v24  ;;  %2232 = vrot.lane.b32.xlu0 %v2173_v31, %s8477_s29  ;;  %v9420_v40 = vpack.c.bf16 %v2761_v36, %v2759_v32  ;;  %v2515_v43 = vpop.permute.xlu1 %2514  ;;  %v2483_v52 = vsel %vm2447_vm8, %v2481_v37, %v2482_v17  ;;  %v2768_v31 = vld [vmem:[#allocation5 + $0xe8] sm:$0xff] }
 0x1cd   : > { %2130 = vst.msk [vmem:[#allocation5 + $0x1b0] sm:$0xff] %vm1688_vm3, %v2060_v38  ;;  %1740 = vst.msk [vmem:[#allocation2 + $0x198] sm:$0xff] %vm1688_vm3, %v1675_v35  ;;  %v7895_v46 = vpop.f32.mrb[104].mxu0  ;;  %v2205_v47 = vpop.permute.xlu0 %2204 }
 0x1ce   : > { %1738 = vst.msk [vmem:[#allocation2 + $0x188] sm:$0xff] %vm1688_vm3, %v1673_v39  ;;  %3073 = vmatmul.mubr.bf16.gmra.mrb[16].mxu1 %v9420_v40  ;;  %3534 = vmatmul.mubr.bf16.gmra.mrb[140].mxu0 %v9420_v40  ;;  %v1529_v50 = vpop.f32.mrb[105].mxu0  ;;  %v1538_v3 = vadd.f32 %v9235_v22, %v7895_v46  ;;  %v2770_v39 = vld [vmem:[#allocation5 + $0xf8] sm:$0xff] }
 0x1cf   : > { %2294 = vst.msk [vmem:[#allocation5 + $0xc0] sm:$0xfe] %vm2284_vm9, %v2205_v47  ;;  %2234 = vrot.lane.b32.xlu1 %v2175_v49, %s8477_s29  ;;  %7045 = vmatprep.mubr.msk.bf16.mxu1 %vm1688_vm3, %v9424_v44  ;;  %v7896_v53 = vpop.f32.mrb[106].mxu0  ;;  %v1530_v5 = vadd.f32 %v9235_v22, %v1529_v50 }
 0x1d0   : > { %2423 = vst.msk [vmem:[#allocation5 + $0xc0] sm:$0xff] %vm2414_vm10, %v2335_v30  ;;  %7116 = vmatprep.mubr.msk.bf16.mxu0 %vm1688_vm3, %v9424_v44  ;;  %2540 = vrot.lane.b32.xlu0 %v2483_v52, %s8478_s13  ;;  %v1532_v55 = vpop.f32.mrb[107].mxu0  ;;  %v2207_v57 = vpop.permute.xlu1 %2206  ;;  %v1541_v7 = vadd.f32 %v9235_v22, %v7896_v53 }
 0x1d1   : > { %2295 = vst.msk [vmem:[#allocation5 + $0xd0] sm:$0xff] %vm2286_vm11, %v2207_v57  ;;  %v2513_v59 = vpop.permute.xlu0 %2512  ;;  %v1533_v8 = vadd.f32 %v9235_v22, %v1532_v55  ;;  %v8263_v55 = vld [vmem:[%s11197_s3 + $0x38] sm:$0xff]  }
 0x1d2   : > { %2424 = vst.msk [vmem:[#allocation5 + $0xd0] sm:$0xff] %vm2414_vm10, %v2337_v23  ;;  %3247 = vmatpush1.bf16.msra.mxu1 %v8263_v55  ;;  %v8265_v55 = vld [vmem:[%s11197_s3 + $0x140] sm:$0xff]  }
 0x1d3   : > { %2602 = vst.msk [vmem:[#allocation5 + $0xc0] sm:$0xff] %vm2592_vm13, %v2513_v59  ;;  %3248 = vmatprep.subr.bf16.mxu1 %v11206_v33  ;;  %4032 = vmatpush1.bf16.msra.mxu0 %v8265_v55 }
 0x1d4   : > { %2603 = vst.msk [vmem:[#allocation5 + $0xd0] sm:$0x7f] %vm2594_vm12, %v2515_v43  ;;  %v1803_v60 = vld [vmem:[#allocation2 + $0x190] ss:$2 sm:$0xff]  ;;  %v1867_v62 = vld [vmem:[#allocation2 + $0x191] ss:$2 sm:$0xff]  ;;  %v9477_v43 = vpack.c.bf16 %v2770_v39, %v2768_v31  ;;  %4033 = vmatprep.subr.bf16.mxu0 %v11206_v33 }
 0x1d5   : > { %v9446_v0 = vmax.f32 %v1803_v60, %v1867_v62  ;;  %v1801_v1 = vld [vmem:[#allocation2 + $0x180] ss:$2 sm:$0xff]  ;;  %v1865_v2 = vld [vmem:[#allocation2 + $0x181] ss:$2 sm:$0xff]  ;;  %v7899_v6 = vpop.f32.mrb[108].mxu0 }
 0x1d6   : > { %v1904_v26 = vmax.f32 %v1801_v1, %v1865_v2  ;;  %v1554_v9 = vadd.f32 %v9235_v22, %v7899_v6  ;;  %v1545_v10 = vpop.f32.mrb[109].mxu0  ;;  %v2772_v31 = vld [vmem:[#allocation5 + $0x108] sm:$0xff] }
 0x1d7   : > { %v2663_v11 = vrot.slane %v9446_v0, 2  ;;  %2368 = vrot.lane.b32.xlu1 %v9446_v0, %s8476_s22  ;;  %v1546_v12 = vadd.f32 %v9235_v22, %v1545_v10  ;;  %v7900_v13 = vpop.f32.mrb[110].mxu0  ;;  %v2485_v15 = vrot.slane %v9446_v0, 1  ;;  %v2177_v16 = vrot.slane %v9446_v0, 7 }
 0x1d8   : > { %v2662_v14 = vrot.slane %v1904_v26, 2  ;;  %2366 = vrot.lane.b32.xlu0 %v1904_v26, %s8476_s22  ;;  %v1678_v17 = vmax.f32 %v1538_v3, %v1554_v9  ;;  %v1557_v18 = vadd.f32 %v9235_v22, %v7900_v13  ;;  %v1548_v19 = vpop.f32.mrb[111].mxu0  ;;  %v2341_v20 = vpop.permute.xlu1 %2340  ;;  %v2061_v21 = vrot.slane %v1904_v26, 6 }
 0x1d9   : > { %2732 = vst.msk [vmem:[#allocation5 + $0x1d8] sm:$0x3f] %vm2707_vm4, %v2663_v11  ;;  %v2062_v23 = vrot.slane %v9446_v0, 6  ;;  %v1676_v24 = vmax.f32 %v1530_v5, %v1546_v12  ;;  %v1549_v27 = vadd.f32 %v9235_v22, %v1548_v19  ;;  %v2339_v28 = vpop.permute.xlu0 %2338  ;;  %v2176_v29 = vrot.slane %v1904_v26, 7 }
 0x1da   : > { %v2664_v25 = vsel %vm1073_vm1, %v2662_v14, %v2663_v11  ;;  %v2763_v30 = vld [vmem:[#allocation5 + $0xc0] sm:$0xff]  ;;  %1743 = vst.msk [vmem:[#allocation2 + $0x1b0] sm:$0xff] %vm1688_vm3, %v1678_v17  ;;  %v1679_v32 = vmax.f32 %v1541_v7, %v1557_v18  ;;  %v2484_v35 = vrot.slane %v1904_v26, 1 }
 0x1db   : > { %2731 = vst.msk [vmem:[#allocation5 + $0x1c8] sm:$0xff] %vm1688_vm3, %v2664_v25  ;;  %2546 = vrot.lane.b32.xlu1 %v2485_v15, %s8478_s13  ;;  %v2765_v34 = vld [vmem:[#allocation5 + $0xd0] sm:$0xff]  ;;  %v2063_v36 = vsel %vm2024_vm7, %v2061_v21, %v2062_v23  ;;  %1741 = vst.msk [vmem:[#allocation2 + $0x1a0] sm:$0xff] %vm1688_vm3, %v1676_v24  ;;  %v1677_v37 = vmax.f32 %v1533_v8, %v1549_v27  ;;  %v2178_v49 = vsel %vm2139_vm5, %v2176_v29, %v2177_v16 }
 0x1dc   : > { %2131 = vst.msk [vmem:[#allocation5 + $0x1c0] sm:$0xfc] %vm2106_vm6, %v2061_v21  ;;  %2236 = vrot.lane.b32.xlu0 %v2176_v29, %s8477_s29  ;;  %v9473_v38 = vpack.c.bf16 %v2765_v34, %v2763_v30  ;;  %v2519_v42 = vpop.permute.xlu1 %2518  ;;  %v2486_v52 = vsel %vm2447_vm8, %v2484_v35, %v2485_v15 }
 0x1dd   : > { %2132 = vst.msk [vmem:[#allocation5 + $0x1d0] sm:$0xff] %vm1688_vm3, %v2063_v36  ;;  %1744 = vst.msk [vmem:[#allocation2 + $0x1b8] sm:$0xff] %vm1688_vm3, %v1679_v32  ;;  %v7903_v46 = vpop.f32.mrb[112].mxu0  ;;  %v2209_v47 = vpop.permute.xlu0 %2208  ;;  %v8264_v32 = vld [vmem:[%s11197_s3 + $0x40] sm:$0xff]  }
 0x1de   : > { %1742 = vst.msk [vmem:[#allocation2 + $0x1a8] sm:$0xff] %vm1688_vm3, %v1677_v37  ;;  %3081 = vmatmul.mubr.bf16.gmra.mrb[20].mxu1 %v9473_v38  ;;  %3542 = vmatmul.mubr.bf16.gmra.mrb[144].mxu0 %v9473_v38  ;;  %v1561_v50 = vpop.f32.mrb[113].mxu0  ;;  %v1570_v3 = vadd.f32 %v9235_v22, %v7903_v46  ;;  %v2774_v46 = vld [vmem:[#allocation5 + $0x118] sm:$0xff] }
 0x1df   : > { %2296 = vst.msk [vmem:[#allocation5 + $0xe0] sm:$0xfe] %vm2284_vm9, %v2209_v47  ;;  %2238 = vrot.lane.b32.xlu1 %v2178_v49, %s8477_s29  ;;  %7046 = vmatprep.mubr.msk.bf16.mxu1 %vm1688_vm3, %v9477_v43  ;;  %v7904_v53 = vpop.f32.mrb[114].mxu0  ;;  %v1562_v5 = vadd.f32 %v9235_v22, %v1561_v50  ;;  %v9533_v49 = vpack.c.bf16 %v2774_v46, %v2772_v31 }
 0x1e0   : > { %2425 = vst.msk [vmem:[#allocation5 + $0xe0] sm:$0xff] %vm2414_vm10, %v2339_v28  ;;  %7117 = vmatprep.mubr.msk.bf16.mxu0 %vm1688_vm3, %v9477_v43  ;;  %2544 = vrot.lane.b32.xlu0 %v2486_v52, %s8478_s13  ;;  %v1564_v57 = vpop.f32.mrb[115].mxu0  ;;  %v2211_v59 = vpop.permute.xlu1 %2210  ;;  %v1573_v7 = vadd.f32 %v9235_v22, %v7904_v53 }
 0x1e1   : > { %2297 = vst.msk [vmem:[#allocation5 + $0xf0] sm:$0xff] %vm2286_vm11, %v2211_v59  ;;  %v2517_v60 = vpop.permute.xlu0 %2516  ;;  %v1565_v8 = vadd.f32 %v9235_v22, %v1564_v57  ;;  %3249 = vmatpush1.bf16.msra.mxu1 %v8264_v32 }
 0x1e2   : > { %2426 = vst.msk [vmem:[#allocation5 + $0xf0] sm:$0xff] %vm2414_vm10, %v2341_v20  ;;  %3250 = vmatprep.subr.bf16.mxu1 %v11206_v33 }
 0x1e3   : > { %2604 = vst.msk [vmem:[#allocation5 + $0xe0] sm:$0xff] %vm2592_vm13, %v2517_v60  ;;  %v9548_v60 = vpop.f32.mrb[0].mxu1 }
 0x1e4   : > { %2605 = vst.msk [vmem:[#allocation5 + $0xf0] sm:$0x7f] %vm2594_vm12, %v2519_v42  ;;  %v1807_v62 = vld [vmem:[#allocation2 + $0x1b0] ss:$2 sm:$0xff]  ;;  %v1871_v63 = vld [vmem:[#allocation2 + $0x1b1] ss:$2 sm:$0xff] }
 0x1e5   : > { %v9500_v0 = vmax.f32 %v1807_v62, %v1871_v63  ;;  %v1805_v1 = vld [vmem:[#allocation2 + $0x1a0] ss:$2 sm:$0xff]  ;;  %v1869_v2 = vld [vmem:[#allocation2 + $0x1a1] ss:$2 sm:$0xff]  ;;  %v7907_v6 = vpop.f32.mrb[116].mxu0  ;;  %v3044_v63 = vpop.f32.mrb[1].mxu1 }
 0x1e6   : > { %v1906_v26 = vmax.f32 %v1805_v1, %v1869_v2  ;;  %v1586_v9 = vadd.f32 %v9235_v22, %v7907_v6  ;;  %v1577_v10 = vpop.f32.mrb[117].mxu0 }
 0x1e7   : > { %v2666_v11 = vrot.slane %v9500_v0, 2  ;;  %2372 = vrot.lane.b32.xlu1 %v9500_v0, %s8476_s22  ;;  %v1578_v12 = vadd.f32 %v9235_v22, %v1577_v10  ;;  %v7908_v13 = vpop.f32.mrb[118].mxu0  ;;  %v2488_v15 = vrot.slane %v9500_v0, 1  ;;  %v2180_v16 = vrot.slane %v9500_v0, 7 }
 0x1e8   : > { %v2665_v14 = vrot.slane %v1906_v26, 2  ;;  %2370 = vrot.lane.b32.xlu0 %v1906_v26, %s8476_s22  ;;  %v1682_v17 = vmax.f32 %v1570_v3, %v1586_v9  ;;  %v1589_v18 = vadd.f32 %v9235_v22, %v7908_v13  ;;  %v1580_v19 = vpop.f32.mrb[119].mxu0  ;;  %v2345_v20 = vpop.permute.xlu1 %2344  ;;  %v2064_v21 = vrot.slane %v1906_v26, 6 }
 0x1e9   : > { %2734 = vst.msk [vmem:[#allocation5 + $0x1f8] sm:$0x3f] %vm2707_vm4, %v2666_v11  ;;  %v2065_v23 = vrot.slane %v9500_v0, 6  ;;  %v1680_v24 = vmax.f32 %v1562_v5, %v1578_v12  ;;  %v1581_v27 = vadd.f32 %v9235_v22, %v1580_v19  ;;  %v2343_v28 = vpop.permute.xlu0 %2342  ;;  %v2179_v29 = vrot.slane %v1906_v26, 7  ;;  %v9555_v3 = vpop.f32.mrb[2].mxu1  ;;  %v8266_v5 = vld [vmem:[%s11197_s3 + $0x148] sm:$0xff]  }
 0x1ea   : > { %v2667_v25 = vsel %vm1073_vm1, %v2665_v14, %v2666_v11  ;;  %v2767_v30 = vld [vmem:[#allocation5 + $0xe0] sm:$0xff]  ;;  %1747 = vst.msk [vmem:[#allocation2 + $0x1d0] sm:$0xff] %vm1688_vm3, %v1682_v17  ;;  %v1683_v34 = vmax.f32 %v1573_v7, %v1589_v18  ;;  %v2487_v36 = vrot.slane %v1906_v26, 1  ;;  %v3047_v6 = vpop.f32.mrb[3].mxu1  ;;  %4034 = vmatpush1.bf16.msra.mxu0 %v8266_v5 }
 0x1eb   : > { %2733 = vst.msk [vmem:[#allocation5 + $0x1e8] sm:$0xff] %vm1688_vm3, %v2667_v25  ;;  %2550 = vrot.lane.b32.xlu1 %v2488_v15, %s8478_s13  ;;  %v2769_v35 = vld [vmem:[#allocation5 + $0xf0] sm:$0xff]  ;;  %v2066_v37 = vsel %vm2024_vm7, %v2064_v21, %v2065_v23  ;;  %1745 = vst.msk [vmem:[#allocation2 + $0x1c0] sm:$0xff] %vm1688_vm3, %v1680_v24  ;;  %v1681_v39 = vmax.f32 %v1565_v8, %v1581_v27  ;;  %v2181_v52 = vsel %vm2139_vm5, %v2179_v29, %v2180_v16  ;;  %v8268_v16 = vld [vmem:[%s11197_s3 + $0x48] sm:$0xff]  }
 0x1ec   : > { %2133 = vst.msk [vmem:[#allocation5 + $0x1e0] sm:$0xfc] %vm2106_vm6, %v2064_v21  ;;  %2240 = vrot.lane.b32.xlu0 %v2179_v29, %s8477_s29  ;;  %v9529_v42 = vpack.c.bf16 %v2769_v35, %v2767_v30  ;;  %v2523_v47 = vpop.permute.xlu1 %2522  ;;  %v2489_v57 = vsel %vm2447_vm8, %v2487_v36, %v2488_v15  ;;  %4035 = vmatprep.subr.bf16.mxu0 %v11206_v33  ;;  %v8267_v15 = vld [vmem:[%s11197_s3 + $0x150] sm:$0xff]  }
 0x1ed   : > { %2134 = vst.msk [vmem:[#allocation5 + $0x1f0] sm:$0xff] %vm1688_vm3, %v2066_v37  ;;  %1748 = vst.msk [vmem:[#allocation2 + $0x1d8] sm:$0xff] %vm1688_vm3, %v1683_v34  ;;  %v2213_v50 = vpop.permute.xlu0 %2212  ;;  %v7911_v53 = vpop.f32.mrb[120].mxu0  ;;  %3251 = vmatpush1.bf16.msra.mxu1 %v8268_v16 }
 0x1ee   : > { %1746 = vst.msk [vmem:[#allocation2 + $0x1c8] sm:$0xff] %vm1688_vm3, %v1681_v39  ;;  %3089 = vmatmul.mubr.bf16.gmra.mrb[24].mxu1 %v9529_v42  ;;  %3550 = vmatmul.mubr.bf16.gmra.mrb[148].mxu0 %v9529_v42  ;;  %v1593_v59 = vpop.f32.mrb[121].mxu0  ;;  %v1602_v8 = vadd.f32 %v9235_v22, %v7911_v53  ;;  %v8269_v53 = vld [vmem:[%s11197_s3 + $0x158] sm:$0xff]  }
 0x1ef   : > { %2298 = vst.msk [vmem:[#allocation5 + $0x100] sm:$0xfe] %vm2284_vm9, %v2213_v50  ;;  %2242 = vrot.lane.b32.xlu1 %v2181_v52, %s8477_s29  ;;  %7047 = vmatprep.mubr.msk.bf16.mxu1 %vm1688_vm3, %v9533_v49  ;;  %v7912_v62 = vpop.f32.mrb[122].mxu0  ;;  %v1594_v12 = vadd.f32 %v9235_v22, %v1593_v59  ;;  %v2776_v52 = vld [vmem:[#allocation5 + $0x128] sm:$0xff] }
 0x1f0   : > { %2427 = vst.msk [vmem:[#allocation5 + $0x100] sm:$0xff] %vm2414_vm10, %v2343_v28  ;;  %7118 = vmatprep.mubr.msk.bf16.mxu0 %vm1688_vm3, %v9533_v49  ;;  %2548 = vrot.lane.b32.xlu0 %v2489_v57, %s8478_s13  ;;  %v2215_v0 = vpop.permute.xlu1 %2214  ;;  %v1596_v1 = vpop.f32.mrb[123].mxu0  ;;  %v1605_v17 = vadd.f32 %v9235_v22, %v7912_v62 }
 0x1f1   : > { %2299 = vst.msk [vmem:[#allocation5 + $0x110] sm:$0xff] %vm2286_vm11, %v2215_v0  ;;  %v2521_v2 = vpop.permute.xlu0 %2520  ;;  %v1597_v23 = vadd.f32 %v9235_v22, %v1596_v1  ;;  %4036 = vmatpush1.bf16.msra.mxu0 %v8267_v15  ;;  %3754 = vmatprep.subr.bf16.mxu1 %v11206_v33  ;;  %v2778_v1 = vld [vmem:[#allocation5 + $0x138] sm:$0xff] }
 0x1f2   : > { %2428 = vst.msk [vmem:[#allocation5 + $0x110] sm:$0xff] %vm2414_vm10, %v2345_v20  ;;  %4037 = vmatprep.subr.bf16.mxu0 %v11206_v33  ;;  %v9614_v5 = vpack.c.bf16 %v2778_v1, %v2776_v52  ;;  %v8274_v52 = vld [vmem:[%s11197_s3 + $0x178] sm:$0xff]  }
 0x1f3   : > { %2606 = vst.msk [vmem:[#allocation5 + $0x100] sm:$0xff] %vm2592_vm13, %v2521_v2 }
 0x1f4   : > { %2607 = vst.msk [vmem:[#allocation5 + $0x110] sm:$0x7f] %vm2594_vm12, %v2523_v47  ;;  %v1811_v26 = vld [vmem:[#allocation2 + $0x1d0] ss:$2 sm:$0xff]  ;;  %v1875_v7 = vld [vmem:[#allocation2 + $0x1d1] ss:$2 sm:$0xff] }
 0x1f5   : > { %v9565_v9 = vmax.f32 %v1811_v26, %v1875_v7  ;;  %v1809_v10 = vld [vmem:[#allocation2 + $0x1c0] ss:$2 sm:$0xff]  ;;  %v1873_v11 = vld [vmem:[#allocation2 + $0x1c1] ss:$2 sm:$0xff]  ;;  %v7915_v13 = vpop.f32.mrb[124].mxu0  ;;  %4038 = vmatpush1.bf16.msra.mxu0 %v8269_v53 }
 0x1f6   : > { %v9568_v14 = vmax.f32 %v1809_v10, %v1873_v11  ;;  %v1618_v18 = vadd.f32 %v9235_v22, %v7915_v13  ;;  %v1609_v19 = vpop.f32.mrb[125].mxu0  ;;  %v8270_v26 = vld [vmem:[%s11197_s3 + $0x160] sm:$0xff]   ;;  %4039 = vmatprep.subr.bf16.mxu0 %v11206_v33  ;;  %v8271_v10 = vld [vmem:[%s11197_s3 + $0x168] sm:$0xff]  }
 0x1f7   : > { %v2669_v20 = vrot.slane %v9565_v9, 2  ;;  %2376 = vrot.lane.b32.xlu1 %v9565_v9, %s8476_s22  ;;  %v2183_v21 = vrot.slane %v9565_v9, 7  ;;  %v1610_v24 = vadd.f32 %v9235_v22, %v1609_v19  ;;  %v7916_v25 = vpop.f32.mrb[126].mxu0  ;;  %v2068_v35 = vrot.slane %v9565_v9, 6 }
 0x1f8   : > { %v2668_v27 = vrot.slane %v9568_v14, 2  ;;  %2374 = vrot.lane.b32.xlu0 %v9568_v14, %s8476_s22  ;;  %v2182_v28 = vrot.slane %v9568_v14, 7  ;;  %v1686_v29 = vmax.f32 %v1602_v8, %v1618_v18  ;;  %v1621_v30 = vadd.f32 %v9235_v22, %v7916_v25  ;;  %v1612_v31 = vpop.f32.mrb[127].mxu0  ;;  %v2349_v32 = vpop.permute.xlu1 %2348 }
 0x1f9   : > { %2736 = vst.msk [vmem:[#allocation5 + $0x218] sm:$0x3f] %vm2707_vm4, %v2669_v20  ;;  %v2067_v34 = vrot.slane %v9568_v14, 6  ;;  %v1684_v36 = vmax.f32 %v1594_v12, %v1610_v24  ;;  %v1613_v39 = vadd.f32 %v9235_v22, %v1612_v31  ;;  %v2347_v46 = vpop.permute.xlu0 %2346  ;;  %v2491_v22 = vrot.slane %v9565_v9, 1  ;;  %4040 = vmatpush1.bf16.msra.mxu0 %v8270_v26 }
 0x1fa   : > { %v2670_v37 = vsel %vm1073_vm1, %v2668_v27, %v2669_v20  ;;  %v2184_v47 = vsel %vm2139_vm5, %v2182_v28, %v2183_v21  ;;  %v2771_v50 = vld [vmem:[#allocation5 + $0x100] sm:$0xff]  ;;  %1751 = vst.msk [vmem:[#allocation2 + $0x1f0] sm:$0xff] %vm1688_vm3, %v1686_v29  ;;  %v1687_v55 = vmax.f32 %v1605_v17, %v1621_v30  ;;  %v2490_v59 = vrot.slane %v9568_v14, 1  ;;  %4041 = vmatprep.subr.bf16.mxu0 %v11206_v33  ;;  %v8273_v17 = vld [vmem:[%s11197_s3 + $0x170] sm:$0xff]  }
 0x1fb   : > { %2735 = vst.msk [vmem:[#allocation5 + $0x208] sm:$0xff] %vm1688_vm3, %v2670_v37  ;;  %2246 = vrot.lane.b32.xlu1 %v2184_v47, %s8477_s29  ;;  %v2773_v57 = vld [vmem:[#allocation5 + $0x110] sm:$0xff]  ;;  %v2069_v62 = vsel %vm2024_vm7, %v2067_v34, %v2068_v35  ;;  %1749 = vst.msk [vmem:[#allocation2 + $0x1e0] sm:$0xff] %vm1688_vm3, %v1684_v36  ;;  %v1685_v63 = vmax.f32 %v1597_v23, %v1613_v39  ;;  %v2782_v39 = vld [vmem:[#allocation5 + $0x158] sm:$0xff] }
 0x1fc   : > { %2135 = vst.msk [vmem:[#allocation5 + $0x200] sm:$0xfc] %vm2106_vm6, %v2067_v34  ;;  %2244 = vrot.lane.b32.xlu0 %v2182_v28, %s8477_s29  ;;  %v9610_v0 = vpack.c.bf16 %v2773_v57, %v2771_v50  ;;  %v2527_v2 = vpop.permute.xlu1 %2526  ;;  %v2492_v7 = vsel %vm2447_vm8, %v2490_v59, %v2491_v22  ;;  %v2780_v34 = vld [vmem:[#allocation5 + $0x148] sm:$0xff]  ;;  %v8275_v57 = vld [vmem:[%s11197_s3 + $0x180] sm:$0xff]  }
 0x1fd   : > { %2136 = vst.msk [vmem:[#allocation5 + $0x210] sm:$0xff] %vm1688_vm3, %v2069_v62  ;;  %1752 = vst.msk [vmem:[#allocation2 + $0x1f8] sm:$0xff] %vm1688_vm3, %v1687_v55  ;;  %v2217_v6 = vpop.permute.xlu0 %2216  ;;  %4042 = vmatpush1.bf16.msra.mxu0 %v8271_v10  ;;  %v9658_v47 = vpack.c.bf16 %v2782_v39, %v2780_v34  ;;  %v8277_v59 = vld [vmem:[%s11197_s3 + $0x188] sm:$0xff]   ;;  %v2794_v34 = vld [vmem:[#allocation5 + $0x1b8] sm:$0xff] }
 0x1fe   : > { %1750 = vst.msk [vmem:[#allocation2 + $0x1e8] sm:$0xff] %vm1688_vm3, %v1685_v63  ;;  %3097 = vmatmul.mubr.bf16.gmra.mrb[28].mxu1 %v9610_v0  ;;  %3558 = vmatmul.mubr.bf16.gmra.mrb[152].mxu0 %v9610_v0 }
 0x1ff   : > { %2300 = vst.msk [vmem:[#allocation5 + $0x120] sm:$0xfe] %vm2284_vm9, %v2217_v6  ;;  %2554 = vrot.lane.b32.xlu1 %v2491_v22, %s8478_s13  ;;  %7048 = vmatprep.mubr.msk.bf16.mxu1 %vm1688_vm3, %v9614_v5 }
 0x200   : > { %2429 = vst.msk [vmem:[#allocation5 + $0x120] sm:$0xff] %vm2414_vm10, %v2347_v46  ;;  %7119 = vmatprep.mubr.msk.bf16.mxu0 %vm1688_vm3, %v9614_v5  ;;  %2552 = vrot.lane.b32.xlu0 %v2492_v7, %s8478_s13  ;;  %v2219_v8 = vpop.permute.xlu1 %2218  ;;  %v2786_v7 = vld [vmem:[#allocation5 + $0x178] sm:$0xff] }
 0x201   : > { %2301 = vst.msk [vmem:[#allocation5 + $0x130] sm:$0xff] %vm2286_vm11, %v2219_v8  ;;  %v2525_v9 = vpop.permute.xlu0 %2524  ;;  %4043 = vmatprep.subr.bf16.mxu0 %v11206_v33 }
 0x202   : > { %2430 = vst.msk [vmem:[#allocation5 + $0x130] sm:$0xff] %vm2414_vm10, %v2349_v32  ;;  %4044 = vmatpush1.bf16.msra.mxu0 %v8273_v17 }
 0x203   : > { %2608 = vst.msk [vmem:[#allocation5 + $0x120] sm:$0xff] %vm2592_vm13, %v2525_v9  ;;  %4045 = vmatprep.subr.bf16.mxu0 %v11206_v33 }
 0x204   : > { %2609 = vst.msk [vmem:[#allocation5 + $0x130] sm:$0x7f] %vm2594_vm12, %v2527_v2  ;;  %v1815_v11 = vld [vmem:[#allocation2 + $0x1f0] ss:$2 sm:$0xff]  ;;  %v1879_v12 = vld [vmem:[#allocation2 + $0x1f1] ss:$2 sm:$0xff] }
 0x205   : > { %v1911_v13 = vmax.f32 %v1815_v11, %v1879_v12  ;;  %v1813_v14 = vld [vmem:[#allocation2 + $0x1e0] ss:$2 sm:$0xff]  ;;  %v1877_v15 = vld [vmem:[#allocation2 + $0x1e1] ss:$2 sm:$0xff] }
 0x206   : > { %v1910_v16 = vmax.f32 %v1813_v14, %v1877_v15  ;;  %4046 = vmatpush1.bf16.msra.mxu0 %v8274_v52  ;;  %v2784_v2 = vld [vmem:[#allocation5 + $0x168] sm:$0xff] }
 0x207   : > { %v2672_v18 = vrot.slane %v1911_v13, 2  ;;  %2380 = vrot.lane.b32.xlu1 %v1911_v13, %s8476_s22  ;;  %v2186_v19 = vrot.slane %v1911_v13, 7  ;;  %v2071_v20 = vrot.slane %v1911_v13, 6  ;;  %v2494_v27 = vrot.slane %v1911_v13, 1  ;;  %4047 = vmatprep.subr.bf16.mxu0 %v11206_v33 }
 0x208   : > { %v2671_v21 = vrot.slane %v1910_v16, 2  ;;  %2378 = vrot.lane.b32.xlu0 %v1910_v16, %s8476_s22  ;;  %v2185_v23 = vrot.slane %v1910_v16, 7  ;;  %v2070_v24 = vrot.slane %v1910_v16, 6  ;;  %v2353_v25 = vpop.permute.xlu1 %2352  ;;  %v2493_v28 = vrot.slane %v1910_v16, 1  ;;  %v2788_v16 = vld [vmem:[#allocation5 + $0x188] sm:$0xff] }
 0x209   : > { %2738 = vst.msk [vmem:[#allocation5 + $0x238] sm:$0x3f] %vm2707_vm4, %v2672_v18  ;;  %v9689_v9 = vpack.c.bf16 %v2786_v7, %v2784_v2 }
 0x20a   : > { %v2673_v29 = vsel %vm1073_vm1, %v2671_v21, %v2672_v18  ;;  %v2351_v30 = vpop.permute.xlu0 %2350  ;;  %v2187_v31 = vsel %vm2139_vm5, %v2185_v23, %v2186_v19  ;;  %v2775_v32 = vld [vmem:[#allocation5 + $0x120] sm:$0xff]  ;;  %v2072_v35 = vsel %vm2024_vm7, %v2070_v24, %v2071_v20  ;;  %2137 = vst.msk [vmem:[#allocation5 + $0x220] sm:$0xfc] %vm2106_vm6, %v2070_v24  ;;  %v2495_v50 = vsel %vm2447_vm8, %v2493_v28, %v2494_v27  ;;  %v2790_v19 = vld [vmem:[#allocation5 + $0x198] sm:$0xff] }
 0x20b   : > { %2737 = vst.msk [vmem:[#allocation5 + $0x228] sm:$0xff] %vm1688_vm3, %v2673_v29  ;;  %2250 = vrot.lane.b32.xlu1 %v2187_v31, %s8477_s29  ;;  %v2777_v36 = vld [vmem:[#allocation5 + $0x130] sm:$0xff]  ;;  %2138 = vst.msk [vmem:[#allocation5 + $0x230] sm:$0xff] %vm1688_vm3, %v2072_v35  ;;  %4048 = vmatpush1.bf16.msra.mxu0 %v8275_v57  ;;  %v9705_v21 = vpack.c.bf16 %v2790_v19, %v2788_v16  ;;  %v2796_v57 = vld [vmem:[#allocation5 + $0x1c8] sm:$0xff] }
 0x20c   : > { %2248 = vrot.lane.b32.xlu0 %v2185_v23, %s8477_s29  ;;  %v9656_v37 = vpack.c.bf16 %v2777_v36, %v2775_v32  ;;  %v2531_v46 = vpop.permute.xlu1 %2530  ;;  %4049 = vmatprep.subr.bf16.mxu0 %v11206_v33 }
 0x20e   : > { %v2221_v53 = vpop.permute.xlu0 %2220  ;;  %3105 = vmatmul.mubr.bf16.gmra.mrb[32].mxu1 %v9656_v37  ;;  %3566 = vmatmul.mubr.bf16.gmra.mrb[156].mxu0 %v9656_v37 }
 0x20f   : > { %2302 = vst.msk [vmem:[#allocation5 + $0x140] sm:$0xfe] %vm2284_vm9, %v2221_v53  ;;  %7049 = vmatprep.mubr.msk.bf16.mxu1 %vm1688_vm3, %v9658_v47  ;;  %7120 = vmatprep.mubr.msk.bf16.mxu0 %vm1688_vm3, %v9658_v47 }
 0x210   : > { %2431 = vst.msk [vmem:[#allocation5 + $0x140] sm:$0xff] %vm2414_vm10, %v2351_v30  ;;  %2558 = vrot.lane.b32.xlu1 %v2494_v27, %s8478_s13  ;;  %2556 = vrot.lane.b32.xlu0 %v2495_v50, %s8478_s13  ;;  %v2223_v55 = vpop.permute.xlu1 %2222  ;;  %v2792_v30 = vld [vmem:[#allocation5 + $0x1a8] sm:$0xff] }
 0x211   : > { %2303 = vst.msk [vmem:[#allocation5 + $0x150] sm:$0xff] %vm2286_vm11, %v2223_v55  ;;  %4050 = vmatpush1.bf16.msra.mxu0 %v8277_v59  ;;  %v9721_v36 = vpack.c.bf16 %v2794_v34, %v2792_v30 }
 0x212   : > { %v2529_v22 = vpop.permute.xlu0 %2528  ;;  %2432 = vst.msk [vmem:[#allocation5 + $0x150] sm:$0xff] %vm2414_vm10, %v2353_v25  ;;  %5205 = vmatprep.subr.bf16.mxu0 %v11206_v33 }
 0x213   : > { %2610 = vst.msk [vmem:[#allocation5 + $0x140] sm:$0xff] %vm2592_vm13, %v2529_v22 }
 0x214   : > { %2611 = vst.msk [vmem:[#allocation5 + $0x150] sm:$0x7f] %vm2594_vm12, %v2531_v46 }
 0x219   : > { %v2357_v62 = vpop.permute.xlu1 %2356 }
 0x21a   : > { %v2355_v63 = vpop.permute.xlu0 %2354  ;;  %v2779_v1 = vld [vmem:[#allocation5 + $0x140] sm:$0xff] }
 0x21b   : > { %v2781_v6 = vld [vmem:[#allocation5 + $0x150] sm:$0xff] }
 0x21c   : > { %v9687_v26 = vpack.c.bf16 %v2781_v6, %v2779_v1 }
 0x21d   : > { %v2535_v8 = vpop.permute.xlu1 %2534 }
 0x21e   : > { %v2225_v10 = vpop.permute.xlu0 %2224  ;;  %3113 = vmatmul.mubr.bf16.gmra.mrb[36].mxu1 %v9687_v26  ;;  %3574 = vmatmul.mubr.bf16.gmra.mrb[160].mxu0 %v9687_v26 }
 0x21f   : > { %2304 = vst.msk [vmem:[#allocation5 + $0x160] sm:$0xfe] %vm2284_vm9, %v2225_v10  ;;  %7050 = vmatprep.mubr.msk.bf16.mxu1 %vm1688_vm3, %v9689_v9  ;;  %7121 = vmatprep.mubr.msk.bf16.mxu0 %vm1688_vm3, %v9689_v9 }
 0x220   : > { %2433 = vst.msk [vmem:[#allocation5 + $0x160] sm:$0xff] %vm2414_vm10, %v2355_v63 }
 0x221   : > { %v2227_v11 = vpop.permute.xlu1 %2226 }
 0x222   : > { %2305 = vst.msk [vmem:[#allocation5 + $0x170] sm:$0xff] %vm2286_vm11, %v2227_v11  ;;  %v2533_v12 = vpop.permute.xlu0 %2532 }
 0x223   : > { %2434 = vst.msk [vmem:[#allocation5 + $0x170] sm:$0xff] %vm2414_vm10, %v2357_v62  ;;  %v2798_v62 = vld [vmem:[#allocation5 + $0x1d8] sm:$0xff] }
 0x224   : > { %2612 = vst.msk [vmem:[#allocation5 + $0x160] sm:$0xff] %vm2592_vm13, %v2533_v12  ;;  %v9737_v1 = vpack.c.bf16 %v2798_v62, %v2796_v57  ;;  %v2800_v12 = vld [vmem:[#allocation5 + $0x1e8] sm:$0xff] }
 0x225   : > { %2613 = vst.msk [vmem:[#allocation5 + $0x170] sm:$0x7f] %vm2594_vm12, %v2535_v8 }
 0x229   : > { %v2361_v13 = vpop.permute.xlu1 %2360 }
 0x22a   : > { %v2359_v14 = vpop.permute.xlu0 %2358 }
 0x22b   : > { %v2783_v15 = vld [vmem:[#allocation5 + $0x160] sm:$0xff] }
 0x22c   : > { %v2785_v17 = vld [vmem:[#allocation5 + $0x170] sm:$0xff] }
 0x22d   : > { %v9703_v18 = vpack.c.bf16 %v2785_v17, %v2783_v15  ;;  %v2539_v20 = vpop.permute.xlu1 %2538  ;;  %v2802_v15 = vld [vmem:[#allocation5 + $0x1f8] sm:$0xff] }
 0x22e   : > { %v2229_v23 = vpop.permute.xlu0 %2228  ;;  %v9753_v17 = vpack.c.bf16 %v2802_v15, %v2800_v12  ;;  %v2810_v12 = vld [vmem:[#allocation5 + $0x238] sm:$0xff] }
 0x22f   : > { %3121 = vmatmul.mubr.bf16.gmra.mrb[40].mxu1 %v9703_v18  ;;  %3582 = vmatmul.mubr.bf16.gmra.mrb[164].mxu0 %v9703_v18  ;;  %2306 = vst.msk [vmem:[#allocation5 + $0x180] sm:$0xfe] %vm2284_vm9, %v2229_v23 }
 0x230   : > { %7051 = vmatprep.mubr.msk.bf16.mxu1 %vm1688_vm3, %v9705_v21  ;;  %7122 = vmatprep.mubr.msk.bf16.mxu0 %vm1688_vm3, %v9705_v21  ;;  %2435 = vst.msk [vmem:[#allocation5 + $0x180] sm:$0xff] %vm2414_vm10, %v2359_v14 }
 0x231   : > { %v2231_v24 = vpop.permute.xlu1 %2230 }
 0x232   : > { %2307 = vst.msk [vmem:[#allocation5 + $0x190] sm:$0xff] %vm2286_vm11, %v2231_v24  ;;  %v2537_v25 = vpop.permute.xlu0 %2536 }
 0x233   : > { %2436 = vst.msk [vmem:[#allocation5 + $0x190] sm:$0xff] %vm2414_vm10, %v2361_v13 }
 0x234   : > { %2614 = vst.msk [vmem:[#allocation5 + $0x180] sm:$0xff] %vm2592_vm13, %v2537_v25 }
 0x235   : > { %2615 = vst.msk [vmem:[#allocation5 + $0x190] sm:$0x7f] %vm2594_vm12, %v2539_v20 }
 0x239   : > { %v2365_v27 = vpop.permute.xlu1 %2364 }
 0x23a   : > { %v2363_v28 = vpop.permute.xlu0 %2362 }
 0x23b   : > { %v2787_v29 = vld [vmem:[#allocation5 + $0x180] sm:$0xff] }
 0x23c   : > { %v2789_v31 = vld [vmem:[#allocation5 + $0x190] sm:$0xff] }
 0x23d   : > { %v9719_v32 = vpack.c.bf16 %v2789_v31, %v2787_v29  ;;  %v2543_v35 = vpop.permute.xlu1 %2542  ;;  %v2806_v31 = vld [vmem:[#allocation5 + $0x218] sm:$0xff] }
 0x23e   : > { %v2233_v39 = vpop.permute.xlu0 %2232 }
 0x23f   : > { %3129 = vmatmul.mubr.bf16.gmra.mrb[44].mxu1 %v9719_v32  ;;  %3590 = vmatmul.mubr.bf16.gmra.mrb[168].mxu0 %v9719_v32  ;;  %2308 = vst.msk [vmem:[#allocation5 + $0x1a0] sm:$0xfe] %vm2284_vm9, %v2233_v39 }
 0x240   : > { %7052 = vmatprep.mubr.msk.bf16.mxu1 %vm1688_vm3, %v9721_v36  ;;  %7123 = vmatprep.mubr.msk.bf16.mxu0 %vm1688_vm3, %v9721_v36  ;;  %2437 = vst.msk [vmem:[#allocation5 + $0x1a0] sm:$0xff] %vm2414_vm10, %v2363_v28  ;;  %v2804_v28 = vld [vmem:[#allocation5 + $0x208] sm:$0xff] }
 0x241   : > { %v2235_v46 = vpop.permute.xlu1 %2234 }
 0x242   : > { %2309 = vst.msk [vmem:[#allocation5 + $0x1b0] sm:$0xff] %vm2286_vm11, %v2235_v46  ;;  %v2541_v50 = vpop.permute.xlu0 %2540 }
 0x243   : > { %2438 = vst.msk [vmem:[#allocation5 + $0x1b0] sm:$0xff] %vm2414_vm10, %v2365_v27 }
 0x244   : > { %2616 = vst.msk [vmem:[#allocation5 + $0x1a0] sm:$0xff] %vm2592_vm13, %v2541_v50 }
 0x245   : > { %2617 = vst.msk [vmem:[#allocation5 + $0x1b0] sm:$0x7f] %vm2594_vm12, %v2543_v35  ;;  %v9769_v35 = vpack.c.bf16 %v2806_v31, %v2804_v28  ;;  %v8405_v28 = vld [vmem:[#allocation5] sm:$0xff] }
 0x249   : > { %v2369_v52 = vpop.permute.xlu1 %2368 }
 0x24a   : > { %v2367_v53 = vpop.permute.xlu0 %2366 }
 0x24b   : > { %v2791_v55 = vld [vmem:[#allocation5 + $0x1a0] sm:$0xff] }
 0x24c   : > { %v2793_v22 = vld [vmem:[#allocation5 + $0x1b0] sm:$0xff] }
 0x24d   : > { %v9735_v59 = vpack.c.bf16 %v2793_v22, %v2791_v55  ;;  %v2547_v63 = vpop.permute.xlu1 %2546 }
 0x24e   : > { %v2237_v2 = vpop.permute.xlu0 %2236 }
 0x24f   : > { %3137 = vmatmul.mubr.bf16.gmra.mrb[48].mxu1 %v9735_v59  ;;  %3598 = vmatmul.mubr.bf16.gmra.mrb[172].mxu0 %v9735_v59  ;;  %2310 = vst.msk [vmem:[#allocation5 + $0x1c0] sm:$0xfe] %vm2284_vm9, %v2237_v2 }
 0x250   : > { %7053 = vmatprep.mubr.msk.bf16.mxu1 %vm1688_vm3, %v9737_v1  ;;  %7124 = vmatprep.mubr.msk.bf16.mxu0 %vm1688_vm3, %v9737_v1  ;;  %2439 = vst.msk [vmem:[#allocation5 + $0x1c0] sm:$0xff] %vm2414_vm10, %v2367_v53 }
 0x251   : > { %v2239_v6 = vpop.permute.xlu1 %2238 }
 0x252   : > { %2311 = vst.msk [vmem:[#allocation5 + $0x1d0] sm:$0xff] %vm2286_vm11, %v2239_v6  ;;  %v2545_v7 = vpop.permute.xlu0 %2544  ;;  %v2740_v6 = vld [vmem:[#allocation5 + $0x8] sm:$0xff] }
 0x253   : > { %2440 = vst.msk [vmem:[#allocation5 + $0x1d0] sm:$0xff] %vm2414_vm10, %v2369_v52 }
 0x254   : > { %2618 = vst.msk [vmem:[#allocation5 + $0x1c0] sm:$0xff] %vm2592_vm13, %v2545_v7  ;;  %v2742_v7 = vld [vmem:[#allocation5 + $0x18] sm:$0xff] }
 0x255   : > { %2619 = vst.msk [vmem:[#allocation5 + $0x1d0] sm:$0x7f] %vm2594_vm12, %v2547_v63 }
 0x259   : > { %v2373_v8 = vpop.permute.xlu1 %2372 }
 0x25a   : > { %v2371_v10 = vpop.permute.xlu0 %2370 }
 0x25b   : > { %v2795_v11 = vld [vmem:[#allocation5 + $0x1c0] sm:$0xff] }
 0x25c   : > { %v2797_v13 = vld [vmem:[#allocation5 + $0x1d0] sm:$0xff] }
 0x25d   : > { %v9751_v14 = vpack.c.bf16 %v2797_v13, %v2795_v11  ;;  %v2551_v16 = vpop.permute.xlu1 %2550  ;;  %v2808_v11 = vld [vmem:[#allocation5 + $0x228] sm:$0xff] }
 0x25e   : > { %v2241_v19 = vpop.permute.xlu0 %2240 }
 0x25f   : > { %3145 = vmatmul.mubr.bf16.gmra.mrb[52].mxu1 %v9751_v14  ;;  %3606 = vmatmul.mubr.bf16.gmra.mrb[176].mxu0 %v9751_v14  ;;  %2312 = vst.msk [vmem:[#allocation5 + $0x1e0] sm:$0xfe] %vm2284_vm9, %v2241_v19 }
 0x260   : > { %7054 = vmatprep.mubr.msk.bf16.mxu1 %vm1688_vm3, %v9753_v17  ;;  %7125 = vmatprep.mubr.msk.bf16.mxu0 %vm1688_vm3, %v9753_v17  ;;  %2441 = vst.msk [vmem:[#allocation5 + $0x1e0] sm:$0xff] %vm2414_vm10, %v2371_v10 }
 0x261   : > { %v2243_v20 = vpop.permute.xlu1 %2242 }
 0x262   : > { %2313 = vst.msk [vmem:[#allocation5 + $0x1f0] sm:$0xff] %vm2286_vm11, %v2243_v20  ;;  %v2549_v23 = vpop.permute.xlu0 %2548  ;;  %v9793_v20 = vpack.c.bf16 %v2810_v12, %v2808_v11  ;;  %v8278_v11 = vld [vmem:[%s11197_s3 + $0x100] sm:$0xff]  }
 0x263   : > { %2442 = vst.msk [vmem:[#allocation5 + $0x1f0] sm:$0xff] %vm2414_vm10, %v2373_v8 }
 0x264   : > { %2620 = vst.msk [vmem:[#allocation5 + $0x1e0] sm:$0xff] %vm2592_vm13, %v2549_v23 }
 0x265   : > { %2621 = vst.msk [vmem:[#allocation5 + $0x1f0] sm:$0x7f] %vm2594_vm12, %v2551_v16  ;;  %v2820_v16 = vpack.c.bf16 %v2742_v7, %v2740_v6  ;;  %v8276_v6 = vld [vmem:[%s11197_s3 + $0xf8] sm:$0xff]  }
 0x269   : > { %v2377_v24 = vpop.permute.xlu1 %2376 }
 0x26a   : > { %v2375_v25 = vpop.permute.xlu0 %2374 }
 0x26b   : > { %v2799_v27 = vld [vmem:[#allocation5 + $0x1e0] sm:$0xff] }
 0x26c   : > { %v2801_v29 = vld [vmem:[#allocation5 + $0x1f0] sm:$0xff] }
 0x26d   : > { %v9767_v30 = vpack.c.bf16 %v2801_v29, %v2799_v27  ;;  %v2247_v34 = vpop.permute.xlu1 %2246  ;;  %v9808_v29 = vpack.c.bf16 %v8405_v28, %v8405_v28 }
 0x26e   : > { %2315 = vst.msk [vmem:[#allocation5 + $0x210] sm:$0xff] %vm2286_vm11, %v2247_v34  ;;  %v2245_v39 = vpop.permute.xlu0 %2244 }
 0x26f   : > { %3153 = vmatmul.mubr.bf16.gmra.mrb[56].mxu1 %v9767_v30  ;;  %3614 = vmatmul.mubr.bf16.gmra.mrb[180].mxu0 %v9767_v30  ;;  %2444 = vst.msk [vmem:[#allocation5 + $0x210] sm:$0xff] %vm2414_vm10, %v2377_v24 }
 0x270   : > { %2314 = vst.msk [vmem:[#allocation5 + $0x200] sm:$0xfe] %vm2284_vm9, %v2245_v39  ;;  %7055 = vmatprep.mubr.msk.bf16.mxu1 %vm1688_vm3, %v9769_v35  ;;  %7126 = vmatprep.mubr.msk.bf16.mxu0 %vm1688_vm3, %v9769_v35  ;;  %v8272_v39 = vld [vmem:[%s11197_s3 + $0xf0] sm:$0xff]  }
 0x271   : > { %2443 = vst.msk [vmem:[#allocation5 + $0x200] sm:$0xff] %vm2414_vm10, %v2375_v25  ;;  %v2555_v46 = vpop.permute.xlu1 %2554  ;;  %v9782_v52 = vpop.f32.mrb[4].mxu1 }
 0x272   : > { %2623 = vst.msk [vmem:[#allocation5 + $0x210] sm:$0x7f] %vm2594_vm12, %v2555_v46  ;;  %v2553_v50 = vpop.permute.xlu0 %2552  ;;  %v9785_v53 = vpop.f32.mrb[128].mxu0 }
 0x273   : > { %2622 = vst.msk [vmem:[#allocation5 + $0x200] sm:$0xff] %vm2592_vm13, %v2553_v50  ;;  %v3052_v55 = vpop.f32.mrb[5].mxu1  ;;  %v3513_v57 = vpop.f32.mrb[129].mxu0 }
 0x274   : > { %v9787_v22 = vpop.f32.mrb[6].mxu1  ;;  %v9789_v62 = vpop.f32.mrb[130].mxu0 }
 0x275   : > { %v3055_v63 = vpop.f32.mrb[7].mxu1  ;;  %v3516_v2 = vpop.f32.mrb[131].mxu0 }
 0x279   : > { %v2381_v8 = vpop.permute.xlu1 %2380  ;;  %v2805_v10 = vld [vmem:[#allocation5 + $0x210] sm:$0xff] }
 0x27a   : > { %v2379_v13 = vpop.permute.xlu0 %2378  ;;  %v2803_v15 = vld [vmem:[#allocation5 + $0x200] sm:$0xff] }
 0x27b   : > { %v9791_v19 = vpack.c.bf16 %v2805_v10, %v2803_v15 }
 0x27d   : > { %3161 = vmatmul.mubr.bf16.gmra.mrb[60].mxu1 %v9791_v19  ;;  %3622 = vmatmul.mubr.bf16.gmra.mrb[184].mxu0 %v9791_v19  ;;  %v2251_v23 = vpop.permute.xlu1 %2250 }
 0x27e   : > { %2317 = vst.msk [vmem:[#allocation5 + $0x230] sm:$0xff] %vm2286_vm11, %v2251_v23  ;;  %v2249_v24 = vpop.permute.xlu0 %2248  ;;  %7127 = vmatprep.mubr.msk.bf16.mxu0 %vm1688_vm3, %v9793_v20  ;;  %7066 = vmatprep.mubr.msk.bf16.mxu1 %vm1688_vm3, %v2820_v16 }
 0x27f   : > { %2446 = vst.msk [vmem:[#allocation5 + $0x230] sm:$0xff] %vm2414_vm10, %v2381_v8 }
 0x280   : > { %2316 = vst.msk [vmem:[#allocation5 + $0x220] sm:$0xfe] %vm2284_vm9, %v2249_v24 }
 0x281   : > { %2445 = vst.msk [vmem:[#allocation5 + $0x220] sm:$0xff] %vm2414_vm10, %v2379_v13  ;;  %v9804_v25 = vpop.f32.mrb[8].mxu1  ;;  %v9806_v27 = vpop.f32.mrb[132].mxu0 }
 0x282   : > { %v2559_v31 = vpop.permute.xlu1 %2558  ;;  %v2557_v34 = vpop.permute.xlu0 %2556 }
 0x283   : > { %2625 = vst.msk [vmem:[#allocation5 + $0x230] sm:$0x7f] %vm2594_vm12, %v2559_v31  ;;  %v3060_v46 = vpop.f32.mrb[9].mxu1  ;;  %v3521_v50 = vpop.f32.mrb[133].mxu0  ;;  %v8281_v31 = vld [vmem:[%s11197_s3 + $0x118] sm:$0xff]  }
 0x284   : > { %2624 = vst.msk [vmem:[#allocation5 + $0x220] sm:$0xff] %vm2592_vm13, %v2557_v34  ;;  %v9815_v55 = vpop.f32.mrb[10].mxu1  ;;  %v9817_v57 = vpop.f32.mrb[134].mxu0  ;;  %v8283_v34 = vld [vmem:[%s11197_s3 + $0x128] sm:$0xff]  }
 0x285   : > { %v3063_v63 = vpop.f32.mrb[11].mxu1  ;;  %v3524_v2 = vpop.f32.mrb[135].mxu0  ;;  %3265 = vmatmul.mubr.bf16.vlgmr.msra.gmra.mrb[64].mxu1 %v9808_v29 }
 0x286   : > { %3755 = vmatpush1.bf16.msra.mxu1 %v8272_v39  ;;  %7067 = vmatprep.mubr.msk.bf16.mxu1 %vm1688_vm3, %v8871_v56  ;;  %v8279_v56 = vld [vmem:[%s11197_s3 + $0x108] sm:$0xff]  }
 0x287   : > { %3756 = vmatprep.subr.bf16.mxu1 %v11206_v33 }
 0x28a   : > { %v2809_v8 = vld [vmem:[#allocation5 + $0x230] sm:$0xff]  ;;  %3757 = vmatpush1.bf16.msra.mxu1 %v8276_v6 }
 0x28b   : > { %v2807_v7 = vld [vmem:[#allocation5 + $0x220] sm:$0xff]  ;;  %3758 = vmatprep.subr.bf16.mxu1 %v11206_v33 }
 0x28c   : > { %v9826_v10 = vpack.c.bf16 %v2809_v8, %v2807_v7  ;;  %v8284_v7 = vld [vmem:[%s11197_s3 + $0x130] sm:$0xff]  }
 0x28d   : > { %3273 = vmatmul.mubr.bf16.gmra.mrb[68].mxu1 %v8475_v58 }
 0x28e   : > { %3630 = vmatmul.mubr.bf16.gmra.mrb[188].mxu0 %v9826_v10  ;;  %7068 = vmatprep.mubr.msk.bf16.mxu1 %vm1688_vm3, %v9031_v41  ;;  %v8280_v41 = vld [vmem:[%s11197_s3 + $0x110] sm:$0xff]  }
 0x28f   : > { %7204 = vmatprep.mubr.msk.bf16.mxu0 %vm1688_vm3, %v9317_v54  ;;  %3759 = vmatpush1.bf16.msra.mxu1 %v8278_v11 }
 0x290   : > { %3760 = vmatprep.subr.bf16.mxu1 %v11206_v33 }
 0x291   : > { %v9842_v12 = vpop.f32.mrb[12].mxu1  ;;  %v9844_v13 = vpop.f32.mrb[136].mxu0 }
 0x292   : > { %v3068_v58 = vpop.f32.mrb[13].mxu1  ;;  %v3529_v15 = vpop.f32.mrb[137].mxu0 }
 0x293   : > { %v9846_v16 = vpop.f32.mrb[14].mxu1  ;;  %v9848_v23 = vpop.f32.mrb[138].mxu0  ;;  %3761 = vmatpush1.bf16.msra.mxu1 %v8279_v56  ;;  %v8285_v56 = vld [vmem:[%s11197_s3 + $0x138] sm:$0xff]  }
 0x294   : > { %v3071_v24 = vpop.f32.mrb[15].mxu1  ;;  %v3532_v28 = vpop.f32.mrb[139].mxu0  ;;  %3762 = vmatprep.subr.bf16.mxu1 %v11206_v33 }
 0x295   : > { %3281 = vmatmul.mubr.bf16.gmra.mrb[72].mxu1 %v9259_v61  ;;  %v8282_v61 = vld [vmem:[%s11197_s3 + $0x120] sm:$0xff]  }
 0x296   : > { %4064 = vmatmul.mubr.bf16.vlgmr.msra.gmra.mrb[192].mxu0 %v9367_v45  ;;  %7069 = vmatprep.mubr.msk.bf16.mxu1 %vm1688_vm3, %v9267_v4 }
 0x297   : > { %7205 = vmatprep.mubr.msk.bf16.mxu0 %vm1688_vm3, %v9371_v48  ;;  %3763 = vmatpush1.bf16.msra.mxu1 %v8280_v41 }
 0x298   : > { %3764 = vmatprep.subr.bf16.mxu1 %v11206_v33 }
 0x29b   : > { %3765 = vmatpush1.bf16.msra.mxu1 %v8281_v31 }
 0x29c   : > { %3766 = vmatprep.subr.bf16.mxu1 %v11206_v33 }
 0x29d   : > { %3289 = vmatmul.mubr.bf16.gmra.mrb[76].mxu1 %v9313_v51 }
 0x29e   : > { %4072 = vmatmul.mubr.bf16.gmra.mrb[196].mxu0 %v9420_v40  ;;  %7070 = vmatprep.mubr.msk.bf16.mxu1 %vm1688_vm3, %v9317_v54 }
 0x29f   : > { %7206 = vmatprep.mubr.msk.bf16.mxu0 %vm1688_vm3, %v9424_v44  ;;  %3767 = vmatpush1.bf16.msra.mxu1 %v8282_v61 }
 0x2a0   : > { %3768 = vmatprep.subr.bf16.mxu1 %v11206_v33 }
 0x2a1   : > { %v9878_v39 = vpop.f32.mrb[16].mxu1  ;;  %v9880_v46 = vpop.f32.mrb[140].mxu0 }
 0x2a2   : > { %v3076_v50 = vpop.f32.mrb[17].mxu1  ;;  %v3537_v63 = vpop.f32.mrb[141].mxu0 }
 0x2a3   : > { %v9882_v2 = vpop.f32.mrb[18].mxu1  ;;  %v9884_v6 = vpop.f32.mrb[142].mxu0  ;;  %3769 = vmatpush1.bf16.msra.mxu1 %v8283_v34 }
 0x2a4   : > { %v3079_v8 = vpop.f32.mrb[19].mxu1  ;;  %v3540_v11 = vpop.f32.mrb[143].mxu0  ;;  %3770 = vmatprep.subr.bf16.mxu1 %v11206_v33 }
 0x2a5   : > { %3297 = vmatmul.mubr.bf16.gmra.mrb[80].mxu1 %v9367_v45 }
 0x2a6   : > { %4080 = vmatmul.mubr.bf16.gmra.mrb[200].mxu0 %v9473_v38  ;;  %7071 = vmatprep.mubr.msk.bf16.mxu1 %vm1688_vm3, %v9371_v48 }
 0x2a7   : > { %7207 = vmatprep.mubr.msk.bf16.mxu0 %vm1688_vm3, %v9477_v43  ;;  %3771 = vmatpush1.bf16.msra.mxu1 %v8284_v7 }
 0x2a8   : > { %3772 = vmatprep.subr.bf16.mxu1 %v11206_v33 }
 0x2ab   : > { %3773 = vmatpush1.bf16.msra.mxu1 %v8285_v56 }
 0x2ac   : > { %4736 = vmatprep.subr.bf16.mxu1 %v11206_v33 }
 0x2ad   : > { %3305 = vmatmul.mubr.bf16.gmra.mrb[84].mxu1 %v9420_v40 }
 0x2ae   : > { %4088 = vmatmul.mubr.bf16.gmra.mrb[204].mxu0 %v9529_v42  ;;  %7072 = vmatprep.mubr.msk.bf16.mxu1 %vm1688_vm3, %v9424_v44 }
 0x2af   : > { %7208 = vmatprep.mubr.msk.bf16.mxu0 %vm1688_vm3, %v9533_v49 }
 0x2b1   : > { %v9907_v58 = vpop.f32.mrb[20].mxu1  ;;  %v9909_v15 = vpop.f32.mrb[144].mxu0 }
 0x2b2   : > { %v3084_v41 = vpop.f32.mrb[21].mxu1  ;;  %v3545_v24 = vpop.f32.mrb[145].mxu0 }
 0x2b3   : > { %v9911_v28 = vpop.f32.mrb[22].mxu1  ;;  %v9913_v31 = vpop.f32.mrb[146].mxu0 }
 0x2b4   : > { %11210 = vst [vmem:[#allocation10_spill] sm:$0xff] %v9911_v28  ;;  %v3087_v61 = vpop.f32.mrb[23].mxu1  ;;  %v3548_v34 = vpop.f32.mrb[147].mxu0 }
 0x2b5   : > { %3313 = vmatmul.mubr.bf16.gmra.mrb[88].mxu1 %v9473_v38 }
 0x2b6   : > { %4096 = vmatmul.mubr.bf16.gmra.mrb[208].mxu0 %v9610_v0  ;;  %7073 = vmatprep.mubr.msk.bf16.mxu1 %vm1688_vm3, %v9477_v43 }
 0x2b7   : > { %7209 = vmatprep.mubr.msk.bf16.mxu0 %vm1688_vm3, %v9614_v5 }
 0x2bd   : > { %3321 = vmatmul.mubr.bf16.gmra.mrb[92].mxu1 %v9529_v42 }
 0x2be   : > { %4104 = vmatmul.mubr.bf16.gmra.mrb[212].mxu0 %v9656_v37  ;;  %7074 = vmatprep.mubr.msk.bf16.mxu1 %vm1688_vm3, %v9533_v49 }
 0x2bf   : > { %7210 = vmatprep.mubr.msk.bf16.mxu0 %vm1688_vm3, %v9658_v47 }
 0x2c1   : > { %v9927_v50 = vpop.f32.mrb[24].mxu1  ;;  %v9929_v63 = vpop.f32.mrb[148].mxu0 }
 0x2c2   : > { %11211 = vst [vmem:[#allocation11_spill] sm:$0xff] %v9927_v50  ;;  %11212 = vst [vmem:[#allocation12_spill] sm:$0xff] %v9929_v63  ;;  %v3092_v7 = vpop.f32.mrb[25].mxu1  ;;  %v3553_v8 = vpop.f32.mrb[149].mxu0 }
 0x2c3   : > { %v9931_v11 = vpop.f32.mrb[26].mxu1  ;;  %v9933_v56 = vpop.f32.mrb[150].mxu0 }
 0x2c4   : > { %11213 = vst [vmem:[#allocation13_spill] sm:$0xff] %v9931_v11  ;;  %11214 = vst [vmem:[#allocation14_spill] sm:$0xff] %v9933_v56  ;;  %v3095_v41 = vpop.f32.mrb[27].mxu1  ;;  %v3556_v24 = vpop.f32.mrb[151].mxu0 }
 0x2c5   : > { %3329 = vmatmul.mubr.bf16.gmra.mrb[96].mxu1 %v9610_v0 }
 0x2c6   : > { %4112 = vmatmul.mubr.bf16.gmra.mrb[216].mxu0 %v9687_v26  ;;  %7075 = vmatprep.mubr.msk.bf16.mxu1 %vm1688_vm3, %v9614_v5 }
 0x2c7   : > { %7211 = vmatprep.mubr.msk.bf16.mxu0 %vm1688_vm3, %v9689_v9 }
 0x2cd   : > { %3337 = vmatmul.mubr.bf16.gmra.mrb[100].mxu1 %v9656_v37 }
 0x2ce   : > { %4120 = vmatmul.mubr.bf16.gmra.mrb[220].mxu0 %v9703_v18  ;;  %7076 = vmatprep.mubr.msk.bf16.mxu1 %vm1688_vm3, %v9658_v47 }
 0x2cf   : > { %7212 = vmatprep.mubr.msk.bf16.mxu0 %vm1688_vm3, %v9705_v21 }
 0x2d1   : > { %v9947_v61 = vpop.f32.mrb[28].mxu1  ;;  %v9949_v34 = vpop.f32.mrb[152].mxu0 }
 0x2d2   : > { %11215 = vst [vmem:[#allocation15_spill] sm:$0xff] %v9947_v61  ;;  %11216 = vst [vmem:[#allocation16_spill] sm:$0xff] %v9949_v34  ;;  %v3100_v7 = vpop.f32.mrb[29].mxu1  ;;  %v3561_v8 = vpop.f32.mrb[153].mxu0 }
 0x2d3   : > { %v9951_v41 = vpop.f32.mrb[30].mxu1  ;;  %v9953_v24 = vpop.f32.mrb[154].mxu0 }
 0x2d4   : > { %11217 = vst [vmem:[#allocation17_spill] sm:$0xff] %v9951_v41  ;;  %11218 = vst [vmem:[#allocation18_spill] sm:$0xff] %v9953_v24  ;;  %v3103_v33 = vpop.f32.mrb[31].mxu1  ;;  %v3564_v11 = vpop.f32.mrb[155].mxu0 }
 0x2d5   : > { %3345 = vmatmul.mubr.bf16.gmra.mrb[104].mxu1 %v9687_v26 }
 0x2d6   : > { %4128 = vmatmul.mubr.bf16.gmra.mrb[224].mxu0 %v9719_v32  ;;  %7077 = vmatprep.mubr.msk.bf16.mxu1 %vm1688_vm3, %v9689_v9 }
 0x2d7   : > { %7213 = vmatprep.mubr.msk.bf16.mxu0 %vm1688_vm3, %v9721_v36 }
 0x2dd   : > { %3353 = vmatmul.mubr.bf16.gmra.mrb[108].mxu1 %v9703_v18 }
 0x2de   : > { %4136 = vmatmul.mubr.bf16.gmra.mrb[228].mxu0 %v9735_v59  ;;  %7078 = vmatprep.mubr.msk.bf16.mxu1 %vm1688_vm3, %v9705_v21 }
 0x2df   : > { %7214 = vmatprep.mubr.msk.bf16.mxu0 %vm1688_vm3, %v9737_v1 }
 0x2e1   : > { %v9967_v33 = vpop.f32.mrb[32].mxu1  ;;  %v9969_v11 = vpop.f32.mrb[156].mxu0 }
 0x2e2   : > { %11219 = vst [vmem:[#allocation19_spill] sm:$0xff] %v9967_v33  ;;  %11220 = vst [vmem:[#allocation20_spill] sm:$0xff] %v9969_v11  ;;  %v3108_v7 = vpop.f32.mrb[33].mxu1  ;;  %v3569_v8 = vpop.f32.mrb[157].mxu0 }
 0x2e3   : > { %v9971_v41 = vpop.f32.mrb[34].mxu1  ;;  %v9973_v61 = vpop.f32.mrb[158].mxu0 }
 0x2e4   : > { %11221 = vst [vmem:[#allocation21_spill] sm:$0xff] %v9971_v41  ;;  %11222 = vst [vmem:[#allocation22_spill] sm:$0xff] %v9973_v61  ;;  %v3111_v24 = vpop.f32.mrb[35].mxu1  ;;  %v3572_v34 = vpop.f32.mrb[159].mxu0 }
 0x2e5   : > { %3361 = vmatmul.mubr.bf16.gmra.mrb[112].mxu1 %v9719_v32 }
 0x2e6   : > { %4144 = vmatmul.mubr.bf16.gmra.mrb[232].mxu0 %v9751_v14  ;;  %7079 = vmatprep.mubr.msk.bf16.mxu1 %vm1688_vm3, %v9721_v36 }
 0x2e7   : > { %7215 = vmatprep.mubr.msk.bf16.mxu0 %vm1688_vm3, %v9753_v17 }
 0x2ed   : > { %3369 = vmatmul.mubr.bf16.gmra.mrb[116].mxu1 %v9735_v59 }
 0x2ee   : > { %4152 = vmatmul.mubr.bf16.gmra.mrb[236].mxu0 %v9767_v30  ;;  %7080 = vmatprep.mubr.msk.bf16.mxu1 %vm1688_vm3, %v9737_v1 }
 0x2ef   : > { %7216 = vmatprep.mubr.msk.bf16.mxu0 %vm1688_vm3, %v9769_v35 }
 0x2f1   : > { %v9987_v34 = vpop.f32.mrb[36].mxu1  ;;  %v9989_v24 = vpop.f32.mrb[160].mxu0 }
 0x2f2   : > { %11223 = vst [vmem:[#allocation23_spill] sm:$0xff] %v9987_v34  ;;  %11224 = vst [vmem:[#allocation24_spill] sm:$0xff] %v9989_v24  ;;  %v3116_v7 = vpop.f32.mrb[37].mxu1  ;;  %v3577_v8 = vpop.f32.mrb[161].mxu0  ;;  %v2812_v34 = vld [vmem:[#allocation5 + $0x248] sm:$0xff]  ;;  %v2814_v24 = vld [vmem:[#allocation5 + $0x258] sm:$0xff] }
 0x2f3   : > { %v9991_v41 = vpop.f32.mrb[38].mxu1  ;;  %v9993_v33 = vpop.f32.mrb[162].mxu0  ;;  %v10001_v7 = vpack.c.bf16 %v2814_v24, %v2812_v34 }
 0x2f4   : > { %11225 = vst [vmem:[#allocation25_spill] sm:$0xff] %v9991_v41  ;;  %11226 = vst [vmem:[#allocation26_spill] sm:$0xff] %v9993_v33  ;;  %v3119_v61 = vpop.f32.mrb[39].mxu1  ;;  %v3580_v11 = vpop.f32.mrb[163].mxu0 }
 0x2f5   : > { %3377 = vmatmul.mubr.bf16.gmra.mrb[120].mxu1 %v9751_v14  ;;  %v2816_v61 = vld [vmem:[#allocation5 + $0x268] sm:$0xff]  ;;  %v2818_v11 = vld [vmem:[#allocation5 + $0x278] sm:$0xff] }
 0x2f6   : > { %4160 = vmatmul.mubr.bf16.gmra.mrb[240].mxu0 %v9791_v19  ;;  %7081 = vmatprep.mubr.msk.bf16.mxu1 %vm1688_vm3, %v9753_v17  ;;  %v2858_v34 = vpack.c.bf16 %v2818_v11, %v2816_v61 }
 0x2f7   : > { %7217 = vmatprep.mubr.msk.bf16.mxu0 %vm1688_vm3, %v9793_v20 }
 0x2fd   : > { %3385 = vmatmul.mubr.bf16.gmra.mrb[124].mxu1 %v9767_v30 }
 0x2fe   : > { %4168 = vmatmul.mubr.bf16.gmra.mrb[244].mxu0 %v9826_v10  ;;  %7158 = vmatprep.mubr.msk.bf16.mxu1 %vm1688_vm3, %v9267_v4 }
 0x2ff   : > { %7218 = vmatprep.mubr.msk.bf16.mxu0 %vm1688_vm3, %v10001_v7 }
 0x302   : > { %v10009_v8 = vpop.f32.mrb[40].mxu1  ;;  %v10011_v41 = vpop.f32.mrb[164].mxu0 }
 0x303   : > { %v3124_v33 = vpop.f32.mrb[41].mxu1  ;;  %v3585_v50 = vpop.f32.mrb[165].mxu0 }
 0x304   : > { %v10013_v24 = vpop.f32.mrb[42].mxu1  ;;  %v10015_v56 = vpop.f32.mrb[166].mxu0 }
 0x305   : > { %v3127_v63 = vpop.f32.mrb[43].mxu1  ;;  %v3588_v28 = vpop.f32.mrb[167].mxu0  ;;  %3787 = vmatmul.mubr.bf16.vlgmr.msra.gmra.mrb[128].mxu1 %v9313_v51 }
 0x306   : > { %4176 = vmatmul.mubr.bf16.gmra.mrb[248].mxu0 %v9808_v29  ;;  %7159 = vmatprep.mubr.msk.bf16.mxu1 %vm1688_vm3, %v9317_v54 }
 0x307   : > { %7219 = vmatprep.mubr.msk.bf16.mxu0 %vm1688_vm3, %v2858_v34 }
 0x30d   : > { %3795 = vmatmul.mubr.bf16.gmra.mrb[132].mxu1 %v9367_v45 }
 0x30e   : > { %4184 = vmatmul.mubr.bf16.gmra.mrb[252].mxu0 %v9808_v29  ;;  %7160 = vmatprep.mubr.msk.bf16.mxu1 %vm1688_vm3, %v9371_v48 }
 0x312   : > { %v10026_v4 = vpop.f32.mrb[44].mxu1  ;;  %v10028_v50 = vpop.f32.mrb[168].mxu0 }
 0x313   : > { %v3132_v28 = vpop.f32.mrb[45].mxu1  ;;  %v3593_v51 = vpop.f32.mrb[169].mxu0 }
 0x314   : > { %v10030_v63 = vpop.f32.mrb[46].mxu1  ;;  %v10032_v33 = vpop.f32.mrb[170].mxu0 }
 0x315   : > { %v3135_v54 = vpop.f32.mrb[47].mxu1  ;;  %v3596_v61 = vpop.f32.mrb[171].mxu0  ;;  %3803 = vmatmul.mubr.bf16.gmra.mrb[136].mxu1 %v9420_v40 }
 0x316   : > { %7161 = vmatprep.mubr.msk.bf16.mxu1 %vm1688_vm3, %v9424_v44 }
 0x31d   : > { %3811 = vmatmul.mubr.bf16.gmra.mrb[140].mxu1 %v9473_v38 }
 0x31e   : > { %7162 = vmatprep.mubr.msk.bf16.mxu1 %vm1688_vm3, %v9477_v43 }
 0x322   : > { %v10040_v45 = vpop.f32.mrb[48].mxu1  ;;  %v10042_v48 = vpop.f32.mrb[172].mxu0 }
 0x323   : > { %v3140_v11 = vpop.f32.mrb[49].mxu1  ;;  %v3601_v34 = vpop.f32.mrb[173].mxu0 }
 0x324   : > { %v10044_v28 = vpop.f32.mrb[50].mxu1  ;;  %v10046_v51 = vpop.f32.mrb[174].mxu0 }
 0x325   : > { %v3143_v54 = vpop.f32.mrb[51].mxu1  ;;  %v3604_v40 = vpop.f32.mrb[175].mxu0  ;;  %3819 = vmatmul.mubr.bf16.gmra.mrb[144].mxu1 %v9529_v42 }
 0x326   : > { %7163 = vmatprep.mubr.msk.bf16.mxu1 %vm1688_vm3, %v9533_v49 }
 0x32d   : > { %3827 = vmatmul.mubr.bf16.gmra.mrb[148].mxu1 %v9610_v0 }
 0x32e   : > { %7164 = vmatprep.mubr.msk.bf16.mxu1 %vm1688_vm3, %v9614_v5 }
 0x332   : > { %v10054_v44 = vpop.f32.mrb[52].mxu1  ;;  %v10056_v38 = vpop.f32.mrb[176].mxu0 }
 0x333   : > { %v3148_v43 = vpop.f32.mrb[53].mxu1  ;;  %v3609_v61 = vpop.f32.mrb[177].mxu0 }
 0x334   : > { %v10058_v11 = vpop.f32.mrb[54].mxu1  ;;  %v10060_v34 = vpop.f32.mrb[178].mxu0 }
 0x335   : > { %v3151_v54 = vpop.f32.mrb[55].mxu1  ;;  %v3612_v42 = vpop.f32.mrb[179].mxu0  ;;  %3835 = vmatmul.mubr.bf16.gmra.mrb[152].mxu1 %v9656_v37 }
 0x336   : > { %7165 = vmatprep.mubr.msk.bf16.mxu1 %vm1688_vm3, %v9658_v47 }
 0x33d   : > { %3843 = vmatmul.mubr.bf16.gmra.mrb[156].mxu1 %v9687_v26 }
 0x33e   : > { %7166 = vmatprep.mubr.msk.bf16.mxu1 %vm1688_vm3, %v9689_v9 }
 0x342   : > { %v10068_v49 = vpop.f32.mrb[56].mxu1  ;;  %v10070_v0 = vpop.f32.mrb[180].mxu0 }
 0x343   : > { %v3156_v5 = vpop.f32.mrb[57].mxu1  ;;  %v3617_v40 = vpop.f32.mrb[181].mxu0 }
 0x344   : > { %v10072_v43 = vpop.f32.mrb[58].mxu1  ;;  %v10074_v61 = vpop.f32.mrb[182].mxu0 }
 0x345   : > { %v3159_v54 = vpop.f32.mrb[59].mxu1  ;;  %v3620_v37 = vpop.f32.mrb[183].mxu0  ;;  %3851 = vmatmul.mubr.bf16.gmra.mrb[160].mxu1 %v9703_v18 }
 0x346   : > { %7167 = vmatprep.mubr.msk.bf16.mxu1 %vm1688_vm3, %v9705_v21 }
 0x34d   : > { %3859 = vmatmul.mubr.bf16.gmra.mrb[164].mxu1 %v9719_v32 }
 0x34e   : > { %7168 = vmatprep.mubr.msk.bf16.mxu1 %vm1688_vm3, %v9721_v36 }
 0x350   : > { %v10082_v47 = vpop.f32.mrb[60].mxu1  ;;  %v10084_v26 = vpop.f32.mrb[184].mxu0 }
 0x351   : > { %11227 = vst [vmem:[#allocation27_spill] sm:$0xff] %v10082_v47  ;;  %v3164_v9 = vpop.f32.mrb[61].mxu1  ;;  %v3625_v42 = vpop.f32.mrb[185].mxu0 }
 0x352   : > { %v10086_v5 = vpop.f32.mrb[62].mxu1  ;;  %v10088_v40 = vpop.f32.mrb[186].mxu0 }
 0x353   : > { %v3167_v54 = vpop.f32.mrb[63].mxu1  ;;  %v3628_v18 = vpop.f32.mrb[187].mxu0 }
 0x355   : > { %3867 = vmatmul.mubr.bf16.gmra.mrb[168].mxu1 %v9735_v59 }
 0x356   : > { %7169 = vmatprep.mubr.msk.bf16.mxu1 %vm1688_vm3, %v9737_v1 }
 0x358   : > { %v3266_v21 = vpop.f32.mrb[64].mxu1 }
 0x359   : > { %v3267_v32 = vadd.f32 %v3266_v21, %v9548_v60  ;;  %v3268_v36 = vpop.f32.mrb[65].mxu1 }
 0x35a   : > { %v3269_v37 = vpop.f32.mrb[66].mxu1 }
 0x35b   : > { %v3270_v47 = vadd.f32 %v3269_v37, %v9555_v3  ;;  %v3271_v9 = vpop.f32.mrb[67].mxu1  ;;  %v10096_v42 = vadd.f32 %v9785_v53, %v3267_v32 }
 0x35d   : > { %3875 = vmatmul.mubr.bf16.gmra.mrb[172].mxu1 %v9751_v14  ;;  %v10100_v54 = vadd.f32 %v9789_v62, %v3270_v47 }
 0x35e   : > { %7170 = vmatprep.mubr.msk.bf16.mxu1 %vm1688_vm3, %v9753_v17 }
 0x360   : > { %v3274_v59 = vpop.f32.mrb[68].mxu1 }
 0x361   : > { %v10104_v1 = vpop.f32.mrb[188].mxu0  ;;  %v3275_v60 = vadd.f32 %v3274_v59, %v9782_v52  ;;  %v3276_v18 = vpop.f32.mrb[69].mxu1 }
 0x362   : > { %v3633_v21 = vpop.f32.mrb[189].mxu0  ;;  %v3277_v3 = vpop.f32.mrb[70].mxu1 }
 0x363   : > { %v10107_v36 = vpop.f32.mrb[190].mxu0  ;;  %v3278_v53 = vadd.f32 %v3277_v3, %v9787_v22  ;;  %v3279_v32 = vpop.f32.mrb[71].mxu1  ;;  %v10111_v62 = vadd.f32 %v9806_v27, %v3275_v60 }
 0x364   : > { %v3636_v14 = vpop.f32.mrb[191].mxu0 }
 0x365   : > { %3883 = vmatmul.mubr.bf16.gmra.mrb[176].mxu1 %v9767_v30  ;;  %v10115_v17 = vadd.f32 %v9817_v57, %v3278_v53 }
 0x366   : > { %7171 = vmatprep.mubr.msk.bf16.mxu1 %vm1688_vm3, %v9769_v35 }
 0x368   : > { %v3282_v52 = vpop.f32.mrb[72].mxu1 }
 0x369   : > { %v10119_v47 = vpop.f32.mrb[192].mxu0  ;;  %v3283_v37 = vadd.f32 %v3282_v52, %v9804_v25  ;;  %v3284_v9 = vpop.f32.mrb[73].mxu1 }
 0x36a   : > { %v4067_v22 = vpop.f32.mrb[193].mxu0  ;;  %v3285_v59 = vpop.f32.mrb[74].mxu1 }
 0x36b   : > { %v10122_v18 = vpop.f32.mrb[194].mxu0  ;;  %v3286_v27 = vadd.f32 %v3285_v59, %v9815_v55  ;;  %v3287_v60 = vpop.f32.mrb[75].mxu1  ;;  %v10126_v57 = vadd.f32 %v9844_v13, %v3283_v37 }
 0x36c   : > { %v4070_v30 = vpop.f32.mrb[195].mxu0 }
 0x36d   : > { %3891 = vmatmul.mubr.bf16.gmra.mrb[180].mxu1 %v9791_v19  ;;  %v10130_v35 = vadd.f32 %v9848_v23, %v3286_v27 }
 0x36e   : > { %7172 = vmatprep.mubr.msk.bf16.mxu1 %vm1688_vm3, %v9793_v20 }
 0x370   : > { %v3290_v25 = vpop.f32.mrb[76].mxu1 }
 0x371   : > { %v10134_v21 = vpop.f32.mrb[196].mxu0  ;;  %v3291_v3 = vadd.f32 %v3290_v25, %v9842_v12  ;;  %v3292_v53 = vpop.f32.mrb[77].mxu1 }
 0x372   : > { %v4075_v55 = vpop.f32.mrb[197].mxu0  ;;  %v3293_v32 = vpop.f32.mrb[78].mxu1 }
 0x373   : > { %v10137_v14 = vpop.f32.mrb[198].mxu0  ;;  %v3294_v13 = vadd.f32 %v3293_v32, %v9846_v16  ;;  %v3295_v52 = vpop.f32.mrb[79].mxu1  ;;  %v10141_v23 = vadd.f32 %v9880_v46, %v3291_v3 }
 0x374   : > { %v4078_v19 = vpop.f32.mrb[199].mxu0 }
 0x375   : > { %3899 = vmatmul.mubr.bf16.gmra.mrb[184].mxu1 %v9826_v10  ;;  %v10145_v20 = vadd.f32 %v9884_v6, %v3294_v13  ;;  %v11229_v19 = vld [vmem:[#allocation12_spill] sm:$0xff] }
 0x376   : > { %7173 = vmatprep.mubr.msk.bf16.mxu1 %vm1688_vm3, %v10001_v7 }
 0x378   : > { %v3298_v12 = vpop.f32.mrb[80].mxu1 }
 0x379   : > { %v10149_v37 = vpop.f32.mrb[200].mxu0  ;;  %v3299_v9 = vadd.f32 %v3298_v12, %v9878_v39  ;;  %v3300_v22 = vpop.f32.mrb[81].mxu1 }
 0x37a   : > { %v4083_v16 = vpop.f32.mrb[201].mxu0  ;;  %v3301_v59 = vpop.f32.mrb[82].mxu1 }
 0x37b   : > { %v10152_v27 = vpop.f32.mrb[202].mxu0  ;;  %v3302_v46 = vadd.f32 %v3301_v59, %v9882_v2  ;;  %v3303_v60 = vpop.f32.mrb[83].mxu1  ;;  %v10156_v6 = vadd.f32 %v9909_v15, %v3299_v9  ;;  %v11228_v2 = vld [vmem:[#allocation10_spill] sm:$0xff]  ;;  %v11233_v16 = vld [vmem:[#allocation11_spill] sm:$0xff] }
 0x37c   : > { %v4086_v10 = vpop.f32.mrb[203].mxu0 }
 0x37d   : > { %3907 = vmatmul.mubr.bf16.gmra.mrb[188].mxu1 %v9808_v29  ;;  %v10160_v7 = vadd.f32 %v9913_v31, %v3302_v46  ;;  %v11231_v29 = vld [vmem:[#allocation14_spill] sm:$0xff] }
 0x380   : > { %v3306_v30 = vpop.f32.mrb[84].mxu1 }
 0x381   : > { %v10162_v25 = vpop.f32.mrb[204].mxu0  ;;  %v3307_v39 = vadd.f32 %v3306_v30, %v9907_v58  ;;  %v3308_v3 = vpop.f32.mrb[85].mxu1  ;;  %v11234_v30 = vld [vmem:[#allocation13_spill] sm:$0xff] }
 0x382   : > { %v4091_v53 = vpop.f32.mrb[205].mxu0  ;;  %v3309_v55 = vpop.f32.mrb[86].mxu1 }
 0x383   : > { %v10165_v32 = vpop.f32.mrb[206].mxu0  ;;  %v3310_v13 = vadd.f32 %v3309_v55, %v11228_v2  ;;  %v3311_v52 = vpop.f32.mrb[87].mxu1  ;;  %v10169_v12 = vadd.f32 %v11229_v19, %v3307_v39  ;;  %v11235_v2 = vld [vmem:[#allocation16_spill] sm:$0xff] }
 0x384   : > { %v4094_v15 = vpop.f32.mrb[207].mxu0  ;;  %v11237_v52 = vld [vmem:[#allocation18_spill] sm:$0xff] }
 0x385   : > { %11230 = vst [vmem:[#allocation10_spill] sm:$0xff] %v10169_v12  ;;  %v10172_v31 = vadd.f32 %v11231_v29, %v3310_v13  ;;  %v11240_v29 = vld [vmem:[#allocation15_spill] sm:$0xff]  ;;  %v11242_v12 = vld [vmem:[#allocation17_spill] sm:$0xff] }
 0x387   : > { %11232 = vst [vmem:[#allocation12_spill] sm:$0xff] %v10172_v31 }
 0x388   : > { %v3314_v9 = vpop.f32.mrb[88].mxu1 }
 0x389   : > { %v10174_v22 = vpop.f32.mrb[208].mxu0  ;;  %v3315_v58 = vadd.f32 %v3314_v9, %v11233_v16  ;;  %v3316_v59 = vpop.f32.mrb[89].mxu1 }
 0x38a   : > { %v4099_v46 = vpop.f32.mrb[209].mxu0  ;;  %v3317_v60 = vpop.f32.mrb[90].mxu1 }
 0x38b   : > { %v10177_v10 = vpop.f32.mrb[210].mxu0  ;;  %v3318_v3 = vadd.f32 %v3317_v60, %v11234_v30  ;;  %v3319_v53 = vpop.f32.mrb[91].mxu1  ;;  %v10181_v39 = vadd.f32 %v11235_v2, %v3315_v58  ;;  %v11245_v2 = vld [vmem:[#allocation22_spill] sm:$0xff] }
 0x38c   : > { %v4102_v55 = vpop.f32.mrb[211].mxu0 }
 0x38d   : > { %11236 = vst [vmem:[#allocation14_spill] sm:$0xff] %v10181_v39  ;;  %v10184_v13 = vadd.f32 %v11237_v52, %v3318_v3  ;;  %v11243_v55 = vld [vmem:[#allocation20_spill] sm:$0xff]  ;;  %v11248_v39 = vld [vmem:[#allocation19_spill] sm:$0xff] }
 0x38f   : > { %11238 = vst [vmem:[#allocation11_spill] sm:$0xff] %v10184_v13 }
 0x390   : > { %v3322_v15 = vpop.f32.mrb[92].mxu1 }
 0x391   : > { %v10186_v19 = vpop.f32.mrb[212].mxu0  ;;  %v3323_v9 = vadd.f32 %v3322_v15, %v11240_v29  ;;  %v3324_v16 = vpop.f32.mrb[93].mxu1 }
 0x392   : > { %11239 = vst [vmem:[#allocation13_spill] sm:$0xff] %v10186_v19  ;;  %v4107_v59 = vpop.f32.mrb[213].mxu0  ;;  %v3325_v46 = vpop.f32.mrb[94].mxu1 }
 0x393   : > { %v10189_v31 = vpop.f32.mrb[214].mxu0  ;;  %v3326_v60 = vadd.f32 %v3325_v46, %v11242_v12  ;;  %v3327_v30 = vpop.f32.mrb[95].mxu1  ;;  %v10193_v58 = vadd.f32 %v11243_v55, %v3323_v9  ;;  %v11252_v55 = vld [vmem:[#allocation26_spill] sm:$0xff] }
 0x394   : > { %11241 = vst [vmem:[#allocation16_spill] sm:$0xff] %v10189_v31  ;;  %v4110_v53 = vpop.f32.mrb[215].mxu0  ;;  %v11250_v31 = vld [vmem:[#allocation21_spill] sm:$0xff] }
 0x395   : > { %11244 = vst [vmem:[#allocation18_spill] sm:$0xff] %v10193_v58  ;;  %v10196_v3 = vadd.f32 %v11245_v2, %v3326_v60  ;;  %v11251_v53 = vld [vmem:[#allocation24_spill] sm:$0xff]  ;;  %v11253_v58 = vld [vmem:[#allocation23_spill] sm:$0xff] }
 0x397   : > { %11246 = vst [vmem:[#allocation15_spill] sm:$0xff] %v10196_v3 }
 0x398   : > { %v3330_v52 = vpop.f32.mrb[96].mxu1 }
 0x399   : > { %v10198_v13 = vpop.f32.mrb[216].mxu0  ;;  %v3331_v15 = vadd.f32 %v3330_v52, %v11248_v39  ;;  %v3332_v29 = vpop.f32.mrb[97].mxu1 }
 0x39a   : > { %11247 = vst [vmem:[#allocation17_spill] sm:$0xff] %v10198_v13  ;;  %v4115_v16 = vpop.f32.mrb[217].mxu0  ;;  %v3333_v59 = vpop.f32.mrb[98].mxu1 }
 0x39b   : > { %v10201_v19 = vpop.f32.mrb[218].mxu0  ;;  %v3334_v12 = vadd.f32 %v3333_v59, %v11250_v31  ;;  %v3335_v46 = vpop.f32.mrb[99].mxu1  ;;  %v10205_v9 = vadd.f32 %v11251_v53, %v3331_v15 }
 0x39c   : > { %11249 = vst [vmem:[#allocation20_spill] sm:$0xff] %v10201_v19  ;;  %v4118_v30 = vpop.f32.mrb[219].mxu0  ;;  %v11254_v19 = vld [vmem:[#allocation25_spill] sm:$0xff] }
 0x39d   : > { %v10208_v60 = vadd.f32 %v11252_v55, %v3334_v12 }
 0x3a0   : > { %v3338_v2 = vpop.f32.mrb[100].mxu1 }
 0x3a1   : > { %v10210_v3 = vpop.f32.mrb[220].mxu0  ;;  %v3339_v39 = vadd.f32 %v3338_v2, %v11253_v58  ;;  %v3340_v52 = vpop.f32.mrb[101].mxu1 }
 0x3a2   : > { %v4123_v29 = vpop.f32.mrb[221].mxu0  ;;  %v3341_v16 = vpop.f32.mrb[102].mxu1 }
 0x3a3   : > { %v10213_v13 = vpop.f32.mrb[222].mxu0  ;;  %v3342_v31 = vadd.f32 %v3341_v16, %v11254_v19  ;;  %v3343_v59 = vpop.f32.mrb[103].mxu1  ;;  %v10217_v15 = vadd.f32 %v10011_v41, %v3339_v39 }
 0x3a4   : > { %v4126_v46 = vpop.f32.mrb[223].mxu0 }
 0x3a5   : > { %v10220_v12 = vadd.f32 %v10015_v56, %v3342_v31 }
 0x3a8   : > { %v3346_v30 = vpop.f32.mrb[104].mxu1 }
 0x3a9   : > { %v10222_v53 = vpop.f32.mrb[224].mxu0  ;;  %v3347_v58 = vadd.f32 %v3346_v30, %v10009_v8  ;;  %v3348_v55 = vpop.f32.mrb[105].mxu1 }
 0x3aa   : > { %v4131_v2 = vpop.f32.mrb[225].mxu0  ;;  %v3349_v52 = vpop.f32.mrb[106].mxu1 }
 0x3ab   : > { %v10225_v29 = vpop.f32.mrb[226].mxu0  ;;  %v3350_v19 = vadd.f32 %v3349_v52, %v10013_v24  ;;  %v3351_v16 = vpop.f32.mrb[107].mxu1  ;;  %v10229_v41 = vadd.f32 %v10028_v50, %v3347_v58 }
 0x3ac   : > { %v4134_v59 = vpop.f32.mrb[227].mxu0 }
 0x3ad   : > { %v10232_v56 = vadd.f32 %v10032_v33, %v3350_v19 }
 0x3b0   : > { %v3354_v39 = vpop.f32.mrb[108].mxu1 }
 0x3b1   : > { %v10234_v31 = vpop.f32.mrb[228].mxu0  ;;  %v3355_v8 = vadd.f32 %v3354_v39, %v10026_v4  ;;  %v3356_v46 = vpop.f32.mrb[109].mxu1 }
 0x3b2   : > { %v4139_v30 = vpop.f32.mrb[229].mxu0  ;;  %v3357_v55 = vpop.f32.mrb[110].mxu1 }
 0x3b3   : > { %v10237_v2 = vpop.f32.mrb[230].mxu0  ;;  %v3358_v24 = vadd.f32 %v3357_v55, %v10030_v63  ;;  %v3359_v52 = vpop.f32.mrb[111].mxu1  ;;  %v10241_v50 = vadd.f32 %v10042_v48, %v3355_v8  ;;  %v8286_v8 = vld [vmem:[%s11199_s5 + $0x50] sm:$0xff]  }
 0x3b4   : > { %v4142_v16 = vpop.f32.mrb[231].mxu0  ;;  %4737 = vmatpush1.bf16.msra.mxu1 %v8286_v8 }
 0x3b5   : > { %v10244_v33 = vadd.f32 %v10046_v51, %v3358_v24 }
 0x3b8   : > { %v3362_v58 = vpop.f32.mrb[112].mxu1 }
 0x3b9   : > { %v10246_v19 = vpop.f32.mrb[232].mxu0  ;;  %v3363_v4 = vadd.f32 %v3362_v58, %v10040_v45  ;;  %v3364_v59 = vpop.f32.mrb[113].mxu1 }
 0x3ba   : > { %v4147_v39 = vpop.f32.mrb[233].mxu0  ;;  %v3365_v46 = vpop.f32.mrb[114].mxu1 }
 0x3bb   : > { %v10249_v30 = vpop.f32.mrb[234].mxu0  ;;  %v3366_v63 = vadd.f32 %v3365_v46, %v10044_v28  ;;  %v3367_v55 = vpop.f32.mrb[115].mxu1  ;;  %v10253_v48 = vadd.f32 %v10056_v38, %v3363_v4  ;;  %v11256_v38 = vmov 0  }
 0x3bc   : > { %v4150_v52 = vpop.f32.mrb[235].mxu0  ;;  %4738 = vmatprep.subr.bf16.mxu1 %v11256_v38 }
 0x3bd   : > { %v10256_v51 = vadd.f32 %v10060_v34, %v3366_v63 }
 0x3bf   : > { %11255 = vst [vmem:[#allocation22_spill] sm:$0xff] %v10256_v51 }
 0x3c0   : > { %v3370_v45 = vpop.f32.mrb[116].mxu1 }
 0x3c1   : > { %v10261_v24 = vpop.f32.mrb[236].mxu0  ;;  %v3371_v16 = vadd.f32 %v3370_v45, %v10054_v44  ;;  %v3372_v58 = vpop.f32.mrb[117].mxu1 }
 0x3c2   : > { %v4155_v59 = vpop.f32.mrb[237].mxu0  ;;  %v3373_v28 = vpop.f32.mrb[118].mxu1 }
 0x3c3   : > { %v10264_v39 = vpop.f32.mrb[238].mxu0  ;;  %v3374_v34 = vadd.f32 %v3373_v28, %v10058_v11  ;;  %v3375_v4 = vpop.f32.mrb[119].mxu1  ;;  %v10269_v63 = vadd.f32 %v10070_v0, %v3371_v16  ;;  %v8287_v0 = vld [vmem:[%s11199_s5 + $0x58] sm:$0xff]  }
 0x3c4   : > { %v4158_v46 = vpop.f32.mrb[239].mxu0  ;;  %4739 = vmatpush1.bf16.msra.mxu1 %v8287_v0 }
 0x3c5   : > { %v10272_v55 = vadd.f32 %v10074_v61, %v3374_v34  ;;  %4740 = vmatprep.subr.bf16.mxu1 %v11256_v38  ;;  %v11257_v46 = vld [vmem:[#allocation27_spill] sm:$0xff] }
 0x3c8   : > { %v3378_v52 = vpop.f32.mrb[120].mxu1 }
 0x3c9   : > { %v10274_v44 = vpop.f32.mrb[240].mxu0  ;;  %v3379_v8 = vadd.f32 %v3378_v52, %v10068_v49  ;;  %v3380_v45 = vpop.f32.mrb[121].mxu1 }
 0x3ca   : > { %v4163_v58 = vpop.f32.mrb[241].mxu0  ;;  %v3381_v59 = vpop.f32.mrb[122].mxu1 }
 0x3cb   : > { %v10277_v51 = vpop.f32.mrb[242].mxu0  ;;  %v3382_v11 = vadd.f32 %v3381_v59, %v10072_v43  ;;  %v3383_v28 = vpop.f32.mrb[123].mxu1  ;;  %v10284_v61 = vadd.f32 %v10084_v26, %v3379_v8 }
 0x3cc   : > { %v4166_v4 = vpop.f32.mrb[243].mxu0 }
 0x3cd   : > { %v10287_v16 = vadd.f32 %v10088_v40, %v3382_v11 }
 0x3d0   : > { %v3386_v49 = vpop.f32.mrb[124].mxu1 }
 0x3d1   : > { %v10290_v34 = vpop.f32.mrb[244].mxu0  ;;  %v3387_v43 = vadd.f32 %v3386_v49, %v11257_v46  ;;  %v3388_v52 = vpop.f32.mrb[125].mxu1 }
 0x3d2   : > { %v4171_v45 = vpop.f32.mrb[245].mxu0  ;;  %v3389_v58 = vpop.f32.mrb[126].mxu1 }
 0x3d3   : > { %v10293_v59 = vpop.f32.mrb[246].mxu0  ;;  %v3390_v28 = vadd.f32 %v3389_v58, %v10086_v5  ;;  %v3391_v26 = vpop.f32.mrb[127].mxu1  ;;  %v10297_v4 = vadd.f32 %v10104_v1, %v3387_v43  ;;  %v8288_v45 = vld [vmem:[%s11199_s5 + $0x60] sm:$0xff]  }
 0x3d4   : > { %v4174_v8 = vpop.f32.mrb[247].mxu0  ;;  %4741 = vmatpush1.bf16.msra.mxu1 %v8288_v45 }
 0x3d5   : > { %v10300_v40 = vadd.f32 %v10107_v36, %v3390_v28  ;;  %4742 = vmatprep.subr.bf16.mxu1 %v11256_v38  ;;  %v8290_v8 = vld [vmem:[%s11199_s5 + $0x70] sm:$0xff]  }
 0x3d8   : > { %v3788_v11 = vpop.f32.mrb[128].mxu1 }
 0x3d9   : > { %v10302_v0 = vpop.f32.mrb[248].mxu0  ;;  %v3915_v49 = vadd.f32 %v3788_v11, %v10096_v42  ;;  %v3790_v46 = vpop.f32.mrb[129].mxu1  ;;  %v8289_v42 = vld [vmem:[%s11199_s5 + $0x68] sm:$0xff]  }
 0x3da   : > { %v4179_v52 = vpop.f32.mrb[249].mxu0  ;;  %v3791_v5 = vpop.f32.mrb[130].mxu1  ;;  %4743 = vmatpush1.bf16.msra.mxu1 %v8289_v42 }
 0x3db   : > { %v10308_v58 = vpop.f32.mrb[250].mxu0  ;;  %v4192_v1 = vadd.f32 %v10119_v47, %v3915_v49  ;;  %v3916_v43 = vadd.f32 %v3791_v5, %v10100_v54  ;;  %v3793_v36 = vpop.f32.mrb[131].mxu1  ;;  %4744 = vmatprep.subr.bf16.mxu1 %v11256_v38  ;;  %v10327_v52 = vld [vmem:[%s11198_s4] ss:$0 sm:$0xff] }
 0x3dc   : > { %v4182_v28 = vpop.f32.mrb[251].mxu0 }
 0x3dd   : > { %v4193_v26 = vadd.f32 %v10122_v18, %v3916_v43  ;;  %v4231_v42 = vadd.f32 %v10327_v52, %v4192_v1 }
 0x3de   : > { %4745 = vmatpush1.bf16.msra.mxu1 %v8290_v8  ;;  %v8292_v8 = vld [vmem:[%s11199_s5 + $0x80] sm:$0xff]  }
 0x3df   : > { %4746 = vmatprep.subr.bf16.mxu1 %v11256_v38 }
 0x3e0   : > { %v3796_v11 = vpop.f32.mrb[132].mxu1 }
 0x3e1   : > { %v10320_v47 = vpop.f32.mrb[252].mxu0  ;;  %v3917_v54 = vadd.f32 %v3796_v11, %v10111_v62  ;;  %v3798_v49 = vpop.f32.mrb[133].mxu1  ;;  %v8291_v62 = vld [vmem:[%s11199_s5 + $0x78] sm:$0xff]  }
 0x3e2   : > { %v4187_v46 = vpop.f32.mrb[253].mxu0  ;;  %v3799_v18 = vpop.f32.mrb[134].mxu1  ;;  %4747 = vmatpush1.bf16.msra.mxu1 %v8291_v62  ;;  %v8293_v62 = vld [vmem:[%s11199_s5 + $0x88] sm:$0xff]  }
 0x3e3   : > { %v10329_v45 = vpop.f32.mrb[254].mxu0  ;;  %v4194_v5 = vadd.f32 %v10134_v21, %v3917_v54  ;;  %v3918_v43 = vadd.f32 %v3799_v18, %v10115_v17  ;;  %v3801_v36 = vpop.f32.mrb[135].mxu1  ;;  %v4232_v46 = vadd.f32 %v10327_v52, %v4193_v26  ;;  %4748 = vmatprep.subr.bf16.mxu1 %v11256_v38 }
 0x3e4   : > { %v4190_v28 = vpop.f32.mrb[255].mxu0 }
 0x3e5   : > { %v4233_v11 = vadd.f32 %v10327_v52, %v4194_v5  ;;  %v4195_v49 = vadd.f32 %v10137_v14, %v3918_v43 }
 0x3e6   : > { %4749 = vmatpush1.bf16.msra.mxu1 %v8292_v8 }
 0x3e7   : > { %v4263_v21 = vmax.f32 %v4231_v42, %v4233_v11  ;;  %v4234_v17 = vadd.f32 %v10327_v52, %v4195_v49  ;;  %4750 = vmatprep.subr.bf16.mxu1 %v11256_v38  ;;  %v8297_v42 = vld [vmem:[%s11199_s5 + $0xf8] sm:$0xff]  }
 0x3e8   : > { %v3804_v54 = vpop.f32.mrb[136].mxu1 }
 0x3e9   : > { %4279 = vst.msk [vmem:[#allocation3] sm:$0xff] %vm1688_vm3, %v4263_v21  ;;  %v4264_v1 = vmax.f32 %v4232_v46, %v4234_v17  ;;  %v3919_v18 = vadd.f32 %v3804_v54, %v10126_v57  ;;  %v3806_v5 = vpop.f32.mrb[137].mxu1  ;;  %v8295_v57 = vld [vmem:[%s11199_s5 + $0xf0] sm:$0xff]  }
 0x3ea   : > { %v3807_v14 = vpop.f32.mrb[138].mxu1  ;;  %4751 = vmatpush1.bf16.msra.mxu1 %v8293_v62  ;;  %5206 = vmatpush1.bf16.msra.mxu0 %v8295_v57 }
 0x3eb   : > { %4280 = vst.msk [vmem:[#allocation3 + $0x8] sm:$0xff] %vm1688_vm3, %v4264_v1  ;;  %v4196_v26 = vadd.f32 %v10149_v37, %v3919_v18  ;;  %v3920_v43 = vadd.f32 %v3807_v14, %v10130_v35  ;;  %v3809_v36 = vpop.f32.mrb[139].mxu1  ;;  %v8294_v37 = vld [vmem:[%s11199_s5 + $0x90] sm:$0xff]   ;;  %4752 = vmatprep.subr.bf16.mxu1 %v11256_v38  ;;  %5207 = vmatprep.subr.bf16.mxu0 %v11256_v38  ;;  %v8296_v18 = vld [vmem:[%s11199_s5 + $0x98] sm:$0xff]  }
 0x3ed   : > { %v4197_v28 = vadd.f32 %v10152_v27, %v3920_v43  ;;  %v4235_v5 = vadd.f32 %v10327_v52, %v4196_v26 }
 0x3ee   : > { %4753 = vmatpush1.bf16.msra.mxu1 %v8294_v37  ;;  %5208 = vmatpush1.bf16.msra.mxu0 %v8297_v42  ;;  %v8298_v42 = vld [vmem:[%s11199_s5 + $0x100] sm:$0xff]  }
 0x3ef   : > { %4754 = vmatprep.subr.bf16.mxu1 %v11256_v38  ;;  %5209 = vmatprep.subr.bf16.mxu0 %v11256_v38  ;;  %v4236_v36 = vadd.f32 %v10327_v52, %v4197_v28 }
 0x3f0   : > { %v3812_v35 = vpop.f32.mrb[140].mxu1 }
 0x3f1   : > { %v3921_v11 = vadd.f32 %v3812_v35, %v10141_v23  ;;  %v3814_v27 = vpop.f32.mrb[141].mxu1 }
 0x3f2   : > { %v3815_v49 = vpop.f32.mrb[142].mxu1  ;;  %v4295_v46 = vld [vmem:[#allocation3] ss:$2 sm:$0xff]  ;;  %v4311_v21 = vld [vmem:[#allocation3 + $0x1] ss:$2 sm:$0xff]  ;;  %4755 = vmatpush1.bf16.msra.mxu1 %v8296_v18  ;;  %5210 = vmatpush1.bf16.msra.mxu0 %v8298_v42 }
 0x3f3   : > { %v4198_v17 = vadd.f32 %v10162_v25, %v3921_v11  ;;  %v3922_v8 = vadd.f32 %v3815_v49, %v10145_v20  ;;  %v3817_v54 = vpop.f32.mrb[143].mxu1  ;;  %v4326_v1 = vmax.f32 %v4295_v46, %v4311_v21  ;;  %4885 = vmatprep.subr.bf16.mxu1 %v11256_v38  ;;  %v10394_v21 = vld [vmem:[#allocation6 + $0x18] sm:$0xff]  ;;  %5211 = vmatprep.subr.bf16.mxu0 %v11256_v38 }
 0x3f5   : > { %v4237_v23 = vadd.f32 %v10327_v52, %v4198_v17  ;;  %v4199_v14 = vadd.f32 %v10165_v32, %v3922_v8  ;;  %4431 = vrot.lane.b32.xlu1 %v4326_v1, %s8476_s22  ;;  %v4503_v25 = vrot.slane %v4326_v1, 2  ;;  %v4391_v20 = vrot.slane %v4326_v1, 7  ;;  %v8299_v17 = vld [vmem:[%s11199_s5 + $0x108] sm:$0xff]  }
 0x3f6   : > { %v4366_v43 = vrot.slane %v4326_v1, 6  ;;  %v4463_v28 = vrot.slane %v4326_v1, 1  ;;  %5212 = vmatpush1.bf16.msra.mxu0 %v8299_v17  ;;  %v11258_v1 = vld [vmem:[#allocation10_spill] sm:$0xff] }
 0x3f7   : > { %v4265_v62 = vmax.f32 %v4235_v5, %v4237_v23  ;;  %v4238_v57 = vadd.f32 %v10327_v52, %v4199_v14  ;;  %4519 = vst.msk [vmem:[#allocation6 + $0x28] sm:$0x3f] %vm2707_vm4, %v4503_v25  ;;  %4399 = vrot.lane.b32.xlu0 %v4391_v20, %s8477_s29  ;;  %5213 = vmatprep.subr.bf16.mxu0 %v11256_v38  ;;  %v11259_v25 = vld [vmem:[#allocation13_spill] sm:$0xff] }
 0x3f8   : > { %v3820_v26 = vpop.f32.mrb[144].mxu1  ;;  %4383 = vst.msk [vmem:[#allocation6 + $0x20] sm:$0xfc] %vm2106_vm6, %v4366_v43  ;;  %v11260_v43 = vld [vmem:[#allocation12_spill] sm:$0xff] }
 0x3f9   : > { %4281 = vst.msk [vmem:[#allocation3 + $0x10] sm:$0xff] %vm1688_vm3, %v4265_v62  ;;  %v4266_v32 = vmax.f32 %v4236_v36, %v4238_v57  ;;  %v3923_v37 = vadd.f32 %v3820_v26, %v10156_v6  ;;  %v3822_v35 = vpop.f32.mrb[145].mxu1  ;;  %v8301_v26 = vld [vmem:[%s11199_s5 + $0x118] sm:$0xff]  }
 0x3fa   : > { %v3823_v11 = vpop.f32.mrb[146].mxu1  ;;  %v11261_v35 = vld [vmem:[#allocation16_spill] sm:$0xff] }
 0x3fb   : > { %4282 = vst.msk [vmem:[#allocation3 + $0x18] sm:$0xff] %vm1688_vm3, %v4266_v32  ;;  %v4200_v27 = vadd.f32 %v10174_v22, %v3923_v37  ;;  %v3924_v49 = vadd.f32 %v3823_v11, %v10160_v7  ;;  %v3825_v46 = vpop.f32.mrb[147].mxu1  ;;  %4471 = vrot.lane.b32.xlu0 %v4463_v28, %s8478_s13  ;;  %v8300_v7 = vld [vmem:[%s11199_s5 + $0x110] sm:$0xff]  }
 0x3fc   : > { %5214 = vmatpush1.bf16.msra.mxu0 %v8300_v7 }
 0x3fd   : > { %v4201_v6 = vadd.f32 %v10177_v10, %v3924_v49  ;;  %5215 = vmatprep.subr.bf16.mxu0 %v11256_v38  ;;  %v4239_v32 = vadd.f32 %v10327_v52, %v4200_v27  ;;  %v8302_v27 = vld [vmem:[%s11199_s5 + $0x120] sm:$0xff]  }
 0x3fe   : > { %v4532_v8 = vld [vmem:[#allocation6 + $0x28] sm:$0xff] }
 0x3ff   : > { %v7604_v54 = vpack.c.bf16 %v4532_v8, %v10394_v21  ;;  %v4240_v49 = vadd.f32 %v10327_v52, %v4201_v6  ;;  %v11262_v6 = vld [vmem:[#allocation14_spill] sm:$0xff] }
 0x400   : > { %v3828_v22 = vpop.f32.mrb[148].mxu1  ;;  %5216 = vmatpush1.bf16.msra.mxu0 %v8301_v26  ;;  %v8303_v26 = vld [vmem:[%s11199_s5 + $0x128] sm:$0xff]  }
 0x401   : > { %v3925_v18 = vadd.f32 %v3828_v22, %v11258_v1  ;;  %v3830_v5 = vpop.f32.mrb[149].mxu1  ;;  %7259 = vmatprep.mubr.msk.bf16.mxu1 %vm1688_vm3, %v7604_v54  ;;  %5217 = vmatprep.subr.bf16.mxu0 %v11256_v38 }
 0x402   : > { %v3831_v10 = vpop.f32.mrb[150].mxu1  ;;  %v4297_v23 = vld [vmem:[#allocation3 + $0x10] ss:$2 sm:$0xff]  ;;  %v4313_v14 = vld [vmem:[#allocation3 + $0x11] ss:$2 sm:$0xff] }
 0x403   : > { %v4202_v20 = vadd.f32 %v11259_v25, %v3925_v18  ;;  %v3926_v36 = vadd.f32 %v3831_v10, %v11260_v43  ;;  %v3833_v62 = vpop.f32.mrb[151].mxu1  ;;  %v4327_v57 = vmax.f32 %v4297_v23, %v4313_v14  ;;  %v11263_v10 = vld [vmem:[#allocation17_spill] sm:$0xff]  ;;  %v11264_v14 = vld [vmem:[#allocation11_spill] sm:$0xff] }
 0x404   : > { %5218 = vmatpush1.bf16.msra.mxu0 %v8302_v27  ;;  %v11267_v27 = vld [vmem:[#allocation15_spill] sm:$0xff] }
 0x405   : > { %v4241_v37 = vadd.f32 %v10327_v52, %v4202_v20  ;;  %v4203_v28 = vadd.f32 %v11261_v35, %v3926_v36  ;;  %v4504_v42 = vrot.slane %v4327_v57, 2  ;;  %4433 = vrot.lane.b32.xlu1 %v4327_v57, %s8476_s22  ;;  %v4367_v11 = vrot.slane %v4327_v57, 6  ;;  %5219 = vmatprep.subr.bf16.mxu0 %v11256_v38  ;;  %v11265_v36 = vld [vmem:[#allocation20_spill] sm:$0xff] }
 0x406   : > { %v4392_v54 = vrot.slane %v4327_v57, 7  ;;  %v4464_v43 = vrot.slane %v4327_v57, 1  ;;  %v8304_v57 = vld [vmem:[%s11199_s5 + $0x130] sm:$0xff]  }
 0x407   : > { %v4267_v46 = vmax.f32 %v4239_v32, %v4241_v37  ;;  %v4242_v17 = vadd.f32 %v10327_v52, %v4203_v28  ;;  %4520 = vst.msk [vmem:[#allocation6 + $0x38] sm:$0x3f] %vm2707_vm4, %v4504_v42  ;;  %v11266_v28 = vld [vmem:[#allocation18_spill] sm:$0xff] }
 0x408   : > { %v3836_v22 = vpop.f32.mrb[152].mxu1  ;;  %4384 = vst.msk [vmem:[#allocation6 + $0x30] sm:$0xfc] %vm2106_vm6, %v4367_v11  ;;  %5220 = vmatpush1.bf16.msra.mxu0 %v8303_v26 }
 0x409   : > { %4283 = vst.msk [vmem:[#allocation3 + $0x20] sm:$0xff] %vm1688_vm3, %v4267_v46  ;;  %v4268_v7 = vmax.f32 %v4240_v49, %v4242_v17  ;;  %v3927_v1 = vadd.f32 %v3836_v22, %v11262_v6  ;;  %v3838_v18 = vpop.f32.mrb[153].mxu1  ;;  %4401 = vrot.lane.b32.xlu1 %v4392_v54, %s8477_s29  ;;  %5221 = vmatprep.subr.bf16.mxu0 %v11256_v38  ;;  %v8305_v6 = vld [vmem:[%s11199_s5 + $0x138] sm:$0xff]  }
 0x40a   : > { %v3839_v5 = vpop.f32.mrb[154].mxu1 }
 0x40b   : > { %4284 = vst.msk [vmem:[#allocation3 + $0x28] sm:$0xff] %vm1688_vm3, %v4268_v7  ;;  %v4204_v23 = vadd.f32 %v11263_v10, %v3927_v1  ;;  %v3928_v25 = vadd.f32 %v3839_v5, %v11264_v14  ;;  %v3841_v20 = vpop.f32.mrb[155].mxu1 }
 0x40c   : > { %5222 = vmatpush1.bf16.msra.mxu0 %v8304_v57 }
 0x40d   : > { %v4205_v62 = vadd.f32 %v11265_v36, %v3928_v25  ;;  %4473 = vrot.lane.b32.xlu1 %v4464_v43, %s8478_s13  ;;  %5223 = vmatprep.subr.bf16.mxu0 %v11256_v38  ;;  %v4243_v1 = vadd.f32 %v10327_v52, %v4204_v23  ;;  %v10459_v23 = vld [vmem:[#allocation5] sm:$0xff] }
 0x40e   : > { %v4534_v32 = vld [vmem:[#allocation6 + $0x38] sm:$0xff] }
 0x40f   : > { %v10438_v37 = vpack.c.bf16 %v4534_v32, %v4532_v8  ;;  %v4244_v14 = vadd.f32 %v10327_v52, %v4205_v62 }
 0x410   : > { %v3844_v35 = vpop.f32.mrb[156].mxu1  ;;  %5224 = vmatpush1.bf16.msra.mxu0 %v8305_v6 }
 0x411   : > { %v3929_v42 = vadd.f32 %v3844_v35, %v11266_v28  ;;  %v3846_v11 = vpop.f32.mrb[157].mxu1  ;;  %7917 = vmatprep.subr.bf16.mxu0 %v10459_v23 }
 0x412   : > { %v3847_v49 = vpop.f32.mrb[158].mxu1  ;;  %v4299_v46 = vld [vmem:[#allocation3 + $0x20] ss:$2 sm:$0xff]  ;;  %v4315_v17 = vld [vmem:[#allocation3 + $0x21] ss:$2 sm:$0xff] }
 0x413   : > { %v4206_v54 = vadd.f32 %v10210_v3, %v3929_v42  ;;  %v3930_v22 = vadd.f32 %v3847_v49, %v11267_v27  ;;  %v3849_v7 = vpop.f32.mrb[159].mxu1  ;;  %v4328_v8 = vmax.f32 %v4299_v46, %v4315_v17 }
 0x415   : > { %v4245_v18 = vadd.f32 %v10327_v52, %v4206_v54  ;;  %v4207_v5 = vadd.f32 %v10213_v13, %v3930_v22  ;;  %v4505_v10 = vrot.slane %v4328_v8, 2  ;;  %4435 = vrot.lane.b32.xlu0 %v4328_v8, %s8476_s22  ;;  %v4368_v3 = vrot.slane %v4328_v8, 6 }
 0x416   : > { %v4393_v43 = vrot.slane %v4328_v8, 7  ;;  %v4465_v11 = vrot.slane %v4328_v8, 1 }
 0x417   : > { %v4269_v25 = vmax.f32 %v4243_v1, %v4245_v18  ;;  %v4246_v20 = vadd.f32 %v10327_v52, %v4207_v5  ;;  %4521 = vst.msk [vmem:[#allocation6 + $0x48] sm:$0x3f] %vm2707_vm4, %v4505_v10 }
 0x418   : > { %v3852_v36 = vpop.f32.mrb[160].mxu1  ;;  %4385 = vst.msk [vmem:[#allocation6 + $0x40] sm:$0xfc] %vm2106_vm6, %v4368_v3 }
 0x419   : > { %4285 = vst.msk [vmem:[#allocation3 + $0x30] sm:$0xff] %vm1688_vm3, %v4269_v25  ;;  %v4270_v13 = vmax.f32 %v4244_v14, %v4246_v20  ;;  %v3931_v26 = vadd.f32 %v3852_v36, %v10205_v9  ;;  %v3854_v62 = vpop.f32.mrb[161].mxu1  ;;  %4403 = vrot.lane.b32.xlu0 %v4393_v43, %s8477_s29 }
 0x41a   : > { %v3855_v35 = vpop.f32.mrb[162].mxu1 }
 0x41b   : > { %4286 = vst.msk [vmem:[#allocation3 + $0x38] sm:$0xff] %vm1688_vm3, %v4270_v13  ;;  %v4208_v57 = vadd.f32 %v10222_v53, %v3931_v26  ;;  %v3932_v28 = vadd.f32 %v3855_v35, %v10208_v60  ;;  %v3857_v42 = vpop.f32.mrb[163].mxu1 }
 0x41d   : > { %v4209_v49 = vadd.f32 %v10225_v29, %v3932_v28  ;;  %4475 = vrot.lane.b32.xlu0 %v4465_v11, %s8478_s13  ;;  %v4247_v1 = vadd.f32 %v10327_v52, %v4208_v57 }
 0x41e   : > { %v4536_v46 = vld [vmem:[#allocation6 + $0x48] sm:$0xff] }
 0x41f   : > { %v10470_v17 = vpack.c.bf16 %v4536_v46, %v4534_v32  ;;  %v4248_v10 = vadd.f32 %v10327_v52, %v4209_v49 }
 0x420   : > { %v3860_v9 = vpop.f32.mrb[164].mxu1 }
 0x421   : > { %v3933_v54 = vadd.f32 %v3860_v9, %v10217_v15  ;;  %v3862_v27 = vpop.f32.mrb[165].mxu1  ;;  %7353 = vmatprep.mubr.msk.bf16.mxu0 %vm1688_vm3, %v10470_v17 }
 0x422   : > { %v3863_v22 = vpop.f32.mrb[166].mxu1  ;;  %v4301_v53 = vld [vmem:[#allocation3 + $0x30] ss:$2 sm:$0xff]  ;;  %v4317_v7 = vld [vmem:[#allocation3 + $0x31] ss:$2 sm:$0xff] }
 0x423   : > { %v4210_v60 = vadd.f32 %v10234_v31, %v3933_v54  ;;  %v3934_v8 = vadd.f32 %v3863_v22, %v10220_v12  ;;  %v3865_v29 = vpop.f32.mrb[167].mxu1  ;;  %v4329_v6 = vmax.f32 %v4301_v53, %v4317_v7 }
 0x425   : > { %v4249_v32 = vadd.f32 %v10327_v52, %v4210_v60  ;;  %v4211_v18 = vadd.f32 %v10237_v2, %v3934_v8  ;;  %v4506_v15 = vrot.slane %v4329_v6, 2  ;;  %4437 = vrot.lane.b32.xlu1 %v4329_v6, %s8476_s22  ;;  %v4369_v5 = vrot.slane %v4329_v6, 6 }
 0x426   : > { %v4394_v12 = vrot.slane %v4329_v6, 7  ;;  %v4466_v62 = vrot.slane %v4329_v6, 1 }
 0x427   : > { %v4271_v3 = vmax.f32 %v4247_v1, %v4249_v32  ;;  %v4250_v14 = vadd.f32 %v10327_v52, %v4211_v18  ;;  %4522 = vst.msk [vmem:[#allocation6 + $0x58] sm:$0x3f] %vm2707_vm4, %v4506_v15  ;;  %v11268_v15 = vld [vmem:[#allocation22_spill] sm:$0xff] }
 0x428   : > { %v3868_v31 = vpop.f32.mrb[168].mxu1  ;;  %4386 = vst.msk [vmem:[#allocation6 + $0x50] sm:$0xfc] %vm2106_vm6, %v4369_v5 }
 0x429   : > { %4287 = vst.msk [vmem:[#allocation3 + $0x40] sm:$0xff] %vm1688_vm3, %v4271_v3  ;;  %v4272_v25 = vmax.f32 %v4248_v10, %v4250_v14  ;;  %v3935_v2 = vadd.f32 %v3868_v31, %v10229_v41  ;;  %v3870_v20 = vpop.f32.mrb[169].mxu1  ;;  %4405 = vrot.lane.b32.xlu1 %v4394_v12, %s8477_s29 }
 0x42a   : > { %v3871_v43 = vpop.f32.mrb[170].mxu1 }
 0x42b   : > { %4288 = vst.msk [vmem:[#allocation3 + $0x48] sm:$0xff] %vm1688_vm3, %v4272_v25  ;;  %v4212_v36 = vadd.f32 %v10246_v19, %v3935_v2  ;;  %v3936_v13 = vadd.f32 %v3871_v43, %v10232_v56  ;;  %v3873_v26 = vpop.f32.mrb[171].mxu1 }
 0x42d   : > { %v4213_v35 = vadd.f32 %v10249_v30, %v3936_v13  ;;  %4477 = vrot.lane.b32.xlu1 %v4466_v62, %s8478_s13  ;;  %v4251_v22 = vadd.f32 %v10327_v52, %v4212_v36 }
 0x42e   : > { %v10493_v57 = vld [vmem:[#allocation6 + $0x58] sm:$0xff] }
 0x42f   : > { %v10496_v41 = vpack.c.bf16 %v10493_v57, %v4536_v46  ;;  %v4252_v60 = vadd.f32 %v10327_v52, %v4213_v35 }
 0x430   : > { %v3876_v28 = vpop.f32.mrb[172].mxu1 }
 0x431   : > { %v3937_v42 = vadd.f32 %v3876_v28, %v10241_v50  ;;  %v3878_v11 = vpop.f32.mrb[173].mxu1 }
 0x432   : > { %v3879_v49 = vpop.f32.mrb[174].mxu1  ;;  %v4303_v9 = vld [vmem:[#allocation3 + $0x40] ss:$2 sm:$0xff]  ;;  %v4319_v19 = vld [vmem:[#allocation3 + $0x41] ss:$2 sm:$0xff] }
 0x433   : > { %v4214_v56 = vadd.f32 %v10261_v24, %v3937_v42  ;;  %v3938_v54 = vadd.f32 %v3879_v49, %v10244_v33  ;;  %v3881_v27 = vpop.f32.mrb[175].mxu1  ;;  %v4330_v30 = vmax.f32 %v4303_v9, %v4319_v19 }
 0x435   : > { %v4253_v53 = vadd.f32 %v10327_v52, %v4214_v56  ;;  %v4215_v46 = vadd.f32 %v10264_v39, %v3938_v54  ;;  %v4507_v7 = vrot.slane %v4330_v30, 2  ;;  %4439 = vrot.lane.b32.xlu0 %v4330_v30, %s8476_s22  ;;  %v4370_v50 = vrot.slane %v4330_v30, 6 }
 0x436   : > { %v4395_v33 = vrot.slane %v4330_v30, 7  ;;  %v4467_v3 = vrot.slane %v4330_v30, 1 }
 0x437   : > { %v4273_v8 = vmax.f32 %v4251_v22, %v4253_v53  ;;  %v4254_v29 = vadd.f32 %v10327_v52, %v4215_v46  ;;  %4523 = vst.msk [vmem:[#allocation6 + $0x68] sm:$0x3f] %vm2707_vm4, %v4507_v7 }
 0x438   : > { %v3884_v24 = vpop.f32.mrb[176].mxu1  ;;  %4387 = vst.msk [vmem:[#allocation6 + $0x60] sm:$0xfc] %vm2106_vm6, %v4370_v50 }
 0x439   : > { %4289 = vst.msk [vmem:[#allocation3 + $0x50] sm:$0xff] %vm1688_vm3, %v4273_v8  ;;  %v4274_v6 = vmax.f32 %v4252_v60, %v4254_v29  ;;  %v3939_v39 = vadd.f32 %v3884_v24, %v10253_v48  ;;  %v3886_v1 = vpop.f32.mrb[177].mxu1  ;;  %4407 = vrot.lane.b32.xlu0 %v4395_v33, %s8477_s29 }
 0x43a   : > { %v3887_v32 = vpop.f32.mrb[178].mxu1 }
 0x43b   : > { %4290 = vst.msk [vmem:[#allocation3 + $0x58] sm:$0xff] %vm1688_vm3, %v4274_v6  ;;  %v4216_v18 = vadd.f32 %v10274_v44, %v3939_v39  ;;  %v3940_v5 = vadd.f32 %v3887_v32, %v11268_v15  ;;  %v3889_v10 = vpop.f32.mrb[179].mxu1 }
 0x43d   : > { %v4217_v14 = vadd.f32 %v10277_v51, %v3940_v5  ;;  %4479 = vrot.lane.b32.xlu0 %v4467_v3, %s8478_s13  ;;  %v4255_v26 = vadd.f32 %v10327_v52, %v4216_v18 }
 0x43f   : > { %v4256_v28 = vadd.f32 %v10327_v52, %v4217_v14 }
 0x440   : > { %v3892_v12 = vpop.f32.mrb[180].mxu1 }
 0x441   : > { %v3941_v31 = vadd.f32 %v3892_v12, %v10269_v63  ;;  %v3894_v48 = vpop.f32.mrb[181].mxu1 }
 0x442   : > { %v3895_v25 = vpop.f32.mrb[182].mxu1  ;;  %v4305_v2 = vld [vmem:[#allocation3 + $0x50] ss:$2 sm:$0xff]  ;;  %v4321_v20 = vld [vmem:[#allocation3 + $0x51] ss:$2 sm:$0xff] }
 0x443   : > { %v4218_v43 = vadd.f32 %v10290_v34, %v3941_v31  ;;  %v3942_v36 = vadd.f32 %v3895_v25, %v10272_v55  ;;  %v3897_v44 = vpop.f32.mrb[183].mxu1  ;;  %v4331_v13 = vmax.f32 %v4305_v2, %v4321_v20 }
 0x445   : > { %v4257_v62 = vadd.f32 %v10327_v52, %v4218_v43  ;;  %v4219_v51 = vadd.f32 %v10293_v59, %v3942_v36  ;;  %v4508_v35 = vrot.slane %v4331_v13, 2  ;;  %4441 = vrot.lane.b32.xlu1 %v4331_v13, %s8476_s22  ;;  %v4371_v63 = vrot.slane %v4331_v13, 6  ;;  %v8306_v36 = vld [vmem:[%s11199_s5] sm:$0xff]  }
 0x446   : > { %v4396_v55 = vrot.slane %v4331_v13, 7  ;;  %v4468_v30 = vrot.slane %v4331_v13, 1 }
 0x447   : > { %v4275_v42 = vmax.f32 %v4255_v26, %v4257_v62  ;;  %v4258_v11 = vadd.f32 %v10327_v52, %v4219_v51  ;;  %4524 = vst.msk [vmem:[#allocation6 + $0x78] sm:$0x3f] %vm2707_vm4, %v4508_v35  ;;  %v8307_v26 = vld [vmem:[%s11199_s5 + $0x8] sm:$0xff]   ;;  %v8308_v51 = vld [vmem:[%s11199_s5 + $0x10] sm:$0xff]   ;;  %v8309_v35 = vld [vmem:[%s11199_s5 + $0x18] sm:$0xff]  }
 0x448   : > { %v3900_v34 = vpop.f32.mrb[184].mxu1  ;;  %4388 = vst.msk [vmem:[#allocation6 + $0x70] sm:$0xfc] %vm2106_vm6, %v4371_v63  ;;  %v8310_v63 = vld [vmem:[%s11199_s5 + $0x20] sm:$0xff]  }
 0x449   : > { %4291 = vst.msk [vmem:[#allocation3 + $0x60] sm:$0xff] %vm1688_vm3, %v4275_v42  ;;  %v4276_v49 = vmax.f32 %v4256_v28, %v4258_v11  ;;  %v3943_v59 = vadd.f32 %v3900_v34, %v10284_v61  ;;  %v3902_v9 = vpop.f32.mrb[185].mxu1  ;;  %4409 = vrot.lane.b32.xlu1 %v4396_v55, %s8477_s29  ;;  %v8311_v55 = vld [vmem:[%s11199_s5 + $0x28] sm:$0xff]  }
 0x44a   : > { %v3903_v19 = vpop.f32.mrb[186].mxu1  ;;  %v8313_v9 = vld [vmem:[%s11199_s5 + $0x38] sm:$0xff]  }
 0x44b   : > { %4292 = vst.msk [vmem:[#allocation3 + $0x68] sm:$0xff] %vm1688_vm3, %v4276_v49  ;;  %v3944_v56 = vadd.f32 %v3903_v19, %v10287_v16  ;;  %v4220_v54 = vadd.f32 %v10302_v0, %v3943_v59  ;;  %v3905_v27 = vpop.f32.mrb[187].mxu1  ;;  %v8312_v49 = vld [vmem:[%s11199_s5 + $0x30] sm:$0xff]   ;;  %v8314_v19 = vld [vmem:[%s11199_s5 + $0x40] sm:$0xff]  }
 0x44d   : > { %v4221_v22 = vadd.f32 %v10308_v58, %v3944_v56  ;;  %4481 = vrot.lane.b32.xlu1 %v4468_v30, %s8478_s13  ;;  %v4259_v0 = vadd.f32 %v10327_v52, %v4220_v54  ;;  %v10612_v56 = vld [vmem:[#allocation6 + $0x68] sm:$0xff] }
 0x44f   : > { %v4260_v39 = vadd.f32 %v10327_v52, %v4221_v22  ;;  %v7608_v22 = vpack.c.bf16 %v10612_v56, %v10493_v57 }
 0x450   : > { %v3908_v53 = vpop.f32.mrb[188].mxu1 }
 0x451   : > { %v3945_v46 = vadd.f32 %v3908_v53, %v10297_v4  ;;  %v3910_v61 = vpop.f32.mrb[189].mxu1  ;;  %v8315_v53 = vld [vmem:[%s11199_s5 + $0x48] sm:$0xff]  }
 0x452   : > { %v3911_v7 = vpop.f32.mrb[190].mxu1  ;;  %v4307_v50 = vld [vmem:[#allocation3 + $0x60] ss:$2 sm:$0xff]  ;;  %v4323_v60 = vld [vmem:[#allocation3 + $0x61] ss:$2 sm:$0xff] }
 0x453   : > { %v3946_v8 = vadd.f32 %v3911_v7, %v10300_v40  ;;  %v4222_v29 = vadd.f32 %v10320_v47, %v3945_v46  ;;  %v4332_v16 = vmax.f32 %v4307_v50, %v4323_v60  ;;  %v3913_v33 = vpop.f32.mrb[191].mxu1 }
 0x454   : > { %v4542_v33 = vld [vmem:[#allocation6 + $0x78] sm:$0xff] }
 0x455   : > { %v4261_v24 = vadd.f32 %v10327_v52, %v4222_v29  ;;  %v4223_v58 = vadd.f32 %v10329_v45, %v3946_v8  ;;  %v4509_v6 = vrot.slane %v4332_v16, 2  ;;  %4443 = vrot.lane.b32.xlu0 %v4332_v16, %s8476_s22  ;;  %v4372_v4 = vrot.slane %v4332_v16, 6 }
 0x456   : > { %v4397_v40 = vrot.slane %v4332_v16, 7  ;;  %v4469_v45 = vrot.slane %v4332_v16, 1 }
 0x457   : > { %v4277_v1 = vmax.f32 %v4259_v0, %v4261_v24  ;;  %v4262_v32 = vadd.f32 %v10327_v52, %v4223_v58  ;;  %4525 = vst.msk [vmem:[#allocation6 + $0x88] sm:$0x3f] %vm2707_vm4, %v4509_v6 }
 0x458   : > { %4389 = vst.msk [vmem:[#allocation6 + $0x80] sm:$0xfc] %vm2106_vm6, %v4372_v4 }
 0x459   : > { %4293 = vst.msk [vmem:[#allocation3 + $0x70] sm:$0xff] %vm1688_vm3, %v4277_v1  ;;  %v4278_v47 = vmax.f32 %v4260_v39, %v4262_v32  ;;  %4411 = vrot.lane.b32.xlu0 %v4397_v40, %s8477_s29  ;;  %v4528_v1 = vld [vmem:[#allocation6 + $0x8] sm:$0xff] }
 0x45a   : > { %v10645_v32 = vld [vmem:[#allocation6 + $0xa8] sm:$0xff] }
 0x45b   : > { %4294 = vst.msk [vmem:[#allocation3 + $0x78] sm:$0xff] %vm1688_vm3, %v4278_v47 }
 0x45d   : > { %4483 = vrot.lane.b32.xlu0 %v4469_v45, %s8478_s13  ;;  %v7612_v45 = vpack.c.bf16 %v10394_v21, %v4528_v1  ;;  %v10660_v21 = vpack.c.bf16 %v10459_v23, %v10459_v23  ;;  %v8341_v1 = vld [vmem:[%s11201_s7 + $0x10] sm:$0xff]  }
 0x45e   : > { %v10559_v25 = vld [vmem:[#allocation6 + $0x88] sm:$0xff] }
 0x45f   : > { %v7610_v0 = vpack.c.bf16 %v10559_v25, %v4542_v33 }
 0x462   : > { %v4309_v18 = vld [vmem:[#allocation3 + $0x70] ss:$2 sm:$0xff]  ;;  %v4325_v15 = vld [vmem:[#allocation3 + $0x71] ss:$2 sm:$0xff] }
 0x463   : > { %v4333_v5 = vmax.f32 %v4309_v18, %v4325_v15 }
 0x465   : > { %v4510_v10 = vrot.slane %v4333_v5, 2  ;;  %4445 = vrot.lane.b32.xlu0 %v4333_v5, %s8476_s22  ;;  %v4398_v52 = vrot.slane %v4333_v5, 7  ;;  %v4373_v3 = vrot.slane %v4333_v5, 6  ;;  %v4470_v12 = vrot.slane %v4333_v5, 1  ;;  %s377_s22 = sand.u32 1, %s8462_s18  }
 0x466   : > { %s378_s14 = scalar_lea.vmem [#allocation7], %s377_s22  ;;  %s6803_s30 = scalar_lea.sflag [#allocation8], %s377_s22 }
 0x467   : > { %4526 = vst.msk [vmem:[#allocation6 + $0x98] sm:$0x3f] %vm2707_vm4, %v4510_v10  ;;  %4413 = vrot.lane.b32.xlu1 %v4398_v52, %s8477_s29  ;;  %v4432_v31 = vpop.permute.xlu1 %4431  ;;  %s6815_s15 = sshll.u32 %s378_s14, 4  ;;  %s8480_s29 = smov [#allocation7]   ;;  %s11154_s15 = int_to_ptr.vmem [resolvable:$true] %s6815_s15 }
 0x468   : > { %4390 = vst.msk [vmem:[#allocation6 + $0x90] sm:$0xfc] %vm2106_vm6, %v4373_v3  ;;  %v8316_v3 = vld [vmem:[%s11199_s5 + $0xa0] sm:$0xff]   ;;  %s8408_s21 = scalar_lea.vmem %s11154_s15, 16 }
 0x469   : > { %v4400_v14 = vpop.permute.xlu0 %4399  ;;  %p8409_p11 = scmp.ne.s32.totalorder %s11154_s15, %s8408_s21 }
 0x46a   : > { %4423 = vst.msk [vmem:[#allocation6 + $0x20] sm:$0xfe] %vm2284_vm9, %v4400_v14  ;;  %v8317_v14 = vld [vmem:[%s11199_s5 + $0xa8] sm:$0xff]  }
 0x46b   : > { %4455 = vst.msk [vmem:[#allocation6 + $0x20] sm:$0xff] %vm2414_vm10, %v4432_v31  ;;  %4485 = vrot.lane.b32.xlu1 %v4470_v12, %s8478_s13  ;;  %p8410_p12 = pnand %p8409_p11, %p8579_p5  ;;  %s8412_s13 = sshll.u32 %s8480_s29, 4  ;;  %s8413_s13 = int_to_ptr.vmem [resolvable:$false] %s8412_s13 }
 0x46c   : > { %s8414_s16 = scalar_lea.vmem %s8413_s13, 32  ;;  %p8415_p0 = scmp.lt.s32.totalorder %s11154_s15, %s8413_s13 }
 0x46d   : > { %v4472_v48 = vpop.permute.xlu0 %4471  ;;  %p8411_p13 = pneg %p8410_p12  ;;  %p8416_p1 = scmp.lt.s32.totalorder %s8414_s16, %s8408_s21 }
 0x46e   : > { %4495 = vst.msk [vmem:[#allocation6 + $0x20] sm:$0x7f] %vm2594_vm12, %v4472_v48  ;;  %v10561_v2 = vld [vmem:[#allocation6 + $0x98] sm:$0xff]  ;;  %v8318_v48 = vld [vmem:[%s11199_s5 + $0xb0] sm:$0xff]  }
 0x46f   : > { %v10565_v20 = vpack.c.bf16 %v10561_v2, %v10559_v25  ;;  %v7622_v5 = vpack.c.bf16 %v10645_v32, %v10561_v2  ;;  %v8319_v25 = vld [vmem:[%s11199_s5 + $0xb8] sm:$0xff]   ;;  %v8320_v2 = vld [vmem:[%s11199_s5 + $0xc0] sm:$0xff]   ;;  %p8417_p2 = por %p8416_p1, %p8415_p0 }
 0x471   : > { %p8418_p3 = pnand %p8417_p2, %p8411_p13 }
 0x475   : > { %v4531_v43 = vld [vmem:[#allocation6 + $0x20] sm:$0xff] }
 0x476   : > { %v7603_v44 = vpack.c.bf16 %v4531_v43, %v10459_v23 }
 0x477   : > { %v4434_v13 = vpop.permute.xlu1 %4433 }
 0x478   : > { %4769 = vmatmul.mubr.bf16.vlgmr.msra.gmra.mrb[192].mxu1 %v7603_v44  ;;  %v8321_v44 = vld [vmem:[%s11199_s5 + $0xc8] sm:$0xff]  }
 0x479   : > { %7260 = vmatprep.mubr.msk.bf16.mxu1 %vm1688_vm3, %v10470_v17  ;;  %4886 = vmatpush1.bf16.msra.mxu1 %v8306_v36  ;;  %v10690_v36 = vpack.c.bf16 %v4542_v33, %v10612_v56 }
 0x47a   : > { %4887 = vmatprep.subr.bf16.mxu1 %v11256_v38 }
 0x47b   : > { %v4402_v62 = vpop.permute.xlu1 %4401 }
 0x47c   : > { %4424 = vst.msk [vmem:[#allocation6 + $0x30] sm:$0xfe] %vm2284_vm9, %v4402_v62  ;;  %v8323_v62 = vld [vmem:[%s11199_s5 + $0xd8] sm:$0xff]  }
 0x47d   : > { %4456 = vst.msk [vmem:[#allocation6 + $0x30] sm:$0xff] %vm2414_vm10, %v4434_v13  ;;  %4888 = vmatpush1.bf16.msra.mxu1 %v8307_v26  ;;  %v8322_v13 = vld [vmem:[%s11199_s5 + $0xd0] sm:$0xff]  }
 0x47e   : > { %4889 = vmatprep.subr.bf16.mxu1 %v11256_v38 }
 0x47f   : > { %v4474_v17 = vpop.permute.xlu1 %4473 }
 0x480   : > { %4496 = vst.msk [vmem:[#allocation6 + $0x30] sm:$0x7f] %vm2594_vm12, %v4474_v17  ;;  %v8325_v17 = vld [vmem:[%s11199_s5 + $0xe8] sm:$0xff]  }
 0x481   : > { %4890 = vmatpush1.bf16.msra.mxu1 %v8308_v51  ;;  %v8324_v51 = vld [vmem:[%s11199_s5 + $0xe0] sm:$0xff]  }
 0x482   : > { %4891 = vmatprep.subr.bf16.mxu1 %v11256_v38 }
 0x485   : > { %4892 = vmatpush1.bf16.msra.mxu1 %v8309_v35  ;;  %v8327_v35 = vld [vmem:[%s11199_s5 + $0x148] sm:$0xff]  }
 0x486   : > { %4893 = vmatprep.subr.bf16.mxu1 %v11256_v38 }
 0x487   : > { %v4436_v28 = vpop.permute.xlu0 %4435  ;;  %v4533_v42 = vld [vmem:[#allocation6 + $0x30] sm:$0xff] }
 0x488   : > { %v10592_v11 = vpack.c.bf16 %v4533_v42, %v4531_v43 }
 0x489   : > { %4894 = vmatpush1.bf16.msra.mxu1 %v8310_v63  ;;  %v8328_v63 = vld [vmem:[%s11199_s5 + $0x150] sm:$0xff]  }
 0x48a   : > { %4895 = vmatprep.subr.bf16.mxu1 %v11256_v38 }
 0x48b   : > { %v4404_v34 = vpop.permute.xlu0 %4403 }
 0x48c   : > { %4425 = vst.msk [vmem:[#allocation6 + $0x40] sm:$0xfe] %vm2284_vm9, %v4404_v34 }
 0x48d   : > { %4457 = vst.msk [vmem:[#allocation6 + $0x40] sm:$0xff] %vm2414_vm10, %v4436_v28  ;;  %4896 = vmatpush1.bf16.msra.mxu1 %v8311_v55  ;;  %v8329_v28 = vld [vmem:[%s11199_s5 + $0x158] sm:$0xff]   ;;  %v8332_v55 = vld [vmem:[%s11199_s5 + $0x170] sm:$0xff]  }
 0x48e   : > { %4897 = vmatprep.subr.bf16.mxu1 %v11256_v38 }
 0x48f   : > { %v4476_v59 = vpop.permute.xlu0 %4475 }
 0x490   : > { %4497 = vst.msk [vmem:[#allocation6 + $0x40] sm:$0x7f] %vm2594_vm12, %v4476_v59  ;;  %v8334_v59 = vld [vmem:[%s11199_s5 + $0x180] sm:$0xff]  }
 0x491   : > { %4898 = vmatpush1.bf16.msra.mxu1 %v8312_v49  ;;  %v8333_v49 = vld [vmem:[%s11199_s5 + $0x178] sm:$0xff]  }
 0x492   : > { %4899 = vmatprep.subr.bf16.mxu1 %v11256_v38 }
 0x495   : > { %4900 = vmatpush1.bf16.msra.mxu1 %v8313_v9  ;;  %v8335_v9 = vld [vmem:[%s11199_s5 + $0x188] sm:$0xff]  }
 0x496   : > { %4901 = vmatprep.subr.bf16.mxu1 %v11256_v38 }
 0x497   : > { %v4438_v54 = vpop.permute.xlu1 %4437  ;;  %v10615_v27 = vld [vmem:[#allocation6 + $0x40] sm:$0xff] }
 0x498   : > { %v7605_v30 = vpack.c.bf16 %v10615_v27, %v4533_v42  ;;  %v8330_v42 = vld [vmem:[%s11199_s5 + $0x160] sm:$0xff]  }
 0x499   : > { %4902 = vmatpush1.bf16.msra.mxu1 %v8314_v19 }
 0x49a   : > { %4777 = vmatmul.mubr.bf16.gmra.mrb[196].mxu1 %v7605_v30  ;;  %5238 = vmatmul.mubr.bf16.vlgmr.msra.gmra.mrb[0].mxu0 %v7605_v30 }
 0x49b   : > { %v4406_v46 = vpop.permute.xlu1 %4405  ;;  %7261 = vmatprep.mubr.msk.bf16.mxu1 %vm1688_vm3, %v7608_v22  ;;  %7354 = vmatprep.mubr.msk.bf16.mxu0 %vm1688_vm3, %v7608_v22 }
 0x49c   : > { %4426 = vst.msk [vmem:[#allocation6 + $0x50] sm:$0xfe] %vm2284_vm9, %v4406_v46  ;;  %4903 = vmatprep.subr.bf16.mxu1 %v11256_v38 }
 0x49d   : > { %4458 = vst.msk [vmem:[#allocation6 + $0x50] sm:$0xff] %vm2414_vm10, %v4438_v54  ;;  %4904 = vmatpush1.bf16.msra.mxu1 %v8315_v53 }
 0x49e   : > { %5041 = vmatprep.subr.bf16.mxu1 %v11256_v38 }
 0x49f   : > { %v4478_v57 = vpop.permute.xlu1 %4477 }
 0x4a0   : > { %4498 = vst.msk [vmem:[#allocation6 + $0x50] sm:$0x7f] %vm2594_vm12, %v4478_v57 }
 0x4a7   : > { %v4440_v61 = vpop.permute.xlu0 %4439  ;;  %v4537_v8 = vld [vmem:[#allocation6 + $0x50] sm:$0xff] }
 0x4a8   : > { %v7615_v43 = vpack.c.bf16 %v4537_v8, %v10615_v27 }
 0x4ab   : > { %v4408_v7 = vpop.permute.xlu0 %4407 }
 0x4ac   : > { %4427 = vst.msk [vmem:[#allocation6 + $0x60] sm:$0xfe] %vm2284_vm9, %v4408_v7 }
 0x4ad   : > { %4459 = vst.msk [vmem:[#allocation6 + $0x60] sm:$0xff] %vm2414_vm10, %v4440_v61 }
 0x4af   : > { %v4480_v50 = vpop.permute.xlu0 %4479 }
 0x4b0   : > { %4499 = vst.msk [vmem:[#allocation6 + $0x60] sm:$0x7f] %vm2594_vm12, %v4480_v50 }
 0x4b7   : > { %v4442_v60 = vpop.permute.xlu1 %4441  ;;  %v10633_v29 = vld [vmem:[#allocation6 + $0x60] sm:$0xff] }
 0x4b8   : > { %v7607_v16 = vpack.c.bf16 %v10633_v29, %v4537_v8 }
 0x4ba   : > { %4785 = vmatmul.mubr.bf16.gmra.mrb[200].mxu1 %v7607_v16  ;;  %5246 = vmatmul.mubr.bf16.gmra.mrb[4].mxu0 %v7607_v16 }
 0x4bb   : > { %v4410_v24 = vpop.permute.xlu1 %4409  ;;  %7262 = vmatprep.mubr.msk.bf16.mxu1 %vm1688_vm3, %v7610_v0  ;;  %7355 = vmatprep.mubr.msk.bf16.mxu0 %vm1688_vm3, %v7610_v0 }
 0x4bc   : > { %4428 = vst.msk [vmem:[#allocation6 + $0x70] sm:$0xfe] %vm2284_vm9, %v4410_v24 }
 0x4bd   : > { %4460 = vst.msk [vmem:[#allocation6 + $0x70] sm:$0xff] %vm2414_vm10, %v4442_v60 }
 0x4bf   : > { %v4482_v58 = vpop.permute.xlu1 %4481 }
 0x4c0   : > { %4500 = vst.msk [vmem:[#allocation6 + $0x70] sm:$0x7f] %vm2594_vm12, %v4482_v58  ;;  %v8336_v58 = vld [vmem:[%s11201_s7 + $0x20] sm:$0xff]  }
 0x4c1   : > { %7918 = vmatpush3.bf16.msra.mxu0 %v8336_v58 }
 0x4c2   : > { %7919 = vmatprep.subr.bf16.mxu0 %v10459_v23 }
 0x4c7   : > { %v4444_v6 = vpop.permute.xlu0 %4443  ;;  %v4541_v40 = vld [vmem:[#allocation6 + $0x70] sm:$0xff] }
 0x4c8   : > { %v7617_v26 = vpack.c.bf16 %v4541_v40, %v10633_v29 }
 0x4cb   : > { %v4412_v4 = vpop.permute.xlu0 %4411 }
 0x4cc   : > { %4429 = vst.msk [vmem:[#allocation6 + $0x80] sm:$0xfe] %vm2284_vm9, %v4412_v4  ;;  %v8338_v4 = vld [vmem:[%s11201_s7 + $0x28] sm:$0xff]  }
 0x4cd   : > { %4461 = vst.msk [vmem:[#allocation6 + $0x80] sm:$0xff] %vm2414_vm10, %v4444_v6  ;;  %v8337_v6 = vld [vmem:[%s11201_s7] sm:$0xff]   ;;  %7920 = vmatpush3.bf16.msra.mxu0 %v8338_v4 }
 0x4ce   : > { %7921 = vmatprep.subr.bf16.mxu0 %v10459_v23 }
 0x4cf   : > { %v4484_v39 = vpop.permute.xlu0 %4483 }
 0x4d0   : > { %4501 = vst.msk [vmem:[#allocation6 + $0x80] sm:$0x7f] %vm2594_vm12, %v4484_v39  ;;  %v8339_v39 = vld [vmem:[%s11201_s7 + $0x8] sm:$0xff]  }
 0x4d7   : > { %v10647_v47 = vld [vmem:[#allocation6 + $0x80] sm:$0xff]  ;;  %v4446_v10 = vpop.permute.xlu0 %4445 }
 0x4d8   : > { %v7609_v18 = vpack.c.bf16 %v10647_v47, %v4541_v40 }
 0x4d9   : > { %v4414_v15 = vpop.permute.xlu1 %4413 }
 0x4da   : > { %4430 = vst.msk [vmem:[#allocation6 + $0x90] sm:$0xfe] %vm2284_vm9, %v4414_v15  ;;  %4793 = vmatmul.mubr.bf16.gmra.mrb[204].mxu1 %v7609_v18  ;;  %5254 = vmatmul.mubr.bf16.gmra.mrb[8].mxu0 %v7609_v18 }
 0x4db   : > { %4462 = vst.msk [vmem:[#allocation6 + $0x90] sm:$0xff] %vm2414_vm10, %v4446_v10  ;;  %7356 = vmatprep.mubr.msk.bf16.mxu0 %vm1688_vm3, %v7622_v5  ;;  %7281 = vmatprep.mubr.msk.bf16.mxu1 %vm1688_vm3, %v7612_v45  ;;  %v8343_v45 = vld [vmem:[%s11201_s7 + $0x18] sm:$0xff]  }
 0x4dd   : > { %v4486_v52 = vpop.permute.xlu1 %4485 }
 0x4de   : > { %4502 = vst.msk [vmem:[#allocation6 + $0x90] sm:$0x7f] %vm2594_vm12, %v4486_v52  ;;  %v8342_v52 = vld [vmem:[%s11201_s7 + $0x38] sm:$0xff]  }
 0x4e2   : > { %4918 = vmatmul.mubr.bf16.vlgmr.msra.gmra.mrb[208].mxu1 %v10660_v21 }
 0x4e3   : > { %5042 = vmatpush1.bf16.msra.mxu1 %v8316_v3  ;;  %7282 = vmatprep.mubr.msk.bf16.mxu1 %vm1688_vm3, %v10438_v37 }
 0x4e4   : > { %5043 = vmatprep.subr.bf16.mxu1 %v11256_v38 }
 0x4e5   : > { %v4545_v12 = vld [vmem:[#allocation6 + $0x90] sm:$0xff] }
 0x4e6   : > { %v7621_v31 = vpack.c.bf16 %v10459_v23, %v4545_v12  ;;  %v7619_v34 = vpack.c.bf16 %v4545_v12, %v10647_v47 }
 0x4e7   : > { %5044 = vmatpush1.bf16.msra.mxu1 %v8317_v14 }
 0x4e8   : > { %5262 = vmatmul.mubr.bf16.gmra.mrb[12].mxu0 %v7621_v31  ;;  %5045 = vmatprep.subr.bf16.mxu1 %v11256_v38 }
 0x4e9   : > { %7925 = vmatprep.mubr.msk.bf16.mxu0 %vm8479_vm14, %v10459_v23 }
 0x4ea   : > { %4926 = vmatmul.mubr.bf16.gmra.mrb[212].mxu1 %v10592_v11 }
 0x4eb   : > { %5046 = vmatpush1.bf16.msra.mxu1 %v8318_v48  ;;  %7283 = vmatprep.mubr.msk.bf16.mxu1 %vm1688_vm3, %v10496_v41 }
 0x4ec   : > { %5047 = vmatprep.subr.bf16.mxu1 %v11256_v38 }
 0x4ef   : > { %5048 = vmatpush1.bf16.msra.mxu1 %v8319_v25 }
 0x4f0   : > { %5049 = vmatprep.subr.bf16.mxu1 %v11256_v38 }
 0x4f2   : > { %4934 = vmatmul.mubr.bf16.gmra.mrb[216].mxu1 %v7615_v43 }
 0x4f3   : > { %5050 = vmatpush1.bf16.msra.mxu1 %v8320_v2  ;;  %7284 = vmatprep.mubr.msk.bf16.mxu1 %vm1688_vm3, %v10690_v36 }
 0x4f4   : > { %5051 = vmatprep.subr.bf16.mxu1 %v11256_v38 }
 0x4f7   : > { %5052 = vmatpush1.bf16.msra.mxu1 %v8321_v44 }
 0x4f8   : > { %5053 = vmatprep.subr.bf16.mxu1 %v11256_v38 }
 0x4fa   : > { %4942 = vmatmul.mubr.bf16.gmra.mrb[220].mxu1 %v7617_v26 }
 0x4fb   : > { %5054 = vmatpush1.bf16.msra.mxu1 %v8322_v13  ;;  %7317 = vmatprep.mubr.msk.bf16.mxu1 %vm1688_vm3, %v10438_v37  ;;  %v8326_v37 = vld [vmem:[%s11199_s5 + $0x140] sm:$0xff]  }
 0x4fc   : > { %5055 = vmatprep.subr.bf16.mxu1 %v11256_v38 }
 0x4ff   : > { %5056 = vmatpush1.bf16.msra.mxu1 %v8323_v62 }
 0x500   : > { %5057 = vmatprep.subr.bf16.mxu1 %v11256_v38 }
 0x503   : > { %5058 = vmatpush1.bf16.msra.mxu1 %v8324_v51 }
 0x504   : > { %5059 = vmatprep.subr.bf16.mxu1 %v11256_v38 }
 0x507   : > { %5060 = vmatpush1.bf16.msra.mxu1 %v8325_v17 }
 0x508   : > { %5369 = vmatprep.subr.bf16.mxu1 %v11256_v38 }
 0x50a   : > { %5074 = vmatmul.mubr.bf16.vlgmr.msra.gmra.mrb[224].mxu1 %v10592_v11  ;;  %v8331_v11 = vld [vmem:[%s11199_s5 + $0x168] sm:$0xff]  }
 0x50b   : > { %7318 = vmatprep.mubr.msk.bf16.mxu1 %vm1688_vm3, %v10496_v41  ;;  %5370 = vmatpush1.bf16.msra.mxu1 %v8326_v37 }
 0x50c   : > { %5371 = vmatprep.subr.bf16.mxu1 %v11256_v38 }
 0x50f   : > { %5372 = vmatpush1.bf16.msra.mxu1 %v8327_v35 }
 0x510   : > { %5373 = vmatprep.subr.bf16.mxu1 %v11256_v38 }
 0x512   : > { %5082 = vmatmul.mubr.bf16.gmra.mrb[228].mxu1 %v7615_v43 }
 0x513   : > { %7319 = vmatprep.mubr.msk.bf16.mxu1 %vm1688_vm3, %v10690_v36  ;;  %5374 = vmatpush1.bf16.msra.mxu1 %v8328_v63 }
 0x514   : > { %5375 = vmatprep.subr.bf16.mxu1 %v11256_v38 }
 0x517   : > { %5376 = vmatpush1.bf16.msra.mxu1 %v8329_v28 }
 0x518   : > { %5377 = vmatprep.subr.bf16.mxu1 %v11256_v38 }
 0x51a   : > { %5090 = vmatmul.mubr.bf16.gmra.mrb[232].mxu1 %v7617_v26 }
 0x51b   : > { %7320 = vmatprep.mubr.msk.bf16.mxu1 %vm1688_vm3, %v10565_v20  ;;  %5378 = vmatpush1.bf16.msra.mxu1 %v8330_v42 }
 0x51c   : > { %5379 = vmatprep.subr.bf16.mxu1 %v11256_v38 }
 0x51f   : > { %5380 = vmatpush1.bf16.msra.mxu1 %v8331_v11 }
 0x520   : > { %5381 = vmatprep.subr.bf16.mxu1 %v11256_v38 }
 0x522   : > { %5098 = vmatmul.mubr.bf16.gmra.mrb[236].mxu1 %v7619_v34 }
 0x523   : > { %5382 = vmatpush1.bf16.msra.mxu1 %v8332_v55  ;;  %7389 = vmatprep.mubr.msk.bf16.mxu1 %vm1688_vm3, %v10496_v41  ;;  %v4550_v41 = vld [vmem:[#allocation6 + $0xb8] sm:$0xff] }
 0x524   : > { %5383 = vmatprep.subr.bf16.mxu1 %v11256_v38  ;;  %v7624_v19 = vpack.c.bf16 %v4550_v41, %v10645_v32  ;;  %v8340_v32 = vld [vmem:[%s11201_s7 + $0x30] sm:$0xff]  }
 0x525   : > { %7922 = vmatpush3.bf16.msra.mxu0 %v8340_v32 }
 0x526   : > { %7923 = vmatprep.subr.bf16.mxu0 %v10459_v23 }
 0x527   : > { %5384 = vmatpush1.bf16.msra.mxu1 %v8333_v49 }
 0x528   : > { %5385 = vmatprep.subr.bf16.mxu1 %v11256_v38 }
 0x529   : > { %7924 = vmatpush3.bf16.msra.mxu0 %v8342_v52 }
 0x52a   : > { %7941 = vmatprep.subr.bf16.mxu0 %v10459_v23 }
 0x52b   : > { %5386 = vmatpush1.bf16.msra.mxu1 %v8334_v59 }
 0x52c   : > { %5387 = vmatprep.subr.bf16.mxu1 %v11256_v38 }
 0x52f   : > { %5388 = vmatpush1.bf16.msra.mxu1 %v8335_v9 }
 0x530   : > { %7929 = vmatprep.subr.bf16.mxu1 %v10459_v23 }
 0x532   : > { %5402 = vmatmul.mubr.bf16.vlgmr.msra.gmra.mrb[240].mxu1 %v7615_v43 }
 0x533   : > { %7390 = vmatprep.mubr.msk.bf16.mxu1 %vm1688_vm3, %v10690_v36  ;;  %7930 = vmatpush3.bf16.msra.mxu1 %v8337_v6 }
 0x534   : > { %7931 = vmatprep.subr.bf16.mxu1 %v10459_v23 }
 0x537   : > { %7932 = vmatpush3.bf16.msra.mxu1 %v8339_v39 }
 0x538   : > { %7933 = vmatprep.subr.bf16.mxu1 %v10459_v23 }
 0x53a   : > { %5410 = vmatmul.mubr.bf16.gmra.mrb[244].mxu1 %v7617_v26 }
 0x53b   : > { %7391 = vmatprep.mubr.msk.bf16.mxu1 %vm1688_vm3, %v10565_v20  ;;  %7934 = vmatpush3.bf16.msra.mxu1 %v8341_v1 }
 0x53c   : > { %7935 = vmatprep.subr.bf16.mxu1 %v10459_v23 }
 0x53f   : > { %7936 = vmatpush3.bf16.msra.mxu1 %v8343_v45 }
 0x540   : > { %7953 = vmatprep.subr.bf16.mxu1 %v10459_v23 }
 0x542   : > { %5418 = vmatmul.mubr.bf16.gmra.mrb[248].mxu1 %v7619_v34 }
 0x543   : > { %7392 = vmatprep.mubr.msk.bf16.mxu1 %vm1688_vm3, %v7624_v19 }
 0x54a   : > { %5426 = vmatmul.mubr.bf16.gmra.mrb[252].mxu1 %v10660_v21 }
 0x54b   : > { %v4770_v38 = vpop.f32.mrb[192].mxu1  ;;  %7937 = vmatprep.mubr.msk.bf16.mxu1 %vm8479_vm14, %v10459_v23 }
 0x54c   : > { %v4772_v56 = vpop.f32.mrb[193].mxu1 }
 0x54d   : > { %v4773_v54 = vpop.f32.mrb[194].mxu1 }
 0x54e   : > { %v4775_v27 = vpop.f32.mrb[195].mxu1 }
 0x56d   : > { %v4778_v30 = vpop.f32.mrb[196].mxu1  ;;  %v10775_v22 = vpop.f32.mrb[0].mxu0 }
 0x56e   : > { %v4780_v53 = vpop.f32.mrb[197].mxu1  ;;  %v5241_v46 = vpop.f32.mrb[1].mxu0 }
 0x56f   : > { %v4781_v57 = vpop.f32.mrb[198].mxu1  ;;  %v10777_v61 = vpop.f32.mrb[2].mxu0 }
 0x570   : > { %v4783_v20 = vpop.f32.mrb[199].mxu1  ;;  %v5244_v7 = vpop.f32.mrb[3].mxu0 }
 0x58d   : > { %v4786_v50 = vpop.f32.mrb[200].mxu1  ;;  %v10779_v60 = vpop.f32.mrb[4].mxu0 }
 0x58e   : > { %v4788_v8 = vpop.f32.mrb[201].mxu1  ;;  %v5249_v29 = vpop.f32.mrb[5].mxu0 }
 0x58f   : > { %v4789_v16 = vpop.f32.mrb[202].mxu1  ;;  %v10781_v33 = vpop.f32.mrb[6].mxu0 }
 0x590   : > { %v4791_v0 = vpop.f32.mrb[203].mxu1  ;;  %v5252_v24 = vpop.f32.mrb[7].mxu0 }
 0x5ad   : > { %v4794_v40 = vpop.f32.mrb[204].mxu1  ;;  %v10806_v47 = vpop.f32.mrb[8].mxu0 }
 0x5ae   : > { %v4796_v18 = vpop.f32.mrb[205].mxu1  ;;  %v5257_v15 = vpop.f32.mrb[9].mxu0 }
 0x5af   : > { %v4797_v5 = vpop.f32.mrb[206].mxu1  ;;  %v5258_v10 = vpop.f32.mrb[10].mxu0 }
 0x5b0   : > { %v4799_v21 = vpop.f32.mrb[207].mxu1  ;;  %v5260_v3 = vpop.f32.mrb[11].mxu0 }
 0x5b5   : > { %v4919_v14 = vpop.f32.mrb[208].mxu1 }
 0x5b6   : > { %v4920_v12 = vadd.f32 %v4919_v14, %v4770_v38  ;;  %v4921_v31 = vpop.f32.mrb[209].mxu1 }
 0x5b7   : > { %v4922_v48 = vpop.f32.mrb[210].mxu1 }
 0x5b8   : > { %v4923_v25 = vadd.f32 %v4922_v48, %v4773_v54  ;;  %v4924_v2 = vpop.f32.mrb[211].mxu1 }
 0x5bb   : > { %v5263_v43 = vpop.f32.mrb[12].mxu0 }
 0x5bc   : > { %v5265_v36 = vpop.f32.mrb[13].mxu0 }
 0x5bd   : > { %v4927_v44 = vpop.f32.mrb[212].mxu1  ;;  %v5266_v13 = vpop.f32.mrb[14].mxu0 }
 0x5be   : > { %v4928_v26 = vadd.f32 %v4927_v44, %v4778_v30  ;;  %v4929_v62 = vpop.f32.mrb[213].mxu1  ;;  %v5268_v51 = vpop.f32.mrb[15].mxu0 }
 0x5bf   : > { %v4930_v17 = vpop.f32.mrb[214].mxu1 }
 0x5c0   : > { %v4931_v37 = vadd.f32 %v4930_v17, %v4781_v57  ;;  %v4932_v35 = vpop.f32.mrb[215].mxu1 }
 0x5c5   : > { %v4935_v63 = vpop.f32.mrb[216].mxu1 }
 0x5c6   : > { %v4936_v28 = vadd.f32 %v4935_v63, %v4786_v50  ;;  %v4937_v42 = vpop.f32.mrb[217].mxu1 }
 0x5c7   : > { %v4938_v23 = vpop.f32.mrb[218].mxu1 }
 0x5c8   : > { %v4939_v11 = vadd.f32 %v4938_v23, %v4789_v16  ;;  %v4940_v55 = vpop.f32.mrb[219].mxu1 }
 0x5cd   : > { %v4943_v34 = vpop.f32.mrb[220].mxu1 }
 0x5ce   : > { %v4944_v49 = vadd.f32 %v4943_v34, %v4794_v40  ;;  %v4945_v59 = vpop.f32.mrb[221].mxu1 }
 0x5cf   : > { %v4946_v9 = vpop.f32.mrb[222].mxu1 }
 0x5d0   : > { %v4947_v41 = vadd.f32 %v4946_v9, %v4797_v5  ;;  %v4948_v19 = vpop.f32.mrb[223].mxu1 }
 0x5dd   : > { %v5075_v38 = vpop.f32.mrb[224].mxu1 }
 0x5de   : > { %v5106_v56 = vadd.f32 %v5075_v38, %v4920_v12  ;;  %v5077_v54 = vpop.f32.mrb[225].mxu1  ;;  %v7393_v12 = vld [vmem:[%s11200_s6] ss:$0 sm:$0xff] }
 0x5df   : > { %v5078_v27 = vpop.f32.mrb[226].mxu1 }
 0x5e0   : > { %v5107_v30 = vadd.f32 %v5078_v27, %v4923_v25  ;;  %v5080_v53 = vpop.f32.mrb[227].mxu1  ;;  %v5270_v46 = vadd.f32 %v10775_v22, %v5106_v56 }
 0x5e2   : > { %v5271_v57 = vadd.f32 %v10777_v61, %v5107_v30 }
 0x5e5   : > { %v5083_v20 = vpop.f32.mrb[228].mxu1 }
 0x5e6   : > { %v5108_v7 = vadd.f32 %v5083_v20, %v4928_v26  ;;  %v5085_v50 = vpop.f32.mrb[229].mxu1 }
 0x5e7   : > { %v5086_v8 = vpop.f32.mrb[230].mxu1 }
 0x5e8   : > { %v5109_v29 = vadd.f32 %v5086_v8, %v4931_v37  ;;  %v5088_v16 = vpop.f32.mrb[231].mxu1  ;;  %v5272_v0 = vadd.f32 %v10779_v60, %v5108_v7  ;;  %v8344_v8 = vld [vmem:[%s11201_s7 + $0x60] sm:$0xff]  }
 0x5e9   : > { %v8345_v16 = vld [vmem:[%s11201_s7 + $0x40] sm:$0xff]  }
 0x5ea   : > { %v5273_v24 = vadd.f32 %v10781_v33, %v5109_v29 }
 0x5ed   : > { %v5091_v58 = vpop.f32.mrb[232].mxu1 }
 0x5ee   : > { %v5110_v6 = vadd.f32 %v5091_v58, %v4936_v28  ;;  %v5093_v4 = vpop.f32.mrb[233].mxu1  ;;  %v10849_v58 = vld [vmem:[#allocation5] sm:$0xff] }
 0x5ef   : > { %v5094_v39 = vpop.f32.mrb[234].mxu1  ;;  %v8348_v4 = vld [vmem:[%s11201_s7 + $0x70] sm:$0xff]  }
 0x5f0   : > { %v5111_v1 = vadd.f32 %v5094_v39, %v4939_v11  ;;  %v5096_v32 = vpop.f32.mrb[235].mxu1  ;;  %v5274_v22 = vadd.f32 %v10806_v47, %v5110_v6  ;;  %v8347_v6 = vld [vmem:[%s11201_s7 + $0x48] sm:$0xff]   ;;  %v8349_v39 = vld [vmem:[%s11201_s7 + $0x50] sm:$0xff]  }
 0x5f1   : > { %v8351_v32 = vld [vmem:[%s11201_s7 + $0x58] sm:$0xff]  }
 0x5f2   : > { %v5275_v40 = vadd.f32 %v5258_v10, %v5111_v1  ;;  %v8350_v1 = vld [vmem:[%s11201_s7 + $0x78] sm:$0xff]  }
 0x5f5   : > { %v5099_v61 = vpop.f32.mrb[236].mxu1 }
 0x5f6   : > { %v5112_v45 = vadd.f32 %v5099_v61, %v4944_v49  ;;  %v5101_v18 = vpop.f32.mrb[237].mxu1  ;;  %v8353_v61 = vld [vmem:[%s11201_s7 + $0x80] sm:$0xff]  }
 0x5f7   : > { %v5102_v15 = vpop.f32.mrb[238].mxu1  ;;  %v8354_v18 = vld [vmem:[%s11201_s7 + $0xa8] sm:$0xff]  }
 0x5f8   : > { %v5113_v5 = vadd.f32 %v5102_v15, %v4947_v41  ;;  %v5104_v52 = vpop.f32.mrb[239].mxu1  ;;  %v5276_v21 = vadd.f32 %v5263_v43, %v5112_v45  ;;  %v8355_v15 = vld [vmem:[%s11201_s7 + $0x88] sm:$0xff]  }
 0x5f9   : > { %v8357_v52 = vld [vmem:[%s11201_s7 + $0x90] sm:$0xff]  }
 0x5fa   : > { %v5277_v3 = vadd.f32 %v5266_v13, %v5113_v5  ;;  %v8356_v5 = vld [vmem:[%s11201_s7 + $0xb0] sm:$0xff]  }
 0x605   : > { %v5403_v60 = vpop.f32.mrb[240].mxu1 }
 0x606   : > { %v5434_v14 = vadd.f32 %v5403_v60, %v5270_v46  ;;  %v5405_v33 = vpop.f32.mrb[241].mxu1  ;;  %v8360_v60 = vld [vmem:[%s11201_s7 + $0xe0] sm:$0xff]  }
 0x607   : > { %v5406_v31 = vpop.f32.mrb[242].mxu1  ;;  %v8361_v33 = vld [vmem:[%s11201_s7 + $0xc0] sm:$0xff]  }
 0x608   : > { %v5435_v48 = vadd.f32 %v5406_v31, %v5271_v57  ;;  %v5408_v25 = vpop.f32.mrb[243].mxu1  ;;  %v5449_v47 = vadd.f32 %v7393_v12, %v5434_v14  ;;  %v8362_v31 = vld [vmem:[%s11201_s7 + $0xe8] sm:$0xff]  }
 0x609   : > { %v8364_v25 = vld [vmem:[%s11201_s7 + $0xf0] sm:$0xff]  }
 0x60a   : > { %v5450_v10 = vadd.f32 %v7393_v12, %v5435_v48  ;;  %v8363_v48 = vld [vmem:[%s11201_s7 + $0xc8] sm:$0xff]  }
 0x60c   : > { %v5457_v2 = vmax.f32 %v5449_v47, %v5450_v10  ;;  %v8365_v47 = vld [vmem:[%s11201_s7 + $0xd0] sm:$0xff]   ;;  %v8366_v10 = vld [vmem:[%s11201_s7 + $0xf8] sm:$0xff]  }
 0x60d   : > { %v5411_v36 = vpop.f32.mrb[244].mxu1 }
 0x60e   : > { %5462 = vst.msk [vmem:[#allocation4] sm:$0xff] %vm5461_vm15, %v5457_v2  ;;  %v5436_v44 = vadd.f32 %v5411_v36, %v5272_v0  ;;  %v5413_v43 = vpop.f32.mrb[245].mxu1  ;;  %v8367_v2 = vld [vmem:[%s11201_s7 + $0xd8] sm:$0xff]   ;;  %v8368_v36 = vld [vmem:[%s11201_s7 + $0x120] sm:$0xff]  }
 0x60f   : > { %v5414_v13 = vpop.f32.mrb[246].mxu1  ;;  %v8369_v43 = vld [vmem:[%s11201_s7 + $0x100] sm:$0xff]  }
 0x610   : > { %v5437_v26 = vadd.f32 %v5414_v13, %v5273_v24  ;;  %v5416_v62 = vpop.f32.mrb[247].mxu1  ;;  %v5451_v51 = vadd.f32 %v7393_v12, %v5436_v44  ;;  %v8346_v24 = vld [vmem:[%s11201_s7 + $0x68] sm:$0xff]  }
 0x611   : > { %v8371_v62 = vld [vmem:[%s11201_s7 + $0x108] sm:$0xff]  }
 0x612   : > { %v5452_v17 = vadd.f32 %v7393_v12, %v5437_v26  ;;  %v8370_v26 = vld [vmem:[%s11201_s7 + $0x128] sm:$0xff]  }
 0x614   : > { %v5458_v37 = vmax.f32 %v5451_v51, %v5452_v17  ;;  %v8372_v51 = vld [vmem:[%s11201_s7 + $0x130] sm:$0xff]  }
 0x615   : > { %v5419_v35 = vpop.f32.mrb[248].mxu1  ;;  %v8373_v17 = vld [vmem:[%s11201_s7 + $0x110] sm:$0xff]  }
 0x616   : > { %5463 = vst.msk [vmem:[#allocation4 + $0x8] sm:$0xff] %vm5461_vm15, %v5458_v37  ;;  %v5438_v63 = vadd.f32 %v5419_v35, %v5274_v22  ;;  %v5421_v28 = vpop.f32.mrb[249].mxu1  ;;  %v8352_v22 = vld [vmem:[%s11201_s7 + $0xa0] sm:$0xff]   ;;  %v8374_v37 = vld [vmem:[%s11201_s7 + $0x138] sm:$0xff]  }
 0x617   : > { %v5422_v42 = vpop.f32.mrb[250].mxu1  ;;  %v8375_v35 = vld [vmem:[%s11201_s7 + $0x118] sm:$0xff]  }
 0x618   : > { %v5439_v23 = vadd.f32 %v5422_v42, %v5275_v40  ;;  %v5424_v11 = vpop.f32.mrb[251].mxu1  ;;  %v5453_v55 = vadd.f32 %v7393_v12, %v5438_v63  ;;  %v8376_v63 = vld [vmem:[%s11201_s7 + $0x160] sm:$0xff]  }
 0x619   : > { %v8377_v42 = vld [vmem:[%s11201_s7 + $0x140] sm:$0xff]   ;;  %v8378_v11 = vld [vmem:[%s11201_s7 + $0x168] sm:$0xff]  }
 0x61a   : > { %v5454_v34 = vadd.f32 %v7393_v12, %v5439_v23 }
 0x61c   : > { %v5459_v49 = vmax.f32 %v5453_v55, %v5454_v34  ;;  %v8379_v55 = vld [vmem:[%s11201_s7 + $0x148] sm:$0xff]   ;;  %v8380_v34 = vld [vmem:[%s11201_s7 + $0x170] sm:$0xff]  }
 0x61d   : > { %v5427_v59 = vpop.f32.mrb[252].mxu1  ;;  %v5466_v53 = vld [vmem:[#allocation4] ss:$2 sm:$0xff]  ;;  %v5470_v46 = vld [vmem:[#allocation4 + $0x1] ss:$2 sm:$0xff] }
 0x61e   : > { %5464 = vst.msk [vmem:[#allocation4 + $0x10] sm:$0xff] %vm5461_vm15, %v5459_v49  ;;  %v5440_v9 = vadd.f32 %v5427_v59, %v5276_v21  ;;  %v5429_v41 = vpop.f32.mrb[253].mxu1  ;;  %v5473_v7 = vmax.f32 %v5466_v53, %v5470_v46  ;;  %v8358_v21 = vld [vmem:[%s11201_s7 + $0xb8] sm:$0xff]   ;;  %v8381_v49 = vld [vmem:[%s11201_s7 + $0x150] sm:$0xff]  }
 0x61f   : > { %v5430_v19 = vpop.f32.mrb[254].mxu1  ;;  %v8382_v59 = vld [vmem:[%s11201_s7 + $0x178] sm:$0xff]   ;;  %v8384_v41 = vld [vmem:[%s11201_s7 + $0x1a0] sm:$0xff]   ;;  %v8389_v53 = vld [vmem:[%s11201_s7 + $0x190] sm:$0xff]  }
 0x620   : > { %v5441_v38 = vadd.f32 %v5430_v19, %v5277_v3  ;;  %v5432_v56 = vpop.f32.mrb[255].mxu1  ;;  %v5455_v54 = vadd.f32 %v7393_v12, %v5440_v9  ;;  %v8359_v3 = vld [vmem:[%s11201_s7 + $0x98] sm:$0xff]  }
 0x621   : > { %v8383_v9 = vld [vmem:[%s11201_s7 + $0x158] sm:$0xff]  }
 0x622   : > { %v5456_v27 = vadd.f32 %v7393_v12, %v5441_v38  ;;  %v8385_v38 = vld [vmem:[%s11201_s7 + $0x180] sm:$0xff]   ;;  %v8390_v46 = vld [vmem:[%s11201_s7 + $0x1b8] sm:$0xff]  }
 0x624   : > { %v5460_v30 = vmax.f32 %v5455_v54, %v5456_v27  ;;  %v8386_v54 = vld [vmem:[%s11201_s7 + $0x1a8] sm:$0xff]  }
 0x625   : > { %v8387_v27 = vld [vmem:[%s11201_s7 + $0x188] sm:$0xff]  }
 0x626   : > { %5465 = vst.msk [vmem:[#allocation4 + $0x18] sm:$0xff] %vm5461_vm15, %v5460_v30  ;;  %v8388_v30 = vld [vmem:[%s11201_s7 + $0x1b0] sm:$0xff]  }
 0x62d   : > { %v5468_v57 = vld [vmem:[#allocation4 + $0x10] ss:$2 sm:$0xff]  ;;  %v5472_v20 = vld [vmem:[#allocation4 + $0x11] ss:$2 sm:$0xff] }
 0x62e   : > { %v5474_v50 = vmax.f32 %v5468_v57, %v5472_v20  ;;  %v8391_v57 = vld [vmem:[%s11201_s7 + $0x198] sm:$0xff]   ;;  %v8392_v20 = vld [vmem:[%s11201_s7 + $0x1e0] sm:$0xff]  }
 0x630   : > { %v10836_v29 = vpack.c.bf16 %v5474_v50, %v5473_v7  ;;  %v8393_v50 = vld [vmem:[%s11201_s7 + $0x1c0] sm:$0xff]  }
 0x632   : > { %7938 = vmatmul.mubr.msk.bf16.vlgmr.msra.gmra.mrb[0].mxu1 %vm5461_vm15, %v10836_v29  ;;  %v10844_v0 = vshrl.u32 %v10836_v29, 16  ;;  %v5639_v45 = vrot.slane %v10836_v29, 1  ;;  %v5795_v12 = vrot.slane %v10836_v29, 2  ;;  %v5951_v13 = vrot.slane %v10836_v29, 3 }
 0x633   : > { %7954 = vmatpush3.bf16.msra.mxu1 %v8344_v8  ;;  %7961 = vmatprep.mubr.msk.bf16.mxu1 %vm8479_vm14, %v10849_v58  ;;  %v6107_v23 = vrot.slane %v10836_v29, 4  ;;  %v6263_v56 = vrot.slane %v10836_v29, 5  ;;  %v6419_v8 = vrot.slane %v10836_v29, 6 }
 0x634   : > { %7926 = vmatmul.mubr.msk.bf16.vlgmr.msra.gmra.mrb[16].mxu0 %vm5461_vm15, %v10844_v0  ;;  %7955 = vmatprep.subr.bf16.mxu1 %v10849_v58  ;;  %v5717_v40 = vrot.slane %v10844_v0, 1  ;;  %v5873_v14 = vrot.slane %v10844_v0, 2  ;;  %v6029_v44 = vrot.slane %v10844_v0, 3  ;;  %v6185_v28 = vrot.slane %v10844_v0, 4 }
 0x635   : > { %7942 = vmatpush3.bf16.msra.mxu0 %v8345_v16  ;;  %7949 = vmatprep.mubr.msk.bf16.mxu0 %vm8479_vm14, %v10849_v58  ;;  %v6341_v19 = vrot.slane %v10844_v0, 5  ;;  %v6497_v7 = vrot.slane %v10844_v0, 6  ;;  %v8394_v16 = vld [vmem:[%s11201_s7 + $0x1e8] sm:$0xff]  }
 0x636   : > { %7943 = vmatprep.subr.bf16.mxu0 %v10849_v58 }
 0x637   : > { %7956 = vmatpush3.bf16.msra.mxu1 %v8346_v24  ;;  %v8395_v24 = vld [vmem:[%s11201_s7 + $0x1c8] sm:$0xff]  }
 0x638   : > { %7957 = vmatprep.subr.bf16.mxu1 %v10849_v58 }
 0x639   : > { %7944 = vmatpush3.bf16.msra.mxu0 %v8347_v6  ;;  %v8396_v6 = vld [vmem:[%s11201_s7 + $0x1f0] sm:$0xff]  }
 0x63a   : > { %7945 = vmatprep.subr.bf16.mxu0 %v10849_v58 }
 0x63b   : > { %7958 = vmatpush3.bf16.msra.mxu1 %v8348_v4  ;;  %v8397_v4 = vld [vmem:[%s11201_s7 + $0x1d0] sm:$0xff]  }
 0x63c   : > { %7959 = vmatprep.subr.bf16.mxu1 %v10849_v58 }
 0x63d   : > { %7946 = vmatpush3.bf16.msra.mxu0 %v8349_v39  ;;  %v8398_v39 = vld [vmem:[%s11201_s7 + $0x1f8] sm:$0xff]  }
 0x63e   : > { %7947 = vmatprep.subr.bf16.mxu0 %v10849_v58 }
 0x63f   : > { %7960 = vmatpush3.bf16.msra.mxu1 %v8350_v1  ;;  %v8399_v1 = vld [vmem:[%s11201_s7 + $0x1d8] sm:$0xff]  }
 0x640   : > { %7977 = vmatprep.subr.bf16.mxu1 %v10849_v58 }
 0x641   : > { %7948 = vmatpush3.bf16.msra.mxu0 %v8351_v32  ;;  %v6653_v32 = vrot.slane %v10844_v0, 7  ;;  %v8401_v0 = vld [vmem:[%s11203_s9 + $0x8] sm:$0xff]  }
 0x642   : > { %7962 = vmatmul.mubr.msk.bf16.vlgmr.msra.gmra.mrb[4].mxu1 %vm5461_vm15, %v5717_v40  ;;  %7965 = vmatprep.subr.bf16.mxu0 %v10849_v58  ;;  %v8400_v40 = vld [vmem:[%s11203_s9] sm:$0xff]  }
 0x643   : > { %7978 = vmatpush3.bf16.msra.mxu1 %v8352_v22  ;;  %7985 = vmatprep.mubr.msk.bf16.mxu1 %vm8479_vm14, %v10849_v58  ;;  %v6575_v22 = vrot.slane %v10836_v29, 7  ;;  %v8402_v29 = vld [vmem:[%s11203_s9 + $0x10] sm:$0xff]  }
 0x644   : > { %7950 = vmatmul.mubr.msk.bf16.vlgmr.msra.gmra.mrb[20].mxu0 %vm5461_vm15, %v5639_v45  ;;  %7979 = vmatprep.subr.bf16.mxu1 %v10849_v58 }
 0x645   : > { %7966 = vmatpush3.bf16.msra.mxu0 %v8353_v61  ;;  %7973 = vmatprep.mubr.msk.bf16.mxu0 %vm8479_vm14, %v10849_v58  ;;  %v8403_v61 = vld [vmem:[%s11203_s9 + $0x18] sm:$0xff]  }
 0x646   : > { %7967 = vmatprep.subr.bf16.mxu0 %v10849_v58 }
 0x647   : > { %7980 = vmatpush3.bf16.msra.mxu1 %v8354_v18 }
 0x648   : > { %7981 = vmatprep.subr.bf16.mxu1 %v10849_v58 }
 0x649   : > { %7968 = vmatpush3.bf16.msra.mxu0 %v8355_v15 }
 0x64a   : > { %7969 = vmatprep.subr.bf16.mxu0 %v10849_v58 }
 0x64b   : > { %7982 = vmatpush3.bf16.msra.mxu1 %v8356_v5 }
 0x64c   : > { %7983 = vmatprep.subr.bf16.mxu1 %v10849_v58 }
 0x64d   : > { %7970 = vmatpush3.bf16.msra.mxu0 %v8357_v52 }
 0x64e   : > { %7971 = vmatprep.subr.bf16.mxu0 %v10849_v58 }
 0x64f   : > { %7984 = vmatpush3.bf16.msra.mxu1 %v8358_v21 }
 0x650   : > { %8001 = vmatprep.subr.bf16.mxu1 %v10849_v58 }
 0x651   : > { %7972 = vmatpush3.bf16.msra.mxu0 %v8359_v3 }
 0x652   : > { %7986 = vmatmul.mubr.msk.bf16.vlgmr.msra.gmra.mrb[8].mxu1 %vm5461_vm15, %v5873_v14  ;;  %7989 = vmatprep.subr.bf16.mxu0 %v10849_v58 }
 0x653   : > { %8002 = vmatpush3.bf16.msra.mxu1 %v8360_v60  ;;  %8009 = vmatprep.mubr.msk.bf16.mxu1 %vm8479_vm14, %v10849_v58 }
 0x654   : > { %7974 = vmatmul.mubr.msk.bf16.vlgmr.msra.gmra.mrb[24].mxu0 %vm5461_vm15, %v5795_v12  ;;  %8003 = vmatprep.subr.bf16.mxu1 %v10849_v58 }
 0x655   : > { %7990 = vmatpush3.bf16.msra.mxu0 %v8361_v33  ;;  %7997 = vmatprep.mubr.msk.bf16.mxu0 %vm8479_vm14, %v10849_v58 }
 0x656   : > { %7991 = vmatprep.subr.bf16.mxu0 %v10849_v58 }
 0x657   : > { %8004 = vmatpush3.bf16.msra.mxu1 %v8362_v31 }
 0x658   : > { %8005 = vmatprep.subr.bf16.mxu1 %v10849_v58 }
 0x659   : > { %7992 = vmatpush3.bf16.msra.mxu0 %v8363_v48 }
 0x65a   : > { %7993 = vmatprep.subr.bf16.mxu0 %v10849_v58 }
 0x65b   : > { %8006 = vmatpush3.bf16.msra.mxu1 %v8364_v25 }
 0x65c   : > { %8007 = vmatprep.subr.bf16.mxu1 %v10849_v58 }
 0x65d   : > { %7994 = vmatpush3.bf16.msra.mxu0 %v8365_v47 }
 0x65e   : > { %7995 = vmatprep.subr.bf16.mxu0 %v10849_v58 }
 0x65f   : > { %8008 = vmatpush3.bf16.msra.mxu1 %v8366_v10 }
 0x660   : > { %8025 = vmatprep.subr.bf16.mxu1 %v10849_v58 }
 0x661   : > { %7996 = vmatpush3.bf16.msra.mxu0 %v8367_v2 }
 0x662   : > { %8010 = vmatmul.mubr.msk.bf16.vlgmr.msra.gmra.mrb[12].mxu1 %vm5461_vm15, %v6029_v44  ;;  %8013 = vmatprep.subr.bf16.mxu0 %v10849_v58 }
 0x663   : > { %8026 = vmatpush3.bf16.msra.mxu1 %v8368_v36  ;;  %8033 = vmatprep.mubr.msk.bf16.mxu1 %vm8479_vm14, %v10849_v58 }
 0x664   : > { %7998 = vmatmul.mubr.msk.bf16.vlgmr.msra.gmra.mrb[28].mxu0 %vm5461_vm15, %v5951_v13  ;;  %8027 = vmatprep.subr.bf16.mxu1 %v10849_v58 }
 0x665   : > { %8014 = vmatpush3.bf16.msra.mxu0 %v8369_v43  ;;  %8021 = vmatprep.mubr.msk.bf16.mxu0 %vm8479_vm14, %v10849_v58 }
 0x666   : > { %8015 = vmatprep.subr.bf16.mxu0 %v10849_v58 }
 0x667   : > { %8028 = vmatpush3.bf16.msra.mxu1 %v8370_v26 }
 0x668   : > { %8029 = vmatprep.subr.bf16.mxu1 %v10849_v58 }
 0x669   : > { %8016 = vmatpush3.bf16.msra.mxu0 %v8371_v62 }
 0x66a   : > { %8017 = vmatprep.subr.bf16.mxu0 %v10849_v58 }
 0x66b   : > { %8030 = vmatpush3.bf16.msra.mxu1 %v8372_v51 }
 0x66c   : > { %8031 = vmatprep.subr.bf16.mxu1 %v10849_v58 }
 0x66d   : > { %8018 = vmatpush3.bf16.msra.mxu0 %v8373_v17 }
 0x66e   : > { %8019 = vmatprep.subr.bf16.mxu0 %v10849_v58 }
 0x66f   : > { %8032 = vmatpush3.bf16.msra.mxu1 %v8374_v37 }
 0x670   : > { %8049 = vmatprep.subr.bf16.mxu1 %v10849_v58 }
 0x671   : > { %8020 = vmatpush3.bf16.msra.mxu0 %v8375_v35 }
 0x672   : > { %8034 = vmatmul.mubr.msk.bf16.vlgmr.msra.gmra.mrb[16].mxu1 %vm5461_vm15, %v6185_v28  ;;  %8037 = vmatprep.subr.bf16.mxu0 %v10849_v58 }
 0x673   : > { %8050 = vmatpush3.bf16.msra.mxu1 %v8376_v63  ;;  %8057 = vmatprep.mubr.msk.bf16.mxu1 %vm8479_vm14, %v10849_v58 }
 0x674   : > { %8022 = vmatmul.mubr.msk.bf16.vlgmr.msra.gmra.mrb[32].mxu0 %vm5461_vm15, %v6107_v23  ;;  %8051 = vmatprep.subr.bf16.mxu1 %v10849_v58 }
 0x675   : > { %8038 = vmatpush3.bf16.msra.mxu0 %v8377_v42  ;;  %8045 = vmatprep.mubr.msk.bf16.mxu0 %vm8479_vm14, %v10849_v58 }
 0x676   : > { %8039 = vmatprep.subr.bf16.mxu0 %v10849_v58 }
 0x677   : > { %8052 = vmatpush3.bf16.msra.mxu1 %v8378_v11 }
 0x678   : > { %8053 = vmatprep.subr.bf16.mxu1 %v10849_v58 }
 0x679   : > { %8040 = vmatpush3.bf16.msra.mxu0 %v8379_v55 }
 0x67a   : > { %8041 = vmatprep.subr.bf16.mxu0 %v10849_v58 }
 0x67b   : > { %8054 = vmatpush3.bf16.msra.mxu1 %v8380_v34 }
 0x67c   : > { %8055 = vmatprep.subr.bf16.mxu1 %v10849_v58 }
 0x67d   : > { %8042 = vmatpush3.bf16.msra.mxu0 %v8381_v49 }
 0x67e   : > { %8043 = vmatprep.subr.bf16.mxu0 %v10849_v58 }
 0x67f   : > { %8056 = vmatpush3.bf16.msra.mxu1 %v8382_v59 }
 0x680   : > { %8073 = vmatprep.subr.bf16.mxu1 %v10849_v58 }
 0x681   : > { %8044 = vmatpush3.bf16.msra.mxu0 %v8383_v9 }
 0x682   : > { %8058 = vmatmul.mubr.msk.bf16.vlgmr.msra.gmra.mrb[20].mxu1 %vm5461_vm15, %v6341_v19  ;;  %8061 = vmatprep.subr.bf16.mxu0 %v10849_v58 }
 0x683   : > { %8074 = vmatpush3.bf16.msra.mxu1 %v8384_v41  ;;  %8081 = vmatprep.mubr.msk.bf16.mxu1 %vm8479_vm14, %v10849_v58 }
 0x684   : > { %8046 = vmatmul.mubr.msk.bf16.vlgmr.msra.gmra.mrb[36].mxu0 %vm5461_vm15, %v6263_v56  ;;  %8075 = vmatprep.subr.bf16.mxu1 %v10849_v58 }
 0x685   : > { %8062 = vmatpush3.bf16.msra.mxu0 %v8385_v38  ;;  %8069 = vmatprep.mubr.msk.bf16.mxu0 %vm8479_vm14, %v10849_v58 }
 0x686   : > { %8063 = vmatprep.subr.bf16.mxu0 %v10849_v58 }
 0x687   : > { %8076 = vmatpush3.bf16.msra.mxu1 %v8386_v54 }
 0x688   : > { %8077 = vmatprep.subr.bf16.mxu1 %v10849_v58 }
 0x689   : > { %8064 = vmatpush3.bf16.msra.mxu0 %v8387_v27 }
 0x68a   : > { %8065 = vmatprep.subr.bf16.mxu0 %v10849_v58 }
 0x68b   : > { %8078 = vmatpush3.bf16.msra.mxu1 %v8388_v30 }
 0x68c   : > { %8079 = vmatprep.subr.bf16.mxu1 %v10849_v58 }
 0x68d   : > { %8066 = vmatpush3.bf16.msra.mxu0 %v8389_v53 }
 0x68e   : > { %8067 = vmatprep.subr.bf16.mxu0 %v10849_v58 }
 0x68f   : > { %8080 = vmatpush3.bf16.msra.mxu1 %v8390_v46 }
 0x690   : > { %8097 = vmatprep.subr.bf16.mxu1 %v10849_v58 }
 0x691   : > { %8068 = vmatpush3.bf16.msra.mxu0 %v8391_v57 }
 0x692   : > { %8082 = vmatmul.mubr.msk.bf16.vlgmr.msra.gmra.mrb[24].mxu1 %vm5461_vm15, %v6497_v7  ;;  %8085 = vmatprep.subr.bf16.mxu0 %v10849_v58 }
 0x693   : > { %8098 = vmatpush3.bf16.msra.mxu1 %v8392_v20  ;;  %8105 = vmatprep.mubr.msk.bf16.mxu1 %vm8479_vm14, %v10849_v58 }
 0x694   : > { %8070 = vmatmul.mubr.msk.bf16.vlgmr.msra.gmra.mrb[40].mxu0 %vm5461_vm15, %v6419_v8  ;;  %8099 = vmatprep.subr.bf16.mxu1 %v10849_v58 }
 0x695   : > { %8086 = vmatpush3.bf16.msra.mxu0 %v8393_v50  ;;  %8093 = vmatprep.mubr.msk.bf16.mxu0 %vm8479_vm14, %v10849_v58 }
 0x696   : > { %8087 = vmatprep.subr.bf16.mxu0 %v10849_v58 }
 0x697   : > { %8100 = vmatpush3.bf16.msra.mxu1 %v8394_v16 }
 0x698   : > { %8101 = vmatprep.subr.bf16.mxu1 %v10849_v58 }
 0x699   : > { %8088 = vmatpush3.bf16.msra.mxu0 %v8395_v24 }
 0x69a   : > { %8089 = vmatprep.subr.bf16.mxu0 %v10849_v58 }
 0x69b   : > { %8102 = vmatpush3.bf16.msra.mxu1 %v8396_v6 }
 0x69c   : > { %8103 = vmatprep.subr.bf16.mxu1 %v10849_v58 }
 0x69d   : > { %8090 = vmatpush3.bf16.msra.mxu0 %v8397_v4 }
 0x69e   : > { %8091 = vmatprep.subr.bf16.mxu0 %v10849_v58 }
 0x69f   : > { %8104 = vmatpush3.bf16.msra.mxu1 %v8398_v39 }
 0x6a1   : > { %8092 = vmatpush3.bf16.msra.mxu0 %v8399_v1 }
 0x6a2   : > { %8106 = vmatmul.mubr.msk.bf16.vlgmr.msra.gmra.mrb[28].mxu1 %vm5461_vm15, %v6653_v32  ;;  %8109 = vmatprep.subr.bf16.mxu0 %v10849_v58 }
 0x6a4   : > { %8094 = vmatmul.mubr.msk.bf16.vlgmr.msra.gmra.mrb[44].mxu0 %vm5461_vm15, %v6575_v22 }
 0x6a5   : > { %8117 = vmatprep.mubr.msk.bf16.mxu0 %vm8479_vm14, %v10849_v58  ;;  %8110 = vmatpush3.bf16.msra.mxu0 %v8400_v40 }
 0x6a6   : > { %8111 = vmatprep.subr.bf16.mxu0 %v10849_v58 }
 0x6a9   : > { %8112 = vmatpush3.bf16.msra.mxu0 %v8401_v0 }
 0x6aa   : > { %8113 = vmatprep.subr.bf16.mxu0 %v10849_v58 }
 0x6ad   : > { %8114 = vmatpush3.bf16.msra.mxu0 %v8402_v29 }
 0x6ae   : > { %8115 = vmatprep.subr.bf16.mxu0 %v10849_v58 }
 0x6b1   : > { %8116 = vmatpush3.bf16.msra.mxu0 %v8403_v61 }
 0x705   : > { %v5623_v45 = vpop.f32.mrb[0].mxu1 }
 0x706   : > { %v7939_v18 = vpop.f32.mrb[1].mxu1 }
 0x707   : > { %v5557_v15 = vpop.f32.mrb[16].mxu0  ;;  %v5626_v5 = vpop.f32.mrb[2].mxu1 }
 0x708   : > { %v5624_v52 = vadd.f32 %v5623_v45, %v5557_v15  ;;  %v7927_v21 = vpop.f32.mrb[17].mxu0  ;;  %v7940_v3 = vpop.f32.mrb[3].mxu1 }
 0x709   : > { %v5560_v60 = vpop.f32.mrb[18].mxu0 }
 0x70a   : > { %v7928_v14 = vpop.f32.mrb[19].mxu0 }
 0x715   : > { %v5779_v33 = vpop.f32.mrb[4].mxu1 }
 0x716   : > { %v7963_v12 = vpop.f32.mrb[5].mxu1 }
 0x717   : > { %v5701_v31 = vpop.f32.mrb[20].mxu0  ;;  %v5782_v48 = vpop.f32.mrb[6].mxu1 }
 0x718   : > { %v5707_v25 = vadd.f32 %v5701_v31, %v5624_v52  ;;  %v7951_v58 = vpop.f32.mrb[21].mxu0  ;;  %v7964_v47 = vpop.f32.mrb[7].mxu1  ;;  %v6722_v48 = vld [vmem:[%s11202_s8] sm:$0x1] }
 0x719   : > { %v5704_v10 = vpop.f32.mrb[22].mxu0 }
 0x71a   : > { %v7952_v2 = vpop.f32.mrb[23].mxu0  ;;  %v5785_v36 = vadd.f32 %v5779_v33, %v5707_v25 }
 0x725   : > { %v5935_v44 = vpop.f32.mrb[8].mxu1 }
 0x726   : > { %v7987_v43 = vpop.f32.mrb[9].mxu1 }
 0x727   : > { %v5857_v13 = vpop.f32.mrb[24].mxu0  ;;  %v5938_v26 = vpop.f32.mrb[10].mxu1 }
 0x728   : > { %v5863_v62 = vadd.f32 %v5857_v13, %v5785_v36  ;;  %v7975_v51 = vpop.f32.mrb[25].mxu0  ;;  %v7988_v17 = vpop.f32.mrb[11].mxu1  ;;  %v6733_v36 = vld [vmem:[%s11204_s10] sm:$0x1] }
 0x729   : > { %v5860_v37 = vpop.f32.mrb[26].mxu0 }
 0x72a   : > { %v7976_v35 = vpop.f32.mrb[27].mxu0  ;;  %v5941_v63 = vadd.f32 %v5935_v44, %v5863_v62 }
 0x735   : > { %v6091_v28 = vpop.f32.mrb[12].mxu1 }
 0x736   : > { %v8011_v42 = vpop.f32.mrb[13].mxu1 }
 0x737   : > { %v6013_v23 = vpop.f32.mrb[28].mxu0  ;;  %v6094_v11 = vpop.f32.mrb[14].mxu1 }
 0x738   : > { %v6019_v55 = vadd.f32 %v6013_v23, %v5941_v63  ;;  %v7999_v34 = vpop.f32.mrb[29].mxu0  ;;  %v8012_v49 = vpop.f32.mrb[15].mxu1 }
 0x739   : > { %v6016_v59 = vpop.f32.mrb[30].mxu0 }
 0x73a   : > { %v8000_v9 = vpop.f32.mrb[31].mxu0  ;;  %v6097_v41 = vadd.f32 %v6091_v28, %v6019_v55 }
 0x745   : > { %v6247_v19 = vpop.f32.mrb[16].mxu1 }
 0x746   : > { %v8035_v38 = vpop.f32.mrb[17].mxu1 }
 0x747   : > { %v6169_v56 = vpop.f32.mrb[32].mxu0  ;;  %v6250_v54 = vpop.f32.mrb[18].mxu1 }
 0x748   : > { %v6175_v27 = vadd.f32 %v6169_v56, %v6097_v41  ;;  %v8023_v30 = vpop.f32.mrb[33].mxu0  ;;  %v8036_v53 = vpop.f32.mrb[19].mxu1 }
 0x749   : > { %v6172_v46 = vpop.f32.mrb[34].mxu0 }
 0x74a   : > { %v8024_v57 = vpop.f32.mrb[35].mxu0  ;;  %v6253_v20 = vadd.f32 %v6247_v19, %v6175_v27 }
 0x755   : > { %v6403_v7 = vpop.f32.mrb[20].mxu1 }
 0x756   : > { %v8059_v50 = vpop.f32.mrb[21].mxu1 }
 0x757   : > { %v6325_v8 = vpop.f32.mrb[36].mxu0  ;;  %v6406_v16 = vpop.f32.mrb[22].mxu1 }
 0x758   : > { %v6331_v24 = vadd.f32 %v6325_v8, %v6253_v20  ;;  %v8047_v6 = vpop.f32.mrb[37].mxu0  ;;  %v8060_v4 = vpop.f32.mrb[23].mxu1 }
 0x759   : > { %v6328_v39 = vpop.f32.mrb[38].mxu0 }
 0x75a   : > { %v8048_v1 = vpop.f32.mrb[39].mxu0  ;;  %v6409_v32 = vadd.f32 %v6403_v7, %v6331_v24 }
 0x765   : > { %v6559_v22 = vpop.f32.mrb[24].mxu1 }
 0x766   : > { %v8083_v40 = vpop.f32.mrb[25].mxu1 }
 0x767   : > { %v6481_v0 = vpop.f32.mrb[40].mxu0  ;;  %v6562_v29 = vpop.f32.mrb[26].mxu1 }
 0x768   : > { %v6487_v61 = vadd.f32 %v6481_v0, %v6409_v32  ;;  %v8071_v45 = vpop.f32.mrb[41].mxu0  ;;  %v8084_v18 = vpop.f32.mrb[27].mxu1 }
 0x769   : > { %v6484_v15 = vpop.f32.mrb[42].mxu0 }
 0x76a   : > { %v8072_v5 = vpop.f32.mrb[43].mxu0  ;;  %v6565_v52 = vadd.f32 %v6559_v22, %v6487_v61 }
 0x775   : > { %v6715_v21 = vpop.f32.mrb[28].mxu1 }
 0x776   : > { %v8107_v3 = vpop.f32.mrb[29].mxu1 }
 0x777   : > { %v6637_v60 = vpop.f32.mrb[44].mxu0  ;;  %v6718_v14 = vpop.f32.mrb[30].mxu1 }
 0x778   : > { %v6643_v33 = vadd.f32 %v6637_v60, %v6565_v52  ;;  %v8095_v12 = vpop.f32.mrb[45].mxu0  ;;  %v8108_v31 = vpop.f32.mrb[31].mxu1 }
 0x779   : > { %v6640_v25 = vpop.f32.mrb[46].mxu0 }
 0x77a   : > { %v6721_v58 = vadd.f32 %v6715_v21, %v6643_v33  ;;  %v8096_v47 = vpop.f32.mrb[47].mxu0 }
 0x77c   : > { %v6723_v10 = vadd.f32 %v6722_v48, %v6721_v58 }
 0x77e   : > { %v6724_v2 = vpack.c.bf16 %v6723_v10, %v6723_v10 }
 0x780   : > { %8118 = vmatmul.mubr.msk.bf16.vlgmr.msra.gmra.mrb[48].mxu0 %vm5461_vm15, %v6724_v2 }
 0x853   : > { %v6795_v44 = vpop.f32.mrb[48].mxu0 }
 0x854   : > { %v6796_v43 = vadd.f32 %v6795_v44, %v6733_v36  ;;  %v8119_v13 = vpop.f32.mrb[49].mxu0 }
 0x855   : > { %v6798_v26 = vpop.f32.mrb[50].mxu0 }
 0x856   : > { %6801 = vst [vmem:[%s378_s14] sm:$0x1] %v6796_v43  ;;  %v8120_v62 = vpop.f32.mrb[51].mxu0 }
 0x857   : > { %8421 = shalt.err (!%p8418_p3)
}
 0x858   : > { %s8422_s22 = scalar_lea.hbm %s11152_s25, 16  ;;  %s8426_s24 = scalar_lea.hbm %s11205_s11, 32 }
 0x859   : > { %p8423_p4 = scmp.ne.s32.totalorder %s11152_s25, %s8422_s22  ;;  %p8427_p9 = scmp.lt.u32.totalorder %s11152_s25, %s11205_s11 }
 0x85a   : > { %p8428_p10 = scmp.lt.u32.totalorder %s8426_s24, %s8422_s22  ;;  %p8430_p12 = scmp.lt.u32.totalorder %s8422_s22, %s11152_s25 }
 0x85b   : > { %p8424_p7 = pnand %p8423_p4, %p8579_p5 }
 0x85c   : > { %p8429_p11 = por %p8428_p10, %p8427_p9 }
 0x85d   : > { %p8425_p8 = pneg %p8424_p7 }
 0x85e   : > { %p8431_p13 = por %p8430_p12, %p8429_p11 }
 0x860   : > { %p8432_p0 = pnand %p8431_p13, %p8425_p8 }
 0x862   : > { %8435 = shalt.err (!%p8432_p0)
}
 0x863   : > { %8121 = dma.vmem_to_hbm [thread:$0]  (%p8579_p5), %s11154_s15, 16, %s11152_s25, %s6803_s30  }
 0x864 PF: > { %p8127_p1 = scmp.ge.s32.totalorder %s8470_s20, 2  ;;  %s6827_s21 = sand.u32 1, %s8458_s17  }
 0x865   : > { %s6828_s16 = scalar_lea.sflag [#allocation8], %s6827_s21 }
 0x866   : > { %p8124_p2 = pnand %p8127_p1, %p8583_p6 }
 0x868   : > { %8453 = dma.done.wait (!%p8124_p2), %s6828_s16, 16  }
 0x869   : > { %8455 = vsyncadd (!%p8124_p2), %s6828_s16, 4294967280  ;;  %p21_p3 = scmp.ge.s32.totalorder %s8566_s23, 4   ;;  %s11269_s17 = smov %s8462_s18 }
 0x86a   : > { %s11270_s18 = smov %s8466_s19  ;;  %s11271_s19 = smov %s8577_s26 }
 0x86b   : > { %s11272_s20 = smov %s8566_s23  ;;  %23 = sbr.rel (!%p21_p3) target bundleno = 3 (0x3), region = 205 }
 0x872   :  { %6832 = vsyncpa [#allocation8], 1 }
 0x873   :  { %6834 = vsyncpa [#allocation8 + $0x1], 1 }

</bundles_post_ra>
